<compile_context>
chip_gen: v7x
topology: tpu7x:2x2x1
jax: 0.10.0
libtpu: 0.0.40
codegen_flags: <defaults>
</compile_context>

<pallas_src>
import math
import functools

import jax
import jax.numpy as jnp
from jax.experimental import pallas as pl
from jax.experimental.pallas import tpu as pltpu


# --------------------------------------------------------------------------
# per-generation configuration
# --------------------------------------------------------------------------

def _detect_vmem_limit_bytes():
    """~75% of physical VMEM: ~96 MiB on v5e/v6e (128 MiB), ~48 MiB on v7x."""
    try:
        info = pltpu.get_tpu_info()
        cap = getattr(info, "vmem_capacity_bytes", None)
        if cap:
            return int(cap) * 3 // 4
    except Exception:
        pass
    return 48 * 1024 * 1024          # safe everywhere (incl. v7x 64 MiB)


def _detect_bf16_exp():
    """bf16 EUP exponentials only on v6e / v7x; v5e and older stay f32."""
    try:
        kind = jax.devices()[0].device_kind.lower()
    except Exception:
        return False
    return ("v6" in kind) or ("v7" in kind)


VMEM_LIMIT = _detect_vmem_limit_bytes()
EXP_DTYPE = jnp.bfloat16 if _detect_bf16_exp() else jnp.float32
BIG_VMEM = VMEM_LIMIT > 64 * 1024 * 1024


def _pick_tile(n, target, mult):
    """Largest divisor of n that is <= target and a multiple of `mult`,
    falling back to the full dimension (a full dim is always a legal block)."""
    if n <= target:
        return n
    t = (target // mult) * mult
    while t >= mult:
        if n % t == 0:
            return t
        t -= mult
    return n


# --------------------------------------------------------------------------
# backbone: non-overlapping patch conv (patchify + matmul + bias + relu)
# inputs / weights bf16, f32 accumulate, bf16 store
# --------------------------------------------------------------------------

def _patch_conv_kernel(x_ref, w_ref, b_ref, o_ref):
    y = jnp.dot(x_ref[0], w_ref[...],
                preferred_element_type=jnp.float32) + b_ref[...]
    o_ref[0] = jnp.maximum(y, 0.0).astype(o_ref.dtype)


def patch_conv(x, w, b):
    N, L, K = x.shape
    C = w.shape[1]
    tl = _pick_tile(L, 1024, 8)
    return pl.pallas_call(
        _patch_conv_kernel,
        out_shape=jax.ShapeDtypeStruct((N, L, C), jnp.bfloat16),
        grid=(N, L // tl),
        in_specs=[
            pl.BlockSpec((1, tl, K), lambda n, l: (n, l, 0)),
            pl.BlockSpec((K, C), lambda n, l: (0, 0)),
            pl.BlockSpec((1, C), lambda n, l: (0, 0)),
        ],
        out_specs=pl.BlockSpec((1, tl, C), lambda n, l: (n, l, 0)),
        compiler_params=pltpu.CompilerParams(
            dimension_semantics=("parallel", "parallel"),
            vmem_limit_bytes=VMEM_LIMIT),
    )(x, w, b)


# --------------------------------------------------------------------------
# FICAS: fully fused PE-add + QKV projection + flash-style cross attention
# + output projection + CAS score head.  q/k/v never touch HBM.
# Both directions (0->1 and 1->0) in one pallas_call via the partner index_map.
# --------------------------------------------------------------------------

def _attn_kernel(fq_ref, fp_ref, peq_ref, pek_ref, wqkv_ref, wo_ref,
                 wcas_ref, bcas_ref, out_ref, cas_ref,
                 q_sc, m_sc, l_sc, acc_sc, *, sm_scale, exp_dtype):
    ki = pl.program_id(2)

    @pl.when(ki == 0)
    def _():
        m_sc[...] = jnp.full(m_sc.shape, -jnp.inf, jnp.float32)
        l_sc[...] = jnp.zeros(l_sc.shape, jnp.float32)
        acc_sc[...] = jnp.zeros(acc_sc.shape, jnp.float32)
        xq = fq_ref[0] + peq_ref[...]                       # bf16 (tq, C)
        q_sc[...] = jnp.dot(xq, wqkv_ref[0],
                            preferred_element_type=jnp.float32
                            ).astype(jnp.bfloat16)

    # PE-add + k/v projections for the partner key tile (C is tiny -> MXU free)
    xp = fp_ref[0] + pek_ref[...]                           # bf16 (tk, C)
    k = jnp.dot(xp, wqkv_ref[1],
                preferred_element_type=jnp.float32).astype(jnp.bfloat16)
    v = jnp.dot(xp, wqkv_ref[2],
                preferred_element_type=jnp.float32).astype(jnp.bfloat16)

    s = jax.lax.dot_general(q_sc[...], k, (((1,), (1,)), ((), ())),
                            preferred_element_type=jnp.float32) * sm_scale

    m_prev = m_sc[...]
    m_new = jnp.maximum(m_prev, jnp.max(s, axis=-1, keepdims=True))
    alpha = jnp.exp(m_prev - m_new)
    p = jnp.exp((s - m_new).astype(exp_dtype))              # bf16 exp on v6e/v7x
    l_sc[...] = alpha * l_sc[...] + jnp.sum(
        p.astype(jnp.float32), axis=-1, keepdims=True)
    acc_sc[...] = alpha * acc_sc[...] + jnp.dot(
        p.astype(jnp.bfloat16), v, preferred_element_type=jnp.float32)
    m_sc[...] = m_new

    @pl.when(ki == pl.num_programs(2) - 1)
    def _():
        o = acc_sc[...] * pl.reciprocal(l_sc[...], approx=True)
        xq = fq_ref[0] + peq_ref[...]                       # residual = PE-added feat
        out = xq.astype(jnp.float32) + jnp.dot(
            o.astype(jnp.bfloat16), wo_ref[...],
            preferred_element_type=jnp.float32)
        out_bf = out.astype(jnp.bfloat16)
        out_ref[0] = out_bf
        # CAS head, lane-dense (1, tq)
        logit = jax.lax.dot_general(wcas_ref[...], out_bf,
                                    (((1,), (1,)), ((), ())),
                                    preferred_element_type=jnp.float32)
        cas_ref[0] = jax.nn.sigmoid(logit + bcas_ref[...])


def ficas_attention(feat, pe, wqkv, wo, wcas_row, bcas, num_pairs):
    NB, L, C = feat.shape
    B = num_pairs
    tq = _pick_tile(L, 512 if BIG_VMEM else 256, 128)
    tk = _pick_tile(L, 1024, 128)
    nq, nk = L // tq, L // tk

    def partner(n):
        return (n + B) % NB

    out, cas = pl.pallas_call(
        functools.partial(_attn_kernel, sm_scale=1.0 / math.sqrt(C),
                          exp_dtype=EXP_DTYPE),
        out_shape=(jax.ShapeDtypeStruct((NB, L, C), jnp.bfloat16),
                   jax.ShapeDtypeStruct((NB, 1, L), jnp.float32)),
        grid=(NB, nq, nk),
        in_specs=[
            pl.BlockSpec((1, tq, C), lambda n, qi, ki: (n, qi, 0)),           # feat_q
            pl.BlockSpec((1, tk, C), lambda n, qi, ki: (partner(n), ki, 0)),  # feat_kv
            pl.BlockSpec((tq, C), lambda n, qi, ki: (qi, 0)),                 # pe (q)
            pl.BlockSpec((tk, C), lambda n, qi, ki: (ki, 0)),                 # pe (k)
            pl.BlockSpec((3, C, C), lambda n, qi, ki: (0, 0, 0)),             # wqkv
            pl.BlockSpec((C, C), lambda n, qi, ki: (0, 0)),                   # wo
            pl.BlockSpec((1, C), lambda n, qi, ki: (0, 0)),                   # wcas
            pl.BlockSpec((1, 1), lambda n, qi, ki: (0, 0)),                   # bcas
        ],
        out_specs=(
            pl.BlockSpec((1, tq, C), lambda n, qi, ki: (n, qi, 0)),
            pl.BlockSpec((1, 1, tq), lambda n, qi, ki: (n, 0, qi)),
        ),
        scratch_shapes=[
            pltpu.VMEM((tq, C), jnp.bfloat16),   # q (computed once per qi)
            pltpu.VMEM((tq, 1), jnp.float32),    # running max
            pltpu.VMEM((tq, 1), jnp.float32),    # running denom
            pltpu.VMEM((tq, C), jnp.float32),    # running acc
        ],
        compiler_params=pltpu.CompilerParams(
            dimension_semantics=("parallel", "parallel", "arbitrary"),
            vmem_limit_bytes=VMEM_LIMIT),
    )(feat, feat, pe, pe, wqkv, wo, wcas_row, bcas)
    return out, cas


# --------------------------------------------------------------------------
# CoarseModule: dual-softmax confidence matrix via log-sum-exp, fully tiled in
# rows AND columns.  conf = exp(2*s - row_lse - col_lse), stored bf16.
# --------------------------------------------------------------------------

def _lse_kernel(a_ref, b_ref, lse_ref, m_sc, s_sc, *, inv_temp, exp_dtype):
    ri = pl.program_id(2)

    @pl.when(ri == 0)
    def _():
        m_sc[...] = jnp.full(m_sc.shape, -jnp.inf, jnp.float32)
        s_sc[...] = jnp.zeros(s_sc.shape, jnp.float32)

    s = jax.lax.dot_general(a_ref[0], b_ref[0], (((1,), (1,)), ((), ())),
                            preferred_element_type=jnp.float32) * inv_temp
    m_prev = m_sc[...]                                      # (1, tb)
    m_new = jnp.maximum(m_prev, jnp.max(s, axis=0, keepdims=True))
    p = jnp.exp((s - m_new).astype(exp_dtype))
    s_sc[...] = s_sc[...] * jnp.exp(m_prev - m_new) + jnp.sum(
        p.astype(jnp.float32), axis=0, keepdims=True)
    m_sc[...] = m_new

    @pl.when(ri == pl.num_programs(2) - 1)
    def _():
        lse_ref[0] = m_sc[...] + jnp.log(s_sc[...])


def _pairwise_lse(a, b, inv_temp):
    """LSE over rows of (a @ b^T * inv_temp) -> (N, 1, Lb), lane-dense."""
    N, La, C = a.shape
    Lb = b.shape[1]
    ta = _pick_tile(La, 512, 8)
    tb = _pick_tile(Lb, 1024 if BIG_VMEM else 512, 128)
    return pl.pallas_call(
        functools.partial(_lse_kernel, inv_temp=inv_temp, exp_dtype=EXP_DTYPE),
        out_shape=jax.ShapeDtypeStruct((N, 1, Lb), jnp.float32),
        grid=(N, Lb // tb, La // ta),
        in_specs=[
            pl.BlockSpec((1, ta, C), lambda n, bi, ai: (n, ai, 0)),
            pl.BlockSpec((1, tb, C), lambda n, bi, ai: (n, bi, 0)),
        ],
        out_specs=pl.BlockSpec((1, 1, tb), lambda n, bi, ai: (n, 0, bi)),
        scratch_shapes=[pltpu.VMEM((1, tb), jnp.float32),
                        pltpu.VMEM((1, tb), jnp.float32)],
        compiler_params=pltpu.CompilerParams(
            dimension_semantics=("parallel", "parallel", "arbitrary"),
            vmem_limit_bytes=VMEM_LIMIT),
    )(a, b)


def _conf_kernel(f0_ref, f1_ref, rl_ref, cl_ref, o_ref, *, inv_temp, exp_dtype):
    s = jax.lax.dot_general(f0_ref[0], f1_ref[0], (((1,), (1,)), ((), ())),
                            preferred_element_type=jnp.float32) * inv_temp
    rl = rl_ref[0]                                          # (tr, 1)
    cl = cl_ref[0]                                          # (1, tc)
    arg = (s + s) - rl - cl                                 # row_soft * col_soft
    o_ref[0] = jnp.exp(arg.astype(exp_dtype)).astype(o_ref.dtype)


def coarse_dual_softmax(f0, f1, temperature=0.1):
    N, L0, C = f0.shape
    L1 = f1.shape[1]
    inv_temp = 1.0 / (float(C) * temperature)

    col_lse = _pairwise_lse(f0, f1, inv_temp)               # (N, 1, L1)
    row_lse = _pairwise_lse(f1, f0, inv_temp)               # (N, 1, L0)
    row_lse_t = jnp.transpose(row_lse, (0, 2, 1))           # (N, L0, 1), tiny

    tr = _pick_tile(L0, 512 if BIG_VMEM else 256, 8)
    tc = _pick_tile(L1, 1024 if BIG_VMEM else 512, 128)
    conf = pl.pallas_call(
        functools.partial(_conf_kernel, inv_temp=inv_temp, exp_dtype=EXP_DTYPE),
        out_shape=jax.ShapeDtypeStruct((N, L0, L1), jnp.bfloat16),
        grid=(N, L0 // tr, L1 // tc),
        in_specs=[
            pl.BlockSpec((1, tr, C), lambda n, r, c: (n, r, 0)),
            pl.BlockSpec((1, tc, C), lambda n, r, c: (n, c, 0)),
            pl.BlockSpec((1, tr, 1), lambda n, r, c: (n, r, 0)),
            pl.BlockSpec((1, 1, tc), lambda n, r, c: (n, 0, c)),
        ],
        out_specs=pl.BlockSpec((1, tr, tc), lambda n, r, c: (n, r, c)),
        compiler_params=pltpu.CompilerParams(
            dimension_semantics=("parallel", "parallel", "parallel"),
            vmem_limit_bytes=VMEM_LIMIT),
    )(f0, f1, row_lse_t, col_lse)
    return conf


# --------------------------------------------------------------------------
# FineModule: per-window correlation + soft-argmax.
# Lw on lanes; single broadcasted multiply+reduce over Cf; coordinates hoisted.
# --------------------------------------------------------------------------

def _fine_kernel(c0_ref, w1_ref, coord_ref, o_ref, *, inv_sqrt_cf):
    c0 = c0_ref[0].astype(jnp.float32)                      # (Cf, tlw)
    w1 = w1_ref[0].astype(jnp.float32)                      # (WW, Cf, tlw)
    corr = jnp.sum(w1 * c0[None], axis=1) * inv_sqrt_cf     # (WW, tlw)

    m = jnp.max(corr, axis=0, keepdims=True)
    p = jnp.exp(corr - m)
    heat = p * pl.reciprocal(jnp.sum(p, axis=0, keepdims=True), approx=True)

    coords = coord_ref[...]                                 # (WW, 2) constant
    cx = coords[:, 0:1]
    cy = coords[:, 1:2]
    ex = jnp.sum(heat * cx, axis=0, keepdims=True)          # (1, tlw)
    ey = jnp.sum(heat * cy, axis=0, keepdims=True)
    o_ref[0] = jnp.concatenate([ex, ey], axis=0)            # (2, tlw)


def fine_match(center0, win1, coords, ww):
    B, Cf, Lw = center0.shape
    WW = ww * ww
    tlw = _pick_tile(Lw, 256, 128)
    return pl.pallas_call(
        functools.partial(_fine_kernel, inv_sqrt_cf=1.0 / math.sqrt(Cf)),
        out_shape=jax.ShapeDtypeStruct((B, 2, Lw), jnp.float32),
        grid=(B, Lw // tlw),
        in_specs=[
            pl.BlockSpec((1, Cf, tlw), lambda n, l: (n, 0, l)),
            pl.BlockSpec((1, WW, Cf, tlw), lambda n, l: (n, 0, 0, l)),
            pl.BlockSpec((WW, 2), lambda n, l: (0, 0)),
        ],
        out_specs=pl.BlockSpec((1, 2, tlw), lambda n, l: (n, 0, l)),
        compiler_params=pltpu.CompilerParams(
            dimension_semantics=("parallel", "parallel"),
            vmem_limit_bytes=VMEM_LIMIT),
    )(center0, win1, coords)


# --------------------------------------------------------------------------
# JAX glue (hierarchical patchify, PE table, parameter setup)
# --------------------------------------------------------------------------

def patchify_hier(x, so=4, si=2):
    """NHWC -> (N, L8, so*so, si*si*C) with window-major token ordering so
    both backbone convs and the fine-module windows are contiguous reshapes."""
    N, H, W, C = x.shape
    s = so * si
    h8, w8 = H // s, W // s
    x = x.reshape(N, h8, so, si, w8, so, si, C)
    x = x.transpose(0, 1, 4, 2, 5, 3, 6, 7)        # (N,h8,w8,so_i,so_j,si_i,si_j,C)
    return x.reshape(N, h8 * w8, so * so, si * si * C)


def make_sine_pe(d_model, h, w):
    """LoFTR-style PositionEncodingSine, flattened to (h*w, d_model)."""
    pe = jnp.zeros((d_model, h, w), jnp.float32)
    y_pos = jnp.cumsum(jnp.ones((h, w), jnp.float32), axis=0)[None]
    x_pos = jnp.cumsum(jnp.ones((h, w), jnp.float32), axis=1)[None]
    div = jnp.exp(
        jnp.arange(0, d_model // 2, 2, dtype=jnp.float32)
        * (-math.log(10000.0) / (d_model // 2)))[:, None, None]
    pe = pe.at[0::4].set(jnp.sin(x_pos * div))
    pe = pe.at[1::4].set(jnp.cos(x_pos * div))
    pe = pe.at[2::4].set(jnp.sin(y_pos * div))
    pe = pe.at[3::4].set(jnp.cos(y_pos * div))
    return pe.transpose(1, 2, 0).reshape(h * w, d_model)


def init_params(key, c_in=3, c_fine=16, d_model=32):
    ks = jax.random.split(key, 8)
    s = 0.1
    return {
        "w1": s * jax.random.normal(ks[0], (2 * 2 * c_in, c_fine), jnp.float32),
        "b1": jnp.zeros((1, c_fine), jnp.float32),
        "w2": s * jax.random.normal(ks[1], (4 * 4 * c_fine, d_model), jnp.float32),
        "b2": jnp.zeros((1, d_model), jnp.float32),
        "wq": s * jax.random.normal(ks[2], (d_model, d_model), jnp.float32),
        "wk": s * jax.random.normal(ks[3], (d_model, d_model), jnp.float32),
        "wv": s * jax.random.normal(ks[4], (d_model, d_model), jnp.float32),
        "wo": s * jax.random.normal(ks[5], (d_model, d_model), jnp.float32),
        "wcas": s * jax.random.normal(ks[6], (1, d_model), jnp.float32),
        "bcas": jnp.zeros((1, 1), jnp.float32),
    }


def adamatcher_forward(color0_nchw, color1_nchw, params):
    # layout: PyTorch NCHW -> NHWC for all kernel work.
    color0 = jnp.transpose(color0_nchw, (0, 2, 3, 1)).astype(jnp.float32)
    color1 = jnp.transpose(color1_nchw, (0, 2, 3, 1)).astype(jnp.float32)
    B, H, W, _ = color0.shape
    c_fine, d_model = params["w1"].shape[1], params["w2"].shape[1]
    ww = 4
    WW = ww * ww

    # weights cast to bf16 once here (not per grid step inside the kernels)
    w1 = params["w1"].astype(jnp.bfloat16)
    w2 = params["w2"].astype(jnp.bfloat16)
    wqkv = jnp.stack([params["wq"], params["wk"], params["wv"]],
                     axis=0).astype(jnp.bfloat16)           # (3, C, C)
    wo = params["wo"].astype(jnp.bfloat16)
    wcas = params["wcas"].astype(jnp.bfloat16)

    # ---- backbone (shared weights, both images stacked like the same-size path)
    imgs = jnp.concatenate([color0, color1], axis=0).astype(jnp.bfloat16)
    NB = 2 * B
    xh = patchify_hier(imgs, so=ww, si=2)                   # (NB, L8, WW, 12)
    L8 = xh.shape[1]
    h8, w8 = H // (2 * ww), W // (2 * ww)

    x2 = xh.reshape(NB, L8 * WW, 2 * 2 * 3)                 # contiguous reshape
    feat_d2 = patch_conv(x2, w1, params["b1"])              # (NB, L8*WW, Cf) bf16
    x8 = feat_d2.reshape(NB, L8, WW * c_fine)               # contiguous reshape
    feat_d8 = patch_conv(x8, w2, params["b2"])              # (NB, L8, C) bf16

    # ---- positional encoding (table only; add is fused into attention)
    pe = make_sine_pe(d_model, h8, w8).astype(jnp.bfloat16) # (L8, C)

    # ---- FICAS: fused PE + QKV + flash cross attention + CAS head
    out, cas = ficas_attention(feat_d8, pe, wqkv, wo, wcas, params["bcas"], B)
    mask_feat0, mask_feat1 = out[:B], out[B:]
    cas_score0 = jnp.transpose(cas[:B], (0, 2, 1))          # (B, L8, 1)
    cas_score1 = jnp.transpose(cas[B:], (0, 2, 1))

    # ---- coarse module: row+column tiled dual-softmax confidence matrix (bf16)
    conf_matrix = coarse_dual_softmax(mask_feat0, mask_feat1, temperature=0.1)
    # TODO(synk): mutual-NN filtering / confidence thresholding (data-dependent
    #             match selection) is not reproduced here.

    # ---- fine module: per-window correlation + soft-argmax
    win = feat_d2.reshape(NB, L8, WW, c_fine)               # window-major already
    win0 = jnp.transpose(win[:B], (0, 2, 3, 1))             # (B, WW, Cf, L8)
    win1 = jnp.transpose(win[B:], (0, 2, 3, 1))
    # TODO(synk): the reference gathers the *matched* window in image1 per coarse
    #             match (data-dependent gather); the co-located window is used here.
    center_idx = (ww // 2) * ww + (ww // 2)
    center0 = win0[:, center_idx]                           # (B, Cf, L8)

    widx = jnp.arange(WW)
    cx = (widx % ww).astype(jnp.float32) / (ww - 1) * 2.0 - 1.0
    cy = (widx // ww).astype(jnp.float32) / (ww - 1) * 2.0 - 1.0
    coords = jnp.stack([cx, cy], axis=1)                    # (WW, 2) constant

    expec_f = fine_match(center0, win1, coords, ww)         # (B, 2, L8)
    expec_f = jnp.transpose(expec_f, (0, 2, 1))             # (B, L8, 2)

    return conf_matrix, cas_score0, cas_score1, expec_f


# --------------------------------------------------------------------------

if __name__ == "__main__":
    key = jax.random.PRNGKey(0)
    k0, k1, kp = jax.random.split(key, 3)

    B, H, W = 2, 32, 32
    color0 = jax.random.normal(k0, (B, 3, H, W), jnp.float32)  # NCHW like torch
    color1 = jax.random.normal(k1, (B, 3, H, W), jnp.float32)
    params = init_params(kp)

    conf, cas0, cas1, expec = jax.jit(adamatcher_forward)(color0, color1, params)
    jax.block_until_ready((conf, cas0, cas1, expec))

    L8 = (H // 8) * (W // 8)
    assert conf.shape == (B, L8, L8)
    assert cas0.shape == (B, L8, 1) and cas1.shape == (B, L8, 1)
    assert expec.shape == (B, L8, 2)
    conf32 = conf.astype(jnp.float32)
    assert bool(jnp.all(jnp.isfinite(conf32)))
    assert bool(jnp.all(conf32 >= 0.0))
    assert bool(jnp.all(jnp.isfinite(expec)))
    assert bool(jnp.all(jnp.isfinite(cas0))) and bool(jnp.all(jnp.isfinite(cas1)))
    print("KERNEL_OK")
</pallas_src>

<mosaic_0001>
module attributes {stable_mosaic.version = 11 : i64} {
  func.func @_patch_conv_kernel(%arg0: i32, %arg1: i32, %arg2: memref<1x256x12xbf16, #tpu.memory_space<vmem>>, %arg3: memref<12x16xbf16, #tpu.memory_space<vmem>>, %arg4: memref<1x16xf32, #tpu.memory_space<vmem>>, %arg5: memref<1x256x16xbf16, #tpu.memory_space<vmem>>) attributes {dimension_semantics = [#tpu.dimension_semantics<parallel>, #tpu.dimension_semantics<parallel>], iteration_bounds = array<i64: 4, 1>, scalar_prefetch = 0 : i64, scratch_operands = 0 : i64, tpu.core_type = #tpu.core_type<tc>, window_params = [{transform_indices = @transform_0, window_bounds = array<i64: 1, 256, 12>}, {pipeline_mode = #tpu.pipeline_mode<synchronous>, transform_indices = @transform_1, window_bounds = array<i64: 12, 16>}, {pipeline_mode = #tpu.pipeline_mode<synchronous>, transform_indices = @transform_2, window_bounds = array<i64: 1, 16>}, {transform_indices = @transform_3, window_bounds = array<i64: 1, 256, 16>}]} {
    %c0 = arith.constant 0 : index
    %c0_0 = arith.constant 0 : index
    %c0_1 = arith.constant 0 : index
    %0 = vector.load %arg2[%c0, %c0_0, %c0_1] : memref<1x256x12xbf16, #tpu.memory_space<vmem>>, vector<1x256x12xbf16>
    %1 = vector.shape_cast %0 : vector<1x256x12xbf16> to vector<256x12xbf16>
    %c0_2 = arith.constant 0 : index
    %c0_3 = arith.constant 0 : index
    %2 = vector.load %arg3[%c0_2, %c0_3] : memref<12x16xbf16, #tpu.memory_space<vmem>>, vector<12x16xbf16>
    %cst = arith.constant dense<0.000000e+00> : vector<256x16xf32>
    %3 = tpu.matmul %1, %2, %cst {dimension_numbers = #tpu.dot_dimension_numbers<[1], [0], [0], [1], [0, 0, 1, 1], [], []>} : vector<256x12xbf16>, vector<12x16xbf16>, vector<256x16xf32> -> vector<256x16xf32>
    %c0_4 = arith.constant 0 : index
    %c0_5 = arith.constant 0 : index
    %4 = vector.load %arg4[%c0_4, %c0_5] : memref<1x16xf32, #tpu.memory_space<vmem>>, vector<1x16xf32>
    %5 = vector.broadcast %4 : vector<1x16xf32> to vector<256x16xf32>
    %6 = arith.addf %3, %5 : vector<256x16xf32>
    %cst_6 = arith.constant 0.000000e+00 : f32
    %7 = vector.broadcast %cst_6 : f32 to vector<256x16xf32>
    %8 = arith.maximumf %6, %7 : vector<256x16xf32>
    %9 = arith.truncf %8 : vector<256x16xf32> to vector<256x16xbf16>
    %c0_7 = arith.constant 0 : index
    %c0_8 = arith.constant 0 : index
    %c0_9 = arith.constant 0 : index
    %10 = vector.load %arg5[%c0_7, %c0_8, %c0_9] : memref<1x256x16xbf16, #tpu.memory_space<vmem>>, vector<1x256x16xbf16>
    %11 = vector.shape_cast %10 : vector<1x256x16xbf16> to vector<256x16xbf16>
    %12 = vector.shape_cast %9 : vector<256x16xbf16> to vector<1x256x16xbf16>
    tpu.vector_store %arg5[%c0_7, %c0_8, %c0_9], %12 {strides = array<i32>} : memref<1x256x16xbf16, #tpu.memory_space<vmem>>, vector<1x256x16xbf16>,
    return
  }
  func.func @transform_0(%arg0: i32, %arg1: i32) -> (i32, i32, i32) {
    %c0_i32 = arith.constant 0 : i32
    %c0_i32_0 = arith.constant 0 : i32
    return %arg0, %arg1, %c0_i32 : i32, i32, i32
  }
  func.func @transform_1(%arg0: i32, %arg1: i32) -> (i32, i32) {
    %c0_i32 = arith.constant 0 : i32
    %c0_i32_0 = arith.constant 0 : i32
    %c0_i32_1 = arith.constant 0 : i32
    return %c0_i32, %c0_i32_0 : i32, i32
  }
  func.func @transform_2(%arg0: i32, %arg1: i32) -> (i32, i32) {
    %c0_i32 = arith.constant 0 : i32
    %c0_i32_0 = arith.constant 0 : i32
    %c0_i32_1 = arith.constant 0 : i32
    return %c0_i32, %c0_i32_0 : i32, i32
  }
  func.func @transform_3(%arg0: i32, %arg1: i32) -> (i32, i32, i32) {
    %c0_i32 = arith.constant 0 : i32
    %c0_i32_0 = arith.constant 0 : i32
    return %arg0, %arg1, %c0_i32 : i32, i32, i32
  }
}

module attributes {stable_mosaic.version = 11 : i64} {
  func.func @_patch_conv_kernel(%arg0: i32, %arg1: i32, %arg2: memref<1x16x256xbf16, #tpu.memory_space<vmem>>, %arg3: memref<256x32xbf16, #tpu.memory_space<vmem>>, %arg4: memref<1x32xf32, #tpu.memory_space<vmem>>, %arg5: memref<1x16x32xbf16, #tpu.memory_space<vmem>>) attributes {dimension_semantics = [#tpu.dimension_semantics<parallel>, #tpu.dimension_semantics<parallel>], iteration_bounds = array<i64: 4, 1>, scalar_prefetch = 0 : i64, scratch_operands = 0 : i64, tpu.core_type = #tpu.core_type<tc>, window_params = [{transform_indices = @transform_0, window_bounds = array<i64: 1, 16, 256>}, {pipeline_mode = #tpu.pipeline_mode<synchronous>, transform_indices = @transform_1, window_bounds = array<i64: 256, 32>}, {pipeline_mode = #tpu.pipeline_mode<synchronous>, transform_indices = @transform_2, window_bounds = array<i64: 1, 32>}, {transform_indices = @transform_3, window_bounds = array<i64: 1, 16, 32>}]} {
    %c0 = arith.constant 0 : index
    %c0_0 = arith.constant 0 : index
    %c0_1 = arith.constant 0 : index
    %0 = vector.load %arg2[%c0, %c0_0, %c0_1] : memref<1x16x256xbf16, #tpu.memory_space<vmem>>, vector<1x16x256xbf16>
    %1 = vector.shape_cast %0 : vector<1x16x256xbf16> to vector<16x256xbf16>
    %c0_2 = arith.constant 0 : index
    %c0_3 = arith.constant 0 : index
    %2 = vector.load %arg3[%c0_2, %c0_3] : memref<256x32xbf16, #tpu.memory_space<vmem>>, vector<256x32xbf16>
    %cst = arith.constant dense<0.000000e+00> : vector<16x32xf32>
    %3 = tpu.matmul %1, %2, %cst {dimension_numbers = #tpu.dot_dimension_numbers<[1], [0], [0], [1], [0, 0, 1, 1], [], []>} : vector<16x256xbf16>, vector<256x32xbf16>, vector<16x32xf32> -> vector<16x32xf32>
    %c0_4 = arith.constant 0 : index
    %c0_5 = arith.constant 0 : index
    %4 = vector.load %arg4[%c0_4, %c0_5] : memref<1x32xf32, #tpu.memory_space<vmem>>, vector<1x32xf32>
    %5 = vector.broadcast %4 : vector<1x32xf32> to vector<16x32xf32>
    %6 = arith.addf %3, %5 : vector<16x32xf32>
    %cst_6 = arith.constant 0.000000e+00 : f32
    %7 = vector.broadcast %cst_6 : f32 to vector<16x32xf32>
    %8 = arith.maximumf %6, %7 : vector<16x32xf32>
    %9 = arith.truncf %8 : vector<16x32xf32> to vector<16x32xbf16>
    %c0_7 = arith.constant 0 : index
    %c0_8 = arith.constant 0 : index
    %c0_9 = arith.constant 0 : index
    %10 = vector.load %arg5[%c0_7, %c0_8, %c0_9] : memref<1x16x32xbf16, #tpu.memory_space<vmem>>, vector<1x16x32xbf16>
    %11 = vector.shape_cast %10 : vector<1x16x32xbf16> to vector<16x32xbf16>
    %12 = vector.shape_cast %9 : vector<16x32xbf16> to vector<1x16x32xbf16>
    tpu.vector_store %arg5[%c0_7, %c0_8, %c0_9], %12 {strides = array<i32>} : memref<1x16x32xbf16, #tpu.memory_space<vmem>>, vector<1x16x32xbf16>,
    return
  }
  func.func @transform_0(%arg0: i32, %arg1: i32) -> (i32, i32, i32) {
    %c0_i32 = arith.constant 0 : i32
    %c0_i32_0 = arith.constant 0 : i32
    return %arg0, %arg1, %c0_i32 : i32, i32, i32
  }
  func.func @transform_1(%arg0: i32, %arg1: i32) -> (i32, i32) {
    %c0_i32 = arith.constant 0 : i32
    %c0_i32_0 = arith.constant 0 : i32
    %c0_i32_1 = arith.constant 0 : i32
    return %c0_i32, %c0_i32_0 : i32, i32
  }
  func.func @transform_2(%arg0: i32, %arg1: i32) -> (i32, i32) {
    %c0_i32 = arith.constant 0 : i32
    %c0_i32_0 = arith.constant 0 : i32
    %c0_i32_1 = arith.constant 0 : i32
    return %c0_i32, %c0_i32_0 : i32, i32
  }
  func.func @transform_3(%arg0: i32, %arg1: i32) -> (i32, i32, i32) {
    %c0_i32 = arith.constant 0 : i32
    %c0_i32_0 = arith.constant 0 : i32
    return %arg0, %arg1, %c0_i32 : i32, i32, i32
  }
}

module attributes {stable_mosaic.version = 11 : i64} {
  func.func @_attn_kernel(%arg0: i32, %arg1: i32, %arg2: i32, %arg3: memref<1x16x32xbf16, #tpu.memory_space<vmem>>, %arg4: memref<1x16x32xbf16, #tpu.memory_space<vmem>>, %arg5: memref<16x32xbf16, #tpu.memory_space<vmem>>, %arg6: memref<16x32xbf16, #tpu.memory_space<vmem>>, %arg7: memref<3x32x32xbf16, #tpu.memory_space<vmem>>, %arg8: memref<32x32xbf16, #tpu.memory_space<vmem>>, %arg9: memref<1x32xbf16, #tpu.memory_space<vmem>>, %arg10: memref<1x1xf32, #tpu.memory_space<vmem>>, %arg11: memref<1x16x32xbf16, #tpu.memory_space<vmem>>, %arg12: memref<1x1x16xf32, #tpu.memory_space<vmem>>, %arg13: memref<16x32xbf16, #tpu.memory_space<vmem>>, %arg14: memref<16x1xf32, #tpu.memory_space<vmem>>, %arg15: memref<16x1xf32, #tpu.memory_space<vmem>>, %arg16: memref<16x32xf32, #tpu.memory_space<vmem>>) attributes {dimension_semantics = [#tpu.dimension_semantics<parallel>, #tpu.dimension_semantics<parallel>, #tpu.dimension_semantics<arbitrary>], iteration_bounds = array<i64: 4, 1, 1>, scalar_prefetch = 0 : i64, scratch_operands = 4 : i64, tpu.core_type = #tpu.core_type<tc>, window_params = [{transform_indices = @transform_0, window_bounds = array<i64: 1, 16, 32>}, {transform_indices = @transform_1, window_bounds = array<i64: 1, 16, 32>}, {transform_indices = @transform_2, window_bounds = array<i64: 16, 32>}, {transform_indices = @transform_3, window_bounds = array<i64: 16, 32>}, {pipeline_mode = #tpu.pipeline_mode<synchronous>, transform_indices = @transform_4, window_bounds = array<i64: 3, 32, 32>}, {pipeline_mode = #tpu.pipeline_mode<synchronous>, transform_indices = @transform_5, window_bounds = array<i64: 32, 32>}, {pipeline_mode = #tpu.pipeline_mode<synchronous>, transform_indices = @transform_6, window_bounds = array<i64: 1, 32>}, {pipeline_mode = #tpu.pipeline_mode<synchronous>, transform_indices = @transform_7, window_bounds = array<i64: 1, 1>}, {transform_indices = @transform_8, window_bounds = array<i64: 1, 16, 32>}, {transform_indices = @transform_9, window_bounds = array<i64: 1, 1, 16>}]} {
    %c0_i32 = arith.constant 0 : i32
    %0 = arith.cmpi eq, %arg2, %c0_i32 : i32
    %1 = arith.extui %0 : i1 to i32
    %c0_i32_0 = arith.constant 0 : i32
    %2 = arith.cmpi ne, %1, %c0_i32_0 : i32
    scf.if %2 {
      %cst_31 = arith.constant 0xFF800000 : f32
      %45 = vector.broadcast %cst_31 : f32 to vector<16x1xf32>
      %c0_32 = arith.constant 0 : index
      %c0_33 = arith.constant 0 : index
      %46 = vector.load %arg14[%c0_32, %c0_33] : memref<16x1xf32, #tpu.memory_space<vmem>>, vector<16x1xf32>
      tpu.vector_store %arg14[%c0_32, %c0_33], %45 {strides = array<i32>} : memref<16x1xf32, #tpu.memory_space<vmem>>, vector<16x1xf32>,
      %cst_34 = arith.constant 0.000000e+00 : f32
      %47 = vector.broadcast %cst_34 : f32 to vector<16x1xf32>
      %c0_35 = arith.constant 0 : index
      %c0_36 = arith.constant 0 : index
      %48 = vector.load %arg15[%c0_35, %c0_36] : memref<16x1xf32, #tpu.memory_space<vmem>>, vector<16x1xf32>
      tpu.vector_store %arg15[%c0_35, %c0_36], %47 {strides = array<i32>} : memref<16x1xf32, #tpu.memory_space<vmem>>, vector<16x1xf32>,
      %cst_37 = arith.constant 0.000000e+00 : f32
      %49 = vector.broadcast %cst_37 : f32 to vector<16x32xf32>
      %c0_38 = arith.constant 0 : index
      %c0_39 = arith.constant 0 : index
      %50 = vector.load %arg16[%c0_38, %c0_39] : memref<16x32xf32, #tpu.memory_space<vmem>>, vector<16x32xf32>
      tpu.vector_store %arg16[%c0_38, %c0_39], %49 {strides = array<i32>} : memref<16x32xf32, #tpu.memory_space<vmem>>, vector<16x32xf32>,
      %c0_40 = arith.constant 0 : index
      %c0_41 = arith.constant 0 : index
      %c0_42 = arith.constant 0 : index
      %51 = vector.load %arg3[%c0_40, %c0_41, %c0_42] : memref<1x16x32xbf16, #tpu.memory_space<vmem>>, vector<1x16x32xbf16>
      %52 = vector.shape_cast %51 : vector<1x16x32xbf16> to vector<16x32xbf16>
      %c0_43 = arith.constant 0 : index
      %c0_44 = arith.constant 0 : index
      %53 = vector.load %arg5[%c0_43, %c0_44] : memref<16x32xbf16, #tpu.memory_space<vmem>>, vector<16x32xbf16>
      %54 = arith.addf %52, %53 : vector<16x32xbf16>
      %c0_45 = arith.constant 0 : index
      %c0_46 = arith.constant 0 : index
      %c0_47 = arith.constant 0 : index
      %55 = vector.load %arg7[%c0_45, %c0_46, %c0_47] : memref<3x32x32xbf16, #tpu.memory_space<vmem>>, vector<1x32x32xbf16>
      %56 = vector.shape_cast %55 : vector<1x32x32xbf16> to vector<32x32xbf16>
      %cst_48 = arith.constant dense<0.000000e+00> : vector<16x32xf32>
      %57 = tpu.matmul %54, %56, %cst_48 {dimension_numbers = #tpu.dot_dimension_numbers<[1], [0], [0], [1], [0, 0, 1, 1], [], []>} : vector<16x32xbf16>, vector<32x32xbf16>, vector<16x32xf32> -> vector<16x32xf32>
      %58 = arith.truncf %57 : vector<16x32xf32> to vector<16x32xbf16>
      %c0_49 = arith.constant 0 : index
      %c0_50 = arith.constant 0 : index
      %59 = vector.load %arg13[%c0_49, %c0_50] : memref<16x32xbf16, #tpu.memory_space<vmem>>, vector<16x32xbf16>
      tpu.vector_store %arg13[%c0_49, %c0_50], %58 {strides = array<i32>} : memref<16x32xbf16, #tpu.memory_space<vmem>>, vector<16x32xbf16>,
    } else {
    }
    %c0 = arith.constant 0 : index
    %c0_1 = arith.constant 0 : index
    %c0_2 = arith.constant 0 : index
    %3 = vector.load %arg4[%c0, %c0_1, %c0_2] : memref<1x16x32xbf16, #tpu.memory_space<vmem>>, vector<1x16x32xbf16>
    %4 = vector.shape_cast %3 : vector<1x16x32xbf16> to vector<16x32xbf16>
    %c0_3 = arith.constant 0 : index
    %c0_4 = arith.constant 0 : index
    %5 = vector.load %arg6[%c0_3, %c0_4] : memref<16x32xbf16, #tpu.memory_space<vmem>>, vector<16x32xbf16>
    %6 = arith.addf %4, %5 : vector<16x32xbf16>
    %c1 = arith.constant 1 : index
    %c0_5 = arith.constant 0 : index
    %c0_6 = arith.constant 0 : index
    %7 = vector.load %arg7[%c1, %c0_5, %c0_6] : memref<3x32x32xbf16, #tpu.memory_space<vmem>>, vector<1x32x32xbf16>
    %8 = vector.shape_cast %7 : vector<1x32x32xbf16> to vector<32x32xbf16>
    %cst = arith.constant dense<0.000000e+00> : vector<16x32xf32>
    %9 = tpu.matmul %6, %8, %cst {dimension_numbers = #tpu.dot_dimension_numbers<[1], [0], [0], [1], [0, 0, 1, 1], [], []>} : vector<16x32xbf16>, vector<32x32xbf16>, vector<16x32xf32> -> vector<16x32xf32>
    %10 = arith.truncf %9 : vector<16x32xf32> to vector<16x32xbf16>
    %c2 = arith.constant 2 : index
    %c0_7 = arith.constant 0 : index
    %c0_8 = arith.constant 0 : index
    %11 = vector.load %arg7[%c2, %c0_7, %c0_8] : memref<3x32x32xbf16, #tpu.memory_space<vmem>>, vector<1x32x32xbf16>
    %12 = vector.shape_cast %11 : vector<1x32x32xbf16> to vector<32x32xbf16>
    %cst_9 = arith.constant dense<0.000000e+00> : vector<16x32xf32>
    %13 = tpu.matmul %6, %12, %cst_9 {dimension_numbers = #tpu.dot_dimension_numbers<[1], [0], [0], [1], [0, 0, 1, 1], [], []>} : vector<16x32xbf16>, vector<32x32xbf16>, vector<16x32xf32> -> vector<16x32xf32>
    %14 = arith.truncf %13 : vector<16x32xf32> to vector<16x32xbf16>
    %c0_10 = arith.constant 0 : index
    %c0_11 = arith.constant 0 : index
    %15 = vector.load %arg13[%c0_10, %c0_11] : memref<16x32xbf16, #tpu.memory_space<vmem>>, vector<16x32xbf16>
    %cst_12 = arith.constant dense<0.000000e+00> : vector<16x16xf32>
    %16 = tpu.matmul %15, %10, %cst_12 {dimension_numbers = #tpu.dot_dimension_numbers<[1], [1], [0], [0], [0, 0, 1, 0], [], []>} : vector<16x32xbf16>, vector<16x32xbf16>, vector<16x16xf32> -> vector<16x16xf32>
    %cst_13 = arith.constant 0.176776692 : f32
    %17 = vector.broadcast %cst_13 : f32 to vector<16x16xf32>
    %18 = arith.mulf %16, %17 : vector<16x16xf32>
    %c0_14 = arith.constant 0 : index
    %c0_15 = arith.constant 0 : index
    %19 = vector.load %arg14[%c0_14, %c0_15] : memref<16x1xf32, #tpu.memory_space<vmem>>, vector<16x1xf32>
    %cst_16 = arith.constant dense<0xFF800000> : vector<16xf32>
    %20 = vector.multi_reduction <maximumf>, %18, %cst_16 [1] : vector<16x16xf32> to vector<16xf32>
    %21 = vector.shape_cast %20 : vector<16xf32> to vector<16x1xf32>
    %22 = arith.maximumf %19, %21 : vector<16x1xf32>
    %23 = arith.subf %19, %22 : vector<16x1xf32>
    %24 = math.exp %23 : vector<16x1xf32>
    %25 = vector.broadcast %22 : vector<16x1xf32> to vector<16x16xf32>
    %26 = arith.subf %18, %25 : vector<16x16xf32>
    %27 = math.exp %26 : vector<16x16xf32>
    %c0_17 = arith.constant 0 : index
    %c0_18 = arith.constant 0 : index
    %28 = vector.load %arg15[%c0_17, %c0_18] : memref<16x1xf32, #tpu.memory_space<vmem>>, vector<16x1xf32>
    %29 = arith.mulf %24, %28 : vector<16x1xf32>
    %cst_19 = arith.constant dense<0.000000e+00> : vector<16xf32>
    %30 = vector.multi_reduction <add>, %27, %cst_19 [1] : vector<16x16xf32> to vector<16xf32>
    %31 = vector.shape_cast %30 : vector<16xf32> to vector<16x1xf32>
    %32 = arith.addf %29, %31 : vector<16x1xf32>
    %c0_20 = arith.constant 0 : index
    %c0_21 = arith.constant 0 : index
    %33 = vector.load %arg15[%c0_20, %c0_21] : memref<16x1xf32, #tpu.memory_space<vmem>>, vector<16x1xf32>
    tpu.vector_store %arg15[%c0_20, %c0_21], %32 {strides = array<i32>} : memref<16x1xf32, #tpu.memory_space<vmem>>, vector<16x1xf32>,
    %c0_22 = arith.constant 0 : index
    %c0_23 = arith.constant 0 : index
    %34 = vector.load %arg16[%c0_22, %c0_23] : memref<16x32xf32, #tpu.memory_space<vmem>>, vector<16x32xf32>
    %35 = vector.broadcast %24 : vector<16x1xf32> to vector<16x32xf32>
    %36 = arith.mulf %35, %34 : vector<16x32xf32>
    %37 = arith.truncf %27 : vector<16x16xf32> to vector<16x16xbf16>
    %cst_24 = arith.constant dense<0.000000e+00> : vector<16x32xf32>
    %38 = tpu.matmul %37, %14, %cst_24 {dimension_numbers = #tpu.dot_dimension_numbers<[1], [0], [0], [1], [0, 0, 1, 1], [], []>} : vector<16x16xbf16>, vector<16x32xbf16>, vector<16x32xf32> -> vector<16x32xf32>
    %39 = arith.addf %36, %38 : vector<16x32xf32>
    %c0_25 = arith.constant 0 : index
    %c0_26 = arith.constant 0 : index
    %40 = vector.load %arg16[%c0_25, %c0_26] : memref<16x32xf32, #tpu.memory_space<vmem>>, vector<16x32xf32>
    tpu.vector_store %arg16[%c0_25, %c0_26], %39 {strides = array<i32>} : memref<16x32xf32, #tpu.memory_space<vmem>>, vector<16x32xf32>,
    %c0_27 = arith.constant 0 : index
    %c0_28 = arith.constant 0 : index
    %41 = vector.load %arg14[%c0_27, %c0_28] : memref<16x1xf32, #tpu.memory_space<vmem>>, vector<16x1xf32>
    tpu.vector_store %arg14[%c0_27, %c0_28], %22 {strides = array<i32>} : memref<16x1xf32, #tpu.memory_space<vmem>>, vector<16x1xf32>,
    %c0_i32_29 = arith.constant 0 : i32
    %42 = arith.cmpi eq, %arg2, %c0_i32_29 : i32
    %43 = arith.extui %42 : i1 to i32
    %c0_i32_30 = arith.constant 0 : i32
    %44 = arith.cmpi ne, %43, %c0_i32_30 : i32
    scf.if %44 {
      %c0_31 = arith.constant 0 : index
      %c0_32 = arith.constant 0 : index
      %45 = vector.load %arg16[%c0_31, %c0_32] : memref<16x32xf32, #tpu.memory_space<vmem>>, vector<16x32xf32>
      %c0_33 = arith.constant 0 : index
      %c0_34 = arith.constant 0 : index
      %46 = vector.load %arg15[%c0_33, %c0_34] : memref<16x1xf32, #tpu.memory_space<vmem>>, vector<16x1xf32>
      %47 = tpu.reciprocal %46 {approx = true} : vector<16x1xf32> -> vector<16x1xf32>
      %48 = vector.broadcast %47 : vector<16x1xf32> to vector<16x32xf32>
      %49 = arith.mulf %45, %48 : vector<16x32xf32>
      %c0_35 = arith.constant 0 : index
      %c0_36 = arith.constant 0 : index
      %c0_37 = arith.constant 0 : index
      %50 = vector.load %arg3[%c0_35, %c0_36, %c0_37] : memref<1x16x32xbf16, #tpu.memory_space<vmem>>, vector<1x16x32xbf16>
      %51 = vector.shape_cast %50 : vector<1x16x32xbf16> to vector<16x32xbf16>
      %c0_38 = arith.constant 0 : index
      %c0_39 = arith.constant 0 : index
      %52 = vector.load %arg5[%c0_38, %c0_39] : memref<16x32xbf16, #tpu.memory_space<vmem>>, vector<16x32xbf16>
      %53 = arith.addf %51, %52 : vector<16x32xbf16>
      %54 = arith.extf %53 : vector<16x32xbf16> to vector<16x32xf32>
      %55 = arith.truncf %49 : vector<16x32xf32> to vector<16x32xbf16>
      %c0_40 = arith.constant 0 : index
      %c0_41 = arith.constant 0 : index
      %56 = vector.load %arg8[%c0_40, %c0_41] : memref<32x32xbf16, #tpu.memory_space<vmem>>, vector<32x32xbf16>
      %cst_42 = arith.constant dense<0.000000e+00> : vector<16x32xf32>
      %57 = tpu.matmul %55, %56, %cst_42 {dimension_numbers = #tpu.dot_dimension_numbers<[1], [0], [0], [1], [0, 0, 1, 1], [], []>} : vector<16x32xbf16>, vector<32x32xbf16>, vector<16x32xf32> -> vector<16x32xf32>
      %58 = arith.addf %54, %57 : vector<16x32xf32>
      %59 = arith.truncf %58 : vector<16x32xf32> to vector<16x32xbf16>
      %c0_43 = arith.constant 0 : index
      %c0_44 = arith.constant 0 : index
      %c0_45 = arith.constant 0 : index
      %60 = vector.load %arg11[%c0_43, %c0_44, %c0_45] : memref<1x16x32xbf16, #tpu.memory_space<vmem>>, vector<1x16x32xbf16>
      %61 = vector.shape_cast %60 : vector<1x16x32xbf16> to vector<16x32xbf16>
      %62 = vector.shape_cast %59 : vector<16x32xbf16> to vector<1x16x32xbf16>
      tpu.vector_store %arg11[%c0_43, %c0_44, %c0_45], %62 {strides = array<i32>} : memref<1x16x32xbf16, #tpu.memory_space<vmem>>, vector<1x16x32xbf16>,
      %c0_46 = arith.constant 0 : index
      %c0_47 = arith.constant 0 : index
      %63 = vector.load %arg9[%c0_46, %c0_47] : memref<1x32xbf16, #tpu.memory_space<vmem>>, vector<1x32xbf16>
      %cst_48 = arith.constant dense<0.000000e+00> : vector<1x16xf32>
      %64 = tpu.matmul %63, %59, %cst_48 {dimension_numbers = #tpu.dot_dimension_numbers<[1], [1], [0], [0], [0, 0, 1, 0], [], []>} : vector<1x32xbf16>, vector<16x32xbf16>, vector<1x16xf32> -> vector<1x16xf32>
      %c0_49 = arith.constant 0 : index
      %c0_50 = arith.constant 0 : index
      %65 = vector.load %arg10[%c0_49, %c0_50] : memref<1x1xf32, #tpu.memory_space<vmem>>, vector<1x1xf32>
      %66 = vector.broadcast %65 : vector<1x1xf32> to vector<1x16xf32>
      %67 = arith.addf %64, %66 : vector<1x16xf32>
      %68 = arith.negf %67 : vector<1x16xf32>
      %69 = math.exp %68 : vector<1x16xf32>
      %cst_51 = arith.constant 1.000000e+00 : f32
      %70 = vector.broadcast %cst_51 : f32 to vector<1x16xf32>
      %71 = arith.addf %70, %69 : vector<1x16xf32>
      %72 = arith.divf %70, %71 : vector<1x16xf32>
      %c0_52 = arith.constant 0 : index
      %c0_53 = arith.constant 0 : index
      %c0_54 = arith.constant 0 : index
      %73 = vector.load %arg12[%c0_52, %c0_53, %c0_54] : memref<1x1x16xf32, #tpu.memory_space<vmem>>, vector<1x1x16xf32>
      %74 = vector.shape_cast %73 : vector<1x1x16xf32> to vector<1x16xf32>
      %75 = vector.shape_cast %72 : vector<1x16xf32> to vector<1x1x16xf32>
      tpu.vector_store %arg12[%c0_52, %c0_53, %c0_54], %75 {strides = array<i32>} : memref<1x1x16xf32, #tpu.memory_space<vmem>>, vector<1x1x16xf32>,
    } else {
    }
    return
  }
  func.func @transform_0(%arg0: i32, %arg1: i32, %arg2: i32) -> (i32, i32, i32) {
    %c0_i32 = arith.constant 0 : i32
    %c0_i32_0 = arith.constant 0 : i32
    return %arg0, %arg1, %c0_i32 : i32, i32, i32
  }
  func.func @transform_1(%arg0: i32, %arg1: i32, %arg2: i32) -> (i32, i32, i32) {
    %c2_i32 = arith.constant 2 : i32
    %0 = arith.addi %arg0, %c2_i32 : i32
    %c4_i32 = arith.constant 4 : i32
    %c0_i32 = arith.constant 0 : i32
    %1 = arith.cmpi eq, %c4_i32, %c0_i32 : i32
    %c1_i32 = arith.constant 1 : i32
    %2 = arith.select %1, %c1_i32, %c4_i32 : i32
    %3 = arith.remsi %0, %2 : i32
    %c0_i32_0 = arith.constant 0 : i32
    %4 = arith.cmpi ne, %3, %c0_i32_0 : i32
    %c0_i32_1 = arith.constant 0 : i32
    %5 = arith.cmpi slt, %3, %c0_i32_1 : i32
    %c0_i32_2 = arith.constant 0 : i32
    %6 = arith.cmpi slt, %2, %c0_i32_2 : i32
    %7 = arith.xori %5, %6 : i1
    %8 = arith.andi %7, %4 : i1
    %9 = arith.addi %3, %2 : i32
    %10 = arith.select %8, %9, %3 : i32
    %c0_i32_3 = arith.constant 0 : i32
    %c0_i32_4 = arith.constant 0 : i32
    return %10, %arg2, %c0_i32_3 : i32, i32, i32
  }
  func.func @transform_2(%arg0: i32, %arg1: i32, %arg2: i32) -> (i32, i32) {
    %c0_i32 = arith.constant 0 : i32
    %c0_i32_0 = arith.constant 0 : i32
    return %arg1, %c0_i32 : i32, i32
  }
  func.func @transform_3(%arg0: i32, %arg1: i32, %arg2: i32) -> (i32, i32) {
    %c0_i32 = arith.constant 0 : i32
    %c0_i32_0 = arith.constant 0 : i32
    return %arg2, %c0_i32 : i32, i32
  }
  func.func @transform_4(%arg0: i32, %arg1: i32, %arg2: i32) -> (i32, i32, i32) {
    %c0_i32 = arith.constant 0 : i32
    %c0_i32_0 = arith.constant 0 : i32
    %c0_i32_1 = arith.constant 0 : i32
    %c0_i32_2 = arith.constant 0 : i32
    return %c0_i32, %c0_i32_0, %c0_i32_1 : i32, i32, i32
  }
  func.func @transform_5(%arg0: i32, %arg1: i32, %arg2: i32) -> (i32, i32) {
    %c0_i32 = arith.constant 0 : i32
    %c0_i32_0 = arith.constant 0 : i32
    %c0_i32_1 = arith.constant 0 : i32
    return %c0_i32, %c0_i32_0 : i32, i32
  }
  func.func @transform_6(%arg0: i32, %arg1: i32, %arg2: i32) -> (i32, i32) {
    %c0_i32 = arith.constant 0 : i32
    %c0_i32_0 = arith.constant 0 : i32
    %c0_i32_1 = arith.constant 0 : i32
    return %c0_i32, %c0_i32_0 : i32, i32
  }
  func.func @transform_7(%arg0: i32, %arg1: i32, %arg2: i32) -> (i32, i32) {
    %c0_i32 = arith.constant 0 : i32
    %c0_i32_0 = arith.constant 0 : i32
    %c0_i32_1 = arith.constant 0 : i32
    return %c0_i32, %c0_i32_0 : i32, i32
  }
  func.func @transform_8(%arg0: i32, %arg1: i32, %arg2: i32) -> (i32, i32, i32) {
    %c0_i32 = arith.constant 0 : i32
    %c0_i32_0 = arith.constant 0 : i32
    return %arg0, %arg1, %c0_i32 : i32, i32, i32
  }
  func.func @transform_9(%arg0: i32, %arg1: i32, %arg2: i32) -> (i32, i32, i32) {
    %c0_i32 = arith.constant 0 : i32
    %c0_i32_0 = arith.constant 0 : i32
    return %arg0, %c0_i32, %arg1 : i32, i32, i32
  }
}

module attributes {stable_mosaic.version = 11 : i64} {
  func.func @_lse_kernel(%arg0: i32, %arg1: i32, %arg2: i32, %arg3: memref<1x16x32xbf16, #tpu.memory_space<vmem>>, %arg4: memref<1x16x32xbf16, #tpu.memory_space<vmem>>, %arg5: memref<1x1x16xf32, #tpu.memory_space<vmem>>, %arg6: memref<1x16xf32, #tpu.memory_space<vmem>>, %arg7: memref<1x16xf32, #tpu.memory_space<vmem>>) attributes {dimension_semantics = [#tpu.dimension_semantics<parallel>, #tpu.dimension_semantics<parallel>, #tpu.dimension_semantics<arbitrary>], iteration_bounds = array<i64: 2, 1, 1>, scalar_prefetch = 0 : i64, scratch_operands = 2 : i64, tpu.core_type = #tpu.core_type<tc>, window_params = [{transform_indices = @transform_0, window_bounds = array<i64: 1, 16, 32>}, {transform_indices = @transform_1, window_bounds = array<i64: 1, 16, 32>}, {transform_indices = @transform_2, window_bounds = array<i64: 1, 1, 16>}]} {
    %c0_i32 = arith.constant 0 : i32
    %0 = arith.cmpi eq, %arg2, %c0_i32 : i32
    %1 = arith.extui %0 : i1 to i32
    %c0_i32_0 = arith.constant 0 : i32
    %2 = arith.cmpi ne, %1, %c0_i32_0 : i32
    scf.if %2 {
      %cst_19 = arith.constant 0xFF800000 : f32
      %29 = vector.broadcast %cst_19 : f32 to vector<1x16xf32>
      %c0_20 = arith.constant 0 : index
      %c0_21 = arith.constant 0 : index
      %30 = vector.load %arg6[%c0_20, %c0_21] : memref<1x16xf32, #tpu.memory_space<vmem>>, vector<1x16xf32>
      tpu.vector_store %arg6[%c0_20, %c0_21], %29 {strides = array<i32>} : memref<1x16xf32, #tpu.memory_space<vmem>>, vector<1x16xf32>,
      %cst_22 = arith.constant 0.000000e+00 : f32
      %31 = vector.broadcast %cst_22 : f32 to vector<1x16xf32>
      %c0_23 = arith.constant 0 : index
      %c0_24 = arith.constant 0 : index
      %32 = vector.load %arg7[%c0_23, %c0_24] : memref<1x16xf32, #tpu.memory_space<vmem>>, vector<1x16xf32>
      tpu.vector_store %arg7[%c0_23, %c0_24], %31 {strides = array<i32>} : memref<1x16xf32, #tpu.memory_space<vmem>>, vector<1x16xf32>,
    } else {
    }
    %c0 = arith.constant 0 : index
    %c0_1 = arith.constant 0 : index
    %c0_2 = arith.constant 0 : index
    %3 = vector.load %arg3[%c0, %c0_1, %c0_2] : memref<1x16x32xbf16, #tpu.memory_space<vmem>>, vector<1x16x32xbf16>
    %4 = vector.shape_cast %3 : vector<1x16x32xbf16> to vector<16x32xbf16>
    %c0_3 = arith.constant 0 : index
    %c0_4 = arith.constant 0 : index
    %c0_5 = arith.constant 0 : index
    %5 = vector.load %arg4[%c0_3, %c0_4, %c0_5] : memref<1x16x32xbf16, #tpu.memory_space<vmem>>, vector<1x16x32xbf16>
    %6 = vector.shape_cast %5 : vector<1x16x32xbf16> to vector<16x32xbf16>
    %cst = arith.constant dense<0.000000e+00> : vector<16x16xf32>
    %7 = tpu.matmul %4, %6, %cst {dimension_numbers = #tpu.dot_dimension_numbers<[1], [1], [0], [0], [0, 0, 1, 0], [], []>} : vector<16x32xbf16>, vector<16x32xbf16>, vector<16x16xf32> -> vector<16x16xf32>
    %cst_6 = arith.constant 3.125000e-01 : f32
    %8 = vector.broadcast %cst_6 : f32 to vector<16x16xf32>
    %9 = arith.mulf %7, %8 : vector<16x16xf32>
    %c0_7 = arith.constant 0 : index
    %c0_8 = arith.constant 0 : index
    %10 = vector.load %arg6[%c0_7, %c0_8] : memref<1x16xf32, #tpu.memory_space<vmem>>, vector<1x16xf32>
    %cst_9 = arith.constant dense<0xFF800000> : vector<16xf32>
    %11 = vector.multi_reduction <maximumf>, %9, %cst_9 [0] : vector<16x16xf32> to vector<16xf32>
    %12 = vector.shape_cast %11 : vector<16xf32> to vector<1x16xf32>
    %13 = arith.maximumf %10, %12 : vector<1x16xf32>
    %14 = vector.broadcast %13 : vector<1x16xf32> to vector<16x16xf32>
    %15 = arith.subf %9, %14 : vector<16x16xf32>
    %16 = math.exp %15 : vector<16x16xf32>
    %c0_10 = arith.constant 0 : index
    %c0_11 = arith.constant 0 : index
    %17 = vector.load %arg7[%c0_10, %c0_11] : memref<1x16xf32, #tpu.memory_space<vmem>>, vector<1x16xf32>
    %18 = arith.subf %10, %13 : vector<1x16xf32>
    %19 = math.exp %18 : vector<1x16xf32>
    %20 = arith.mulf %17, %19 : vector<1x16xf32>
    %cst_12 = arith.constant dense<0.000000e+00> : vector<16xf32>
    %21 = vector.multi_reduction <add>, %16, %cst_12 [0] : vector<16x16xf32> to vector<16xf32>
    %22 = vector.shape_cast %21 : vector<16xf32> to vector<1x16xf32>
    %23 = arith.addf %20, %22 : vector<1x16xf32>
    %c0_13 = arith.constant 0 : index
    %c0_14 = arith.constant 0 : index
    %24 = vector.load %arg7[%c0_13, %c0_14] : memref<1x16xf32, #tpu.memory_space<vmem>>, vector<1x16xf32>
    tpu.vector_store %arg7[%c0_13, %c0_14], %23 {strides = array<i32>} : memref<1x16xf32, #tpu.memory_space<vmem>>, vector<1x16xf32>,
    %c0_15 = arith.constant 0 : index
    %c0_16 = arith.constant 0 : index
    %25 = vector.load %arg6[%c0_15, %c0_16] : memref<1x16xf32, #tpu.memory_space<vmem>>, vector<1x16xf32>
    tpu.vector_store %arg6[%c0_15, %c0_16], %13 {strides = array<i32>} : memref<1x16xf32, #tpu.memory_space<vmem>>, vector<1x16xf32>,
    %c0_i32_17 = arith.constant 0 : i32
    %26 = arith.cmpi eq, %arg2, %c0_i32_17 : i32
    %27 = arith.extui %26 : i1 to i32
    %c0_i32_18 = arith.constant 0 : i32
    %28 = arith.cmpi ne, %27, %c0_i32_18 : i32
    scf.if %28 {
      %c0_19 = arith.constant 0 : index
      %c0_20 = arith.constant 0 : index
      %29 = vector.load %arg6[%c0_19, %c0_20] : memref<1x16xf32, #tpu.memory_space<vmem>>, vector<1x16xf32>
      %c0_21 = arith.constant 0 : index
      %c0_22 = arith.constant 0 : index
      %30 = vector.load %arg7[%c0_21, %c0_22] : memref<1x16xf32, #tpu.memory_space<vmem>>, vector<1x16xf32>
      %31 = math.log %30 : vector<1x16xf32>
      %32 = arith.addf %29, %31 : vector<1x16xf32>
      %c0_23 = arith.constant 0 : index
      %c0_24 = arith.constant 0 : index
      %c0_25 = arith.constant 0 : index
      %33 = vector.load %arg5[%c0_23, %c0_24, %c0_25] : memref<1x1x16xf32, #tpu.memory_space<vmem>>, vector<1x1x16xf32>
      %34 = vector.shape_cast %33 : vector<1x1x16xf32> to vector<1x16xf32>
      %35 = vector.shape_cast %32 : vector<1x16xf32> to vector<1x1x16xf32>
      tpu.vector_store %arg5[%c0_23, %c0_24, %c0_25], %35 {strides = array<i32>} : memref<1x1x16xf32, #tpu.memory_space<vmem>>, vector<1x1x16xf32>,
    } else {
    }
    return
  }
  func.func @transform_0(%arg0: i32, %arg1: i32, %arg2: i32) -> (i32, i32, i32) {
    %c0_i32 = arith.constant 0 : i32
    %c0_i32_0 = arith.constant 0 : i32
    return %arg0, %arg2, %c0_i32 : i32, i32, i32
  }
  func.func @transform_1(%arg0: i32, %arg1: i32, %arg2: i32) -> (i32, i32, i32) {
    %c0_i32 = arith.constant 0 : i32
    %c0_i32_0 = arith.constant 0 : i32
    return %arg0, %arg1, %c0_i32 : i32, i32, i32
  }
  func.func @transform_2(%arg0: i32, %arg1: i32, %arg2: i32) -> (i32, i32, i32) {
    %c0_i32 = arith.constant 0 : i32
    %c0_i32_0 = arith.constant 0 : i32
    return %arg0, %c0_i32, %arg1 : i32, i32, i32
  }
}

module attributes {stable_mosaic.version = 11 : i64} {
  func.func @_conf_kernel(%arg0: i32, %arg1: i32, %arg2: i32, %arg3: memref<1x16x32xbf16, #tpu.memory_space<vmem>>, %arg4: memref<1x16x32xbf16, #tpu.memory_space<vmem>>, %arg5: memref<1x16x1xf32, #tpu.memory_space<vmem>>, %arg6: memref<1x1x16xf32, #tpu.memory_space<vmem>>, %arg7: memref<1x16x16xbf16, #tpu.memory_space<vmem>>) attributes {dimension_semantics = [#tpu.dimension_semantics<parallel>, #tpu.dimension_semantics<parallel>, #tpu.dimension_semantics<parallel>], iteration_bounds = array<i64: 2, 1, 1>, scalar_prefetch = 0 : i64, scratch_operands = 0 : i64, tpu.core_type = #tpu.core_type<tc>, window_params = [{transform_indices = @transform_0, window_bounds = array<i64: 1, 16, 32>}, {transform_indices = @transform_1, window_bounds = array<i64: 1, 16, 32>}, {transform_indices = @transform_2, window_bounds = array<i64: 1, 16, 1>}, {transform_indices = @transform_3, window_bounds = array<i64: 1, 1, 16>}, {transform_indices = @transform_4, window_bounds = array<i64: 1, 16, 16>}]} {
    %c0 = arith.constant 0 : index
    %c0_0 = arith.constant 0 : index
    %c0_1 = arith.constant 0 : index
    %0 = vector.load %arg3[%c0, %c0_0, %c0_1] : memref<1x16x32xbf16, #tpu.memory_space<vmem>>, vector<1x16x32xbf16>
    %1 = vector.shape_cast %0 : vector<1x16x32xbf16> to vector<16x32xbf16>
    %c0_2 = arith.constant 0 : index
    %c0_3 = arith.constant 0 : index
    %c0_4 = arith.constant 0 : index
    %2 = vector.load %arg4[%c0_2, %c0_3, %c0_4] : memref<1x16x32xbf16, #tpu.memory_space<vmem>>, vector<1x16x32xbf16>
    %3 = vector.shape_cast %2 : vector<1x16x32xbf16> to vector<16x32xbf16>
    %cst = arith.constant dense<0.000000e+00> : vector<16x16xf32>
    %4 = tpu.matmul %1, %3, %cst {dimension_numbers = #tpu.dot_dimension_numbers<[1], [1], [0], [0], [0, 0, 1, 0], [], []>} : vector<16x32xbf16>, vector<16x32xbf16>, vector<16x16xf32> -> vector<16x16xf32>
    %cst_5 = arith.constant 3.125000e-01 : f32
    %5 = vector.broadcast %cst_5 : f32 to vector<16x16xf32>
    %6 = arith.mulf %4, %5 : vector<16x16xf32>
    %c0_6 = arith.constant 0 : index
    %c0_7 = arith.constant 0 : index
    %c0_8 = arith.constant 0 : index
    %7 = vector.load %arg5[%c0_6, %c0_7, %c0_8] : memref<1x16x1xf32, #tpu.memory_space<vmem>>, vector<1x16x1xf32>
    %8 = vector.shape_cast %7 : vector<1x16x1xf32> to vector<16x1xf32>
    %c0_9 = arith.constant 0 : index
    %c0_10 = arith.constant 0 : index
    %c0_11 = arith.constant 0 : index
    %9 = vector.load %arg6[%c0_9, %c0_10, %c0_11] : memref<1x1x16xf32, #tpu.memory_space<vmem>>, vector<1x1x16xf32>
    %10 = vector.shape_cast %9 : vector<1x1x16xf32> to vector<1x16xf32>
    %11 = arith.addf %6, %6 : vector<16x16xf32>
    %12 = vector.broadcast %8 : vector<16x1xf32> to vector<16x16xf32>
    %13 = arith.subf %11, %12 : vector<16x16xf32>
    %14 = vector.broadcast %10 : vector<1x16xf32> to vector<16x16xf32>
    %15 = arith.subf %13, %14 : vector<16x16xf32>
    %16 = math.exp %15 : vector<16x16xf32>
    %17 = arith.truncf %16 : vector<16x16xf32> to vector<16x16xbf16>
    %c0_12 = arith.constant 0 : index
    %c0_13 = arith.constant 0 : index
    %c0_14 = arith.constant 0 : index
    %18 = vector.load %arg7[%c0_12, %c0_13, %c0_14] : memref<1x16x16xbf16, #tpu.memory_space<vmem>>, vector<1x16x16xbf16>
    %19 = vector.shape_cast %18 : vector<1x16x16xbf16> to vector<16x16xbf16>
    %20 = vector.shape_cast %17 : vector<16x16xbf16> to vector<1x16x16xbf16>
    tpu.vector_store %arg7[%c0_12, %c0_13, %c0_14], %20 {strides = array<i32>} : memref<1x16x16xbf16, #tpu.memory_space<vmem>>, vector<1x16x16xbf16>,
    return
  }
  func.func @transform_0(%arg0: i32, %arg1: i32, %arg2: i32) -> (i32, i32, i32) {
    %c0_i32 = arith.constant 0 : i32
    %c0_i32_0 = arith.constant 0 : i32
    return %arg0, %arg1, %c0_i32 : i32, i32, i32
  }
  func.func @transform_1(%arg0: i32, %arg1: i32, %arg2: i32) -> (i32, i32, i32) {
    %c0_i32 = arith.constant 0 : i32
    %c0_i32_0 = arith.constant 0 : i32
    return %arg0, %arg2, %c0_i32 : i32, i32, i32
  }
  func.func @transform_2(%arg0: i32, %arg1: i32, %arg2: i32) -> (i32, i32, i32) {
    %c0_i32 = arith.constant 0 : i32
    %c0_i32_0 = arith.constant 0 : i32
    return %arg0, %arg1, %c0_i32 : i32, i32, i32
  }
  func.func @transform_3(%arg0: i32, %arg1: i32, %arg2: i32) -> (i32, i32, i32) {
    %c0_i32 = arith.constant 0 : i32
    %c0_i32_0 = arith.constant 0 : i32
    return %arg0, %c0_i32, %arg2 : i32, i32, i32
  }
  func.func @transform_4(%arg0: i32, %arg1: i32, %arg2: i32) -> (i32, i32, i32) {
    %c0_i32 = arith.constant 0 : i32
    return %arg0, %arg1, %arg2 : i32, i32, i32
  }
}

module attributes {stable_mosaic.version = 11 : i64} {
  func.func @_fine_kernel(%arg0: i32, %arg1: i32, %arg2: memref<1x16x16xbf16, #tpu.memory_space<vmem>>, %arg3: memref<1x16x16x16xbf16, #tpu.memory_space<vmem>>, %arg4: memref<16x2xf32, #tpu.memory_space<vmem>>, %arg5: memref<1x2x16xf32, #tpu.memory_space<vmem>>) attributes {dimension_semantics = [#tpu.dimension_semantics<parallel>, #tpu.dimension_semantics<parallel>], iteration_bounds = array<i64: 2, 1>, scalar_prefetch = 0 : i64, scratch_operands = 0 : i64, tpu.core_type = #tpu.core_type<tc>, window_params = [{transform_indices = @transform_0, window_bounds = array<i64: 1, 16, 16>}, {transform_indices = @transform_1, window_bounds = array<i64: 1, 16, 16, 16>}, {pipeline_mode = #tpu.pipeline_mode<synchronous>, transform_indices = @transform_2, window_bounds = array<i64: 16, 2>}, {transform_indices = @transform_3, window_bounds = array<i64: 1, 2, 16>}]} {
    %c0 = arith.constant 0 : index
    %c0_0 = arith.constant 0 : index
    %c0_1 = arith.constant 0 : index
    %0 = vector.load %arg2[%c0, %c0_0, %c0_1] : memref<1x16x16xbf16, #tpu.memory_space<vmem>>, vector<1x16x16xbf16>
    %1 = vector.shape_cast %0 : vector<1x16x16xbf16> to vector<16x16xbf16>
    %2 = arith.extf %1 : vector<16x16xbf16> to vector<16x16xf32>
    %c0_2 = arith.constant 0 : index
    %c0_3 = arith.constant 0 : index
    %c0_4 = arith.constant 0 : index
    %c0_5 = arith.constant 0 : index
    %3 = vector.load %arg3[%c0_2, %c0_3, %c0_4, %c0_5] : memref<1x16x16x16xbf16, #tpu.memory_space<vmem>>, vector<1x16x16x16xbf16>
    %4 = vector.shape_cast %3 : vector<1x16x16x16xbf16> to vector<16x16x16xbf16>
    %5 = arith.extf %4 : vector<16x16x16xbf16> to vector<16x16x16xf32>
    %6 = vector.shape_cast %2 : vector<16x16xf32> to vector<1x16x16xf32>
    %7 = vector.broadcast %6 : vector<1x16x16xf32> to vector<16x16x16xf32>
    %8 = arith.mulf %5, %7 : vector<16x16x16xf32>
    %cst = arith.constant dense<0.000000e+00> : vector<16x16xf32>
    %9 = vector.multi_reduction <add>, %8, %cst [1] : vector<16x16x16xf32> to vector<16x16xf32>
    %cst_6 = arith.constant 2.500000e-01 : f32
    %10 = vector.broadcast %cst_6 : f32 to vector<16x16xf32>
    %11 = arith.mulf %9, %10 : vector<16x16xf32>
    %cst_7 = arith.constant dense<0xFF800000> : vector<16xf32>
    %12 = vector.multi_reduction <maximumf>, %11, %cst_7 [0] : vector<16x16xf32> to vector<16xf32>
    %13 = vector.shape_cast %12 : vector<16xf32> to vector<1x16xf32>
    %14 = vector.broadcast %13 : vector<1x16xf32> to vector<16x16xf32>
    %15 = arith.subf %11, %14 : vector<16x16xf32>
    %16 = math.exp %15 : vector<16x16xf32>
    %cst_8 = arith.constant dense<0.000000e+00> : vector<16xf32>
    %17 = vector.multi_reduction <add>, %16, %cst_8 [0] : vector<16x16xf32> to vector<16xf32>
    %18 = vector.shape_cast %17 : vector<16xf32> to vector<1x16xf32>
    %19 = tpu.reciprocal %18 {approx = true} : vector<1x16xf32> -> vector<1x16xf32>
    %20 = vector.broadcast %19 : vector<1x16xf32> to vector<16x16xf32>
    %21 = arith.mulf %16, %20 : vector<16x16xf32>
    %c0_9 = arith.constant 0 : index
    %c0_10 = arith.constant 0 : index
    %22 = vector.load %arg4[%c0_9, %c0_10] : memref<16x2xf32, #tpu.memory_space<vmem>>, vector<16x2xf32>
    %23 = vector.extract_strided_slice %22 {offsets = [0, 0], sizes = [16, 1], strides = [1, 1]} : vector<16x2xf32> to vector<16x1xf32>
    %24 = vector.extract_strided_slice %22 {offsets = [0, 1], sizes = [16, 1], strides = [1, 1]} : vector<16x2xf32> to vector<16x1xf32>
    %25 = vector.broadcast %23 : vector<16x1xf32> to vector<16x16xf32>
    %26 = arith.mulf %21, %25 : vector<16x16xf32>
    %cst_11 = arith.constant dense<0.000000e+00> : vector<16xf32>
    %27 = vector.multi_reduction <add>, %26, %cst_11 [0] : vector<16x16xf32> to vector<16xf32>
    %28 = vector.shape_cast %27 : vector<16xf32> to vector<1x16xf32>
    %29 = vector.broadcast %24 : vector<16x1xf32> to vector<16x16xf32>
    %30 = arith.mulf %21, %29 : vector<16x16xf32>
    %cst_12 = arith.constant dense<0.000000e+00> : vector<16xf32>
    %31 = vector.multi_reduction <add>, %30, %cst_12 [0] : vector<16x16xf32> to vector<16xf32>
    %32 = vector.shape_cast %31 : vector<16xf32> to vector<1x16xf32>
    %33 = tpu.concatenate %28, %32 in 0 : vector<1x16xf32>, vector<1x16xf32> -> vector<2x16xf32>
    %c0_13 = arith.constant 0 : index
    %c0_14 = arith.constant 0 : index
    %c0_15 = arith.constant 0 : index
    %34 = vector.load %arg5[%c0_13, %c0_14, %c0_15] : memref<1x2x16xf32, #tpu.memory_space<vmem>>, vector<1x2x16xf32>
    %35 = vector.shape_cast %34 : vector<1x2x16xf32> to vector<2x16xf32>
    %36 = vector.shape_cast %33 : vector<2x16xf32> to vector<1x2x16xf32>
    tpu.vector_store %arg5[%c0_13, %c0_14, %c0_15], %36 {strides = array<i32>} : memref<1x2x16xf32, #tpu.memory_space<vmem>>, vector<1x2x16xf32>,
    return
  }
  func.func @transform_0(%arg0: i32, %arg1: i32) -> (i32, i32, i32) {
    %c0_i32 = arith.constant 0 : i32
    %c0_i32_0 = arith.constant 0 : i32
    return %arg0, %c0_i32, %arg1 : i32, i32, i32
  }
  func.func @transform_1(%arg0: i32, %arg1: i32) -> (i32, i32, i32, i32) {
    %c0_i32 = arith.constant 0 : i32
    %c0_i32_0 = arith.constant 0 : i32
    %c0_i32_1 = arith.constant 0 : i32
    return %arg0, %c0_i32, %c0_i32_0, %arg1 : i32, i32, i32, i32
  }
  func.func @transform_2(%arg0: i32, %arg1: i32) -> (i32, i32) {
    %c0_i32 = arith.constant 0 : i32
    %c0_i32_0 = arith.constant 0 : i32
    %c0_i32_1 = arith.constant 0 : i32
    return %c0_i32, %c0_i32_0 : i32, i32
  }
  func.func @transform_3(%arg0: i32, %arg1: i32) -> (i32, i32, i32) {
    %c0_i32 = arith.constant 0 : i32
    %c0_i32_0 = arith.constant 0 : i32
    return %arg0, %c0_i32, %arg1 : i32, i32, i32
  }
}

</mosaic_0001>

<bundles_post_ra>
// kernel: adamatcher_forward.7
= control target key start
LH: loop header
LB: loop body
LE: loop exit
PB: predicated region body
PF: predicated region fallthrough
CT: control target
= control target key end

     0   :  { %s1082_s12 = smov 0   ;;  %s1084_s13 = smov 0   ;;  %s1262_s0 = inlined_call_operand.vmem [shape: bf16[4,256,12], index: 0, kind: input, shape index: {}]   ;;  %s1263_s1 = inlined_call_operand.vmem [shape: bf16[12,16], index: 1, kind: input, shape index: {}]   ;;  %s1264_s2 = inlined_call_operand.vmem [shape: f32[1,16], index: 2, kind: input, shape index: {}]   ;;  %s1265_s3 = inlined_call_operand.vmem [shape: bf16[4,256,16], index: 3, kind: output, shape index: {}]  }
   0x1   :  { %s1086_s14 = smov 0  }
   0x2 LB: > { %s25_s15 = sadd.s32 1, %s1056_s13  ;;  %p835_p0 = scmp.ge.s32.totalorder %s1060_s14, 1  ;;  %s1060_s14 = sphi %s1086_s14, %s13_s14   ;;  %s1056_s13 = sphi %s1084_s13, %s1267_s13   ;;  %s1052_s12 = sphi %s1082_s12, %s1266_s12  }
   0x3   : > { %p27_p1 = scmp.ge.s32.totalorder %s25_s15, 4  ;;  %p158_p2 = scmp.lt.s32.totalorder %s1060_s14, 5 }
   0x5   : > { %s1269_s15 = smov (%p27_p1, %s25_s15), 0  ;;  %p159_p3 = pnand %p835_p0, %p158_p2 }
   0x6   : > { %v1021_v0 = vld [vmem:[%s1263_s1] sm:$0x3f] (!%p159_p3)   ;;  %vm386_vm0 = vcmask (!%p159_p3), 1045504   ;;  %p191_p4 = scmp.lt.s32.totalorder (!%p159_p3), %s1052_s12, 3  ;;  %vm337_vm1 = vcmask (!%p159_p3), 97280   ;;  %vm711_vm2 = vcmask (!%p159_p3), 125952  }
   0x7   : > { %162 = sbr.rel (%p159_p3) target bundleno = 266 (0x10a), region = 32  ;;  %995 = vmatprep.subr.msk.bf16.mxu0 (!%p159_p3), %vm386_vm0, %v1021_v0  ;;  %996 = vmatprep.subr.msk.bf16.mxu1 (!%p159_p3), %vm386_vm0, %v1021_v0  ;;  %v388_v1 = vsel (!%p159_p3), %vm386_vm0, %v1021_v0, 0  ;;  %v1148_v18 = vld [vmem:[%s1264_s2] ss:$0 sm:$0xff] (!%p159_p3) }
   0x8   : > { %960 = vmatpush3.bf16.msra.mxu0 (!%p159_p3), %v388_v1  ;;  %994 = vmatpush3.bf16.msra.mxu1 (!%p159_p3), %v388_v1 }
   0xe   : > { %s1271_s12 = smov (!%p191_p4, %s1052_s12), 3 }
   0xf   : > { %s908_s18 = sshll.u32 %s1271_s12, 7 }
  0x10   : > { %s1111_s21 = scalar_lea.vmem %s1262_s0, %s908_s18  ;;  %s1160_s26 = scalar_lea.vmem %s1265_s3, %s908_s18 }
  0x11   : > { %v1022_v2 = vld [vmem:[%s1111_s21] sm:$0xff]   ;;  %v1024_v4 = vld [vmem:[%s1111_s21 + $0x8] sm:$0xff]   ;;  %v1026_v6 = vld [vmem:[%s1111_s21 + $0x10] sm:$0xff]  }
  0x12   : > { %v1023_v3 = vld [vmem:[%s1111_s21 + $0x40] sm:$0xff]   ;;  %961 = vmatprep.mubr.msk.bf16.mxu0 %vm337_vm1, %v1022_v2  ;;  %v1025_v5 = vld [vmem:[%s1111_s21 + $0x48] sm:$0xff]   ;;  %v1027_v7 = vld [vmem:[%s1111_s21 + $0x50] sm:$0xff]  }
  0x13   : > { %977 = vmatprep.mubr.msk.bf16.mxu1 %vm337_vm1, %v1023_v3  ;;  %962 = vmatmul.mubr.msk.bf16.vlgmr.msra.gmra.mrb[0].mxu0 %vm337_vm1, %v1024_v4  ;;  %v1028_v8 = vld [vmem:[%s1111_s21 + $0x18] sm:$0xff]   ;;  %v1030_v10 = vld [vmem:[%s1111_s21 + $0x20] sm:$0xff]   ;;  %v1032_v12 = vld [vmem:[%s1111_s21 + $0x28] sm:$0xff]  }
  0x14   : > { %978 = vmatmul.mubr.msk.bf16.vlgmr.msra.gmra.mrb[0].mxu1 %vm337_vm1, %v1025_v5  ;;  %965 = vmatprep.mubr.msk.bf16.mxu0 %vm337_vm1, %v1026_v6  ;;  %v1029_v9 = vld [vmem:[%s1111_s21 + $0x58] sm:$0xff]   ;;  %v1031_v11 = vld [vmem:[%s1111_s21 + $0x60] sm:$0xff]   ;;  %v1033_v13 = vld [vmem:[%s1111_s21 + $0x68] sm:$0xff]  }
  0x15   : > { %981 = vmatprep.mubr.msk.bf16.mxu1 %vm337_vm1, %v1027_v7  ;;  %v1034_v14 = vld [vmem:[%s1111_s21 + $0x30] sm:$0xff]   ;;  %v1036_v16 = vld [vmem:[%s1111_s21 + $0x38] sm:$0xff]  }
  0x16   : > { %v1035_v15 = vld [vmem:[%s1111_s21 + $0x70] sm:$0xff]   ;;  %v1037_v17 = vld [vmem:[%s1111_s21 + $0x78] sm:$0xff]  }
  0x1b   : > { %966 = vmatmul.mubr.msk.bf16.gmra.mrb[4].mxu0 %vm337_vm1, %v1028_v8 }
  0x1c   : > { %982 = vmatmul.mubr.msk.bf16.gmra.mrb[4].mxu1 %vm337_vm1, %v1029_v9  ;;  %969 = vmatprep.mubr.msk.bf16.mxu0 %vm337_vm1, %v1030_v10 }
  0x1d   : > { %985 = vmatprep.mubr.msk.bf16.mxu1 %vm337_vm1, %v1031_v11 }
  0x23   : > { %970 = vmatmul.mubr.msk.bf16.gmra.mrb[8].mxu0 %vm337_vm1, %v1032_v12 }
  0x24   : > { %986 = vmatmul.mubr.msk.bf16.gmra.mrb[8].mxu1 %vm337_vm1, %v1033_v13  ;;  %973 = vmatprep.mubr.msk.bf16.mxu0 %vm337_vm1, %v1034_v14 }
  0x25   : > { %989 = vmatprep.mubr.msk.bf16.mxu1 %vm337_vm1, %v1035_v15 }
  0x2b   : > { %974 = vmatmul.mubr.msk.bf16.gmra.mrb[12].mxu0 %vm337_vm1, %v1036_v16 }
  0x2c   : > { %990 = vmatmul.mubr.msk.bf16.gmra.mrb[12].mxu1 %vm337_vm1, %v1037_v17 }
  0xe6   : > { %v963_v19 = vpop.f32.mrb[0].mxu0 }
  0xe7   : > { %v433_v20 = vadd.f32 %v963_v19, %v1148_v18  ;;  %v979_v21 = vpop.f32.mrb[0].mxu1  ;;  %v424_v22 = vpop.f32.mrb[1].mxu0 }
  0xe8   : > { %v497_v23 = vadd.f32 %v979_v21, %v1148_v18  ;;  %v425_v24 = vadd.f32 %v1148_v18, %v424_v22  ;;  %v488_v25 = vpop.f32.mrb[1].mxu1  ;;  %v964_v26 = vpop.f32.mrb[2].mxu0 }
  0xe9   : > { %v553_v27 = vmax.f32 %v433_v20, 0.0  ;;  %v489_v28 = vadd.f32 %v1148_v18, %v488_v25  ;;  %v436_v29 = vadd.f32 %v964_v26, %v1148_v18  ;;  %v980_v30 = vpop.f32.mrb[2].mxu1  ;;  %v427_v31 = vpop.f32.mrb[3].mxu0 }
  0xea   : > { %v569_v32 = vmax.f32 %v497_v23, 0.0  ;;  %v551_v33 = vmax.f32 %v425_v24, 0.0  ;;  %v500_v34 = vadd.f32 %v980_v30, %v1148_v18  ;;  %v428_v35 = vadd.f32 %v1148_v18, %v427_v31  ;;  %v491_v36 = vpop.f32.mrb[3].mxu1 }
  0xeb   : > { %v912_v37 = vpack.c.bf16 %v553_v27, %v553_v27  ;;  %v567_v38 = vmax.f32 %v489_v28, 0.0  ;;  %v554_v39 = vmax.f32 %v436_v29, 0.0  ;;  %v492_v40 = vadd.f32 %v1148_v18, %v491_v36 }
  0xec   : > { %v928_v41 = vpack.c.bf16 %v569_v32, %v569_v32  ;;  %v910_v42 = vpack.c.bf16 %v551_v33, %v551_v33  ;;  %v570_v43 = vmax.f32 %v500_v34, 0.0  ;;  %v552_v44 = vmax.f32 %v428_v35, 0.0 }
  0xed   : > { %714 = vst.msk [vmem:[%s1160_s26 + $0x8] sm:$0xf] %vm711_vm2, %v912_v37  ;;  %v926_v45 = vpack.c.bf16 %v567_v38, %v567_v38  ;;  %v913_v46 = vpack.c.bf16 %v554_v39, %v554_v39  ;;  %v568_v47 = vmax.f32 %v492_v40, 0.0 }
  0xee   : > { %730 = vst.msk [vmem:[%s1160_s26 + $0x48] sm:$0xf] %vm711_vm2, %v928_v41  ;;  %712 = vst.msk [vmem:[%s1160_s26] sm:$0xf] %vm711_vm2, %v910_v42  ;;  %v929_v48 = vpack.c.bf16 %v570_v43, %v570_v43  ;;  %v911_v49 = vpack.c.bf16 %v552_v44, %v552_v44  ;;  %v967_v50 = vpop.f32.mrb[4].mxu0 }
  0xef   : > { %728 = vst.msk [vmem:[%s1160_s26 + $0x40] sm:$0xf] %vm711_vm2, %v926_v45  ;;  %715 = vst.msk [vmem:[%s1160_s26 + $0xc] sm:$0xf] %vm711_vm2, %v913_v46  ;;  %v927_v51 = vpack.c.bf16 %v568_v47, %v568_v47  ;;  %v449_v52 = vadd.f32 %v967_v50, %v1148_v18  ;;  %v983_v53 = vpop.f32.mrb[4].mxu1  ;;  %v440_v54 = vpop.f32.mrb[5].mxu0 }
  0xf0   : > { %731 = vst.msk [vmem:[%s1160_s26 + $0x4c] sm:$0xf] %vm711_vm2, %v929_v48  ;;  %713 = vst.msk [vmem:[%s1160_s26 + $0x4] sm:$0xf] %vm711_vm2, %v911_v49  ;;  %v513_v55 = vadd.f32 %v983_v53, %v1148_v18  ;;  %v441_v56 = vadd.f32 %v1148_v18, %v440_v54  ;;  %v504_v57 = vpop.f32.mrb[5].mxu1  ;;  %v968_v58 = vpop.f32.mrb[6].mxu0 }
  0xf1   : > { %729 = vst.msk [vmem:[%s1160_s26 + $0x44] sm:$0xf] %vm711_vm2, %v927_v51  ;;  %v557_v59 = vmax.f32 %v449_v52, 0.0  ;;  %v505_v60 = vadd.f32 %v1148_v18, %v504_v57  ;;  %v452_v61 = vadd.f32 %v968_v58, %v1148_v18  ;;  %v984_v62 = vpop.f32.mrb[6].mxu1  ;;  %v443_v63 = vpop.f32.mrb[7].mxu0 }
  0xf2   : > { %v573_v0 = vmax.f32 %v513_v55, 0.0  ;;  %v555_v1 = vmax.f32 %v441_v56, 0.0  ;;  %v516_v2 = vadd.f32 %v984_v62, %v1148_v18  ;;  %v444_v3 = vadd.f32 %v1148_v18, %v443_v63  ;;  %v507_v4 = vpop.f32.mrb[7].mxu1 }
  0xf3   : > { %v916_v5 = vpack.c.bf16 %v557_v59, %v557_v59  ;;  %v571_v6 = vmax.f32 %v505_v60, 0.0  ;;  %v558_v7 = vmax.f32 %v452_v61, 0.0  ;;  %v508_v8 = vadd.f32 %v1148_v18, %v507_v4 }
  0xf4   : > { %v932_v9 = vpack.c.bf16 %v573_v0, %v573_v0  ;;  %v914_v10 = vpack.c.bf16 %v555_v1, %v555_v1  ;;  %v574_v11 = vmax.f32 %v516_v2, 0.0  ;;  %v556_v12 = vmax.f32 %v444_v3, 0.0 }
  0xf5   : > { %718 = vst.msk [vmem:[%s1160_s26 + $0x18] sm:$0xf] %vm711_vm2, %v916_v5  ;;  %v930_v13 = vpack.c.bf16 %v571_v6, %v571_v6  ;;  %v917_v14 = vpack.c.bf16 %v558_v7, %v558_v7  ;;  %v572_v15 = vmax.f32 %v508_v8, 0.0 }
  0xf6   : > { %734 = vst.msk [vmem:[%s1160_s26 + $0x58] sm:$0xf] %vm711_vm2, %v932_v9  ;;  %716 = vst.msk [vmem:[%s1160_s26 + $0x10] sm:$0xf] %vm711_vm2, %v914_v10  ;;  %v933_v16 = vpack.c.bf16 %v574_v11, %v574_v11  ;;  %v915_v17 = vpack.c.bf16 %v556_v12, %v556_v12  ;;  %v971_v19 = vpop.f32.mrb[8].mxu0 }
  0xf7   : > { %732 = vst.msk [vmem:[%s1160_s26 + $0x50] sm:$0xf] %vm711_vm2, %v930_v13  ;;  %719 = vst.msk [vmem:[%s1160_s26 + $0x1c] sm:$0xf] %vm711_vm2, %v917_v14  ;;  %v931_v20 = vpack.c.bf16 %v572_v15, %v572_v15  ;;  %v465_v21 = vadd.f32 %v971_v19, %v1148_v18  ;;  %v987_v22 = vpop.f32.mrb[8].mxu1  ;;  %v456_v23 = vpop.f32.mrb[9].mxu0 }
  0xf8   : > { %735 = vst.msk [vmem:[%s1160_s26 + $0x5c] sm:$0xf] %vm711_vm2, %v933_v16  ;;  %717 = vst.msk [vmem:[%s1160_s26 + $0x14] sm:$0xf] %vm711_vm2, %v915_v17  ;;  %v529_v24 = vadd.f32 %v987_v22, %v1148_v18  ;;  %v457_v25 = vadd.f32 %v1148_v18, %v456_v23  ;;  %v520_v26 = vpop.f32.mrb[9].mxu1  ;;  %v972_v27 = vpop.f32.mrb[10].mxu0 }
  0xf9   : > { %733 = vst.msk [vmem:[%s1160_s26 + $0x54] sm:$0xf] %vm711_vm2, %v931_v20  ;;  %v561_v28 = vmax.f32 %v465_v21, 0.0  ;;  %v521_v29 = vadd.f32 %v1148_v18, %v520_v26  ;;  %v468_v30 = vadd.f32 %v972_v27, %v1148_v18  ;;  %v988_v31 = vpop.f32.mrb[10].mxu1  ;;  %v459_v32 = vpop.f32.mrb[11].mxu0 }
  0xfa   : > { %v577_v33 = vmax.f32 %v529_v24, 0.0  ;;  %v559_v34 = vmax.f32 %v457_v25, 0.0  ;;  %v532_v35 = vadd.f32 %v988_v31, %v1148_v18  ;;  %v460_v36 = vadd.f32 %v1148_v18, %v459_v32  ;;  %v523_v37 = vpop.f32.mrb[11].mxu1 }
  0xfb   : > { %v920_v38 = vpack.c.bf16 %v561_v28, %v561_v28  ;;  %v575_v39 = vmax.f32 %v521_v29, 0.0  ;;  %v562_v40 = vmax.f32 %v468_v30, 0.0  ;;  %v524_v41 = vadd.f32 %v1148_v18, %v523_v37 }
  0xfc   : > { %v936_v42 = vpack.c.bf16 %v577_v33, %v577_v33  ;;  %v918_v43 = vpack.c.bf16 %v559_v34, %v559_v34  ;;  %v578_v44 = vmax.f32 %v532_v35, 0.0  ;;  %v560_v45 = vmax.f32 %v460_v36, 0.0 }
  0xfd   : > { %722 = vst.msk [vmem:[%s1160_s26 + $0x28] sm:$0xf] %vm711_vm2, %v920_v38  ;;  %v934_v46 = vpack.c.bf16 %v575_v39, %v575_v39  ;;  %v921_v47 = vpack.c.bf16 %v562_v40, %v562_v40  ;;  %v576_v48 = vmax.f32 %v524_v41, 0.0 }
  0xfe   : > { %738 = vst.msk [vmem:[%s1160_s26 + $0x68] sm:$0xf] %vm711_vm2, %v936_v42  ;;  %720 = vst.msk [vmem:[%s1160_s26 + $0x20] sm:$0xf] %vm711_vm2, %v918_v43  ;;  %v937_v49 = vpack.c.bf16 %v578_v44, %v578_v44  ;;  %v919_v50 = vpack.c.bf16 %v560_v45, %v560_v45  ;;  %v975_v51 = vpop.f32.mrb[12].mxu0 }
  0xff   : > { %736 = vst.msk [vmem:[%s1160_s26 + $0x60] sm:$0xf] %vm711_vm2, %v934_v46  ;;  %723 = vst.msk [vmem:[%s1160_s26 + $0x2c] sm:$0xf] %vm711_vm2, %v921_v47  ;;  %v935_v52 = vpack.c.bf16 %v576_v48, %v576_v48  ;;  %v481_v53 = vadd.f32 %v975_v51, %v1148_v18  ;;  %v991_v54 = vpop.f32.mrb[12].mxu1  ;;  %v472_v55 = vpop.f32.mrb[13].mxu0 }
 0x100   : > { %739 = vst.msk [vmem:[%s1160_s26 + $0x6c] sm:$0xf] %vm711_vm2, %v937_v49  ;;  %721 = vst.msk [vmem:[%s1160_s26 + $0x24] sm:$0xf] %vm711_vm2, %v919_v50  ;;  %v545_v56 = vadd.f32 %v991_v54, %v1148_v18  ;;  %v473_v57 = vadd.f32 %v1148_v18, %v472_v55  ;;  %v536_v58 = vpop.f32.mrb[13].mxu1  ;;  %v976_v59 = vpop.f32.mrb[14].mxu0 }
 0x101   : > { %737 = vst.msk [vmem:[%s1160_s26 + $0x64] sm:$0xf] %vm711_vm2, %v935_v52  ;;  %v565_v60 = vmax.f32 %v481_v53, 0.0  ;;  %v537_v61 = vadd.f32 %v1148_v18, %v536_v58  ;;  %v484_v62 = vadd.f32 %v976_v59, %v1148_v18  ;;  %v992_v63 = vpop.f32.mrb[14].mxu1  ;;  %v475_v0 = vpop.f32.mrb[15].mxu0 }
 0x102   : > { %v581_v1 = vmax.f32 %v545_v56, 0.0  ;;  %v563_v2 = vmax.f32 %v473_v57, 0.0  ;;  %v548_v3 = vadd.f32 %v992_v63, %v1148_v18  ;;  %v476_v4 = vadd.f32 %v1148_v18, %v475_v0  ;;  %v539_v5 = vpop.f32.mrb[15].mxu1 }
 0x103   : > { %v924_v6 = vpack.c.bf16 %v565_v60, %v565_v60  ;;  %v579_v7 = vmax.f32 %v537_v61, 0.0  ;;  %v566_v8 = vmax.f32 %v484_v62, 0.0  ;;  %v540_v9 = vadd.f32 %v1148_v18, %v539_v5 }
 0x104   : > { %v940_v10 = vpack.c.bf16 %v581_v1, %v581_v1  ;;  %v922_v11 = vpack.c.bf16 %v563_v2, %v563_v2  ;;  %v582_v12 = vmax.f32 %v548_v3, 0.0  ;;  %v564_v13 = vmax.f32 %v476_v4, 0.0 }
 0x105   : > { %726 = vst.msk [vmem:[%s1160_s26 + $0x38] sm:$0xf] %vm711_vm2, %v924_v6  ;;  %v938_v14 = vpack.c.bf16 %v579_v7, %v579_v7  ;;  %v925_v15 = vpack.c.bf16 %v566_v8, %v566_v8  ;;  %v580_v16 = vmax.f32 %v540_v9, 0.0 }
 0x106   : > { %742 = vst.msk [vmem:[%s1160_s26 + $0x78] sm:$0xf] %vm711_vm2, %v940_v10  ;;  %724 = vst.msk [vmem:[%s1160_s26 + $0x30] sm:$0xf] %vm711_vm2, %v922_v11  ;;  %v941_v17 = vpack.c.bf16 %v582_v12, %v582_v12  ;;  %v923_v19 = vpack.c.bf16 %v564_v13, %v564_v13 }
 0x107   : > { %740 = vst.msk [vmem:[%s1160_s26 + $0x70] sm:$0xf] %vm711_vm2, %v938_v14  ;;  %727 = vst.msk [vmem:[%s1160_s26 + $0x3c] sm:$0xf] %vm711_vm2, %v925_v15  ;;  %v939_v18 = vpack.c.bf16 %v580_v16, %v580_v16 }
 0x108   : > { %743 = vst.msk [vmem:[%s1160_s26 + $0x7c] sm:$0xf] %vm711_vm2, %v941_v17  ;;  %725 = vst.msk [vmem:[%s1160_s26 + $0x34] sm:$0xf] %vm711_vm2, %v923_v19 }
 0x109   : > { %741 = vst.msk [vmem:[%s1160_s26 + $0x74] sm:$0xf] %vm711_vm2, %v939_v18 }
 0x10a PF: > { %s13_s14 = sadd.s32 1, %s1060_s14   ;;  %s1266_s12 = smov %s1056_s13 }
 0x10b   : > { %p10_p5 = scmp.ge.s32.totalorder %s13_s14, 6   ;;  %s1267_s13 = smov %s1269_s15 }
 0x10d   :  { %12 = sbr.rel (!%p10_p5) target bundleno = 2 (0x2), region = 62 }

// kernel: adamatcher_forward.8
= control target key start
LH: loop header
LB: loop body
LE: loop exit
PB: predicated region body
PF: predicated region fallthrough
CT: control target
= control target key end

     0   :  { %s650_s12 = smov 0   ;;  %s652_s13 = smov 0   ;;  %s738_s0 = inlined_call_operand.vmem [shape: bf16[4,16,256], index: 0, kind: input, shape index: {}]   ;;  %s739_s1 = inlined_call_operand.vmem [shape: bf16[256,32], index: 1, kind: input, shape index: {}]   ;;  %s740_s2 = inlined_call_operand.vmem [shape: f32[1,32], index: 2, kind: input, shape index: {}]   ;;  %s741_s3 = inlined_call_operand.vmem [shape: bf16[4,16,32], index: 3, kind: output, shape index: {}]  }
   0x1   :  { %s654_s14 = smov 0  }
   0x2 LB: > { %s25_s15 = sadd.s32 1, %s624_s13  ;;  %p509_p0 = scmp.ge.s32.totalorder %s628_s14, 1  ;;  %s628_s14 = sphi %s654_s14, %s13_s14   ;;  %s624_s13 = sphi %s652_s13, %s743_s13   ;;  %s620_s12 = sphi %s650_s12, %s742_s12  }
   0x3   : > { %p27_p1 = scmp.ge.s32.totalorder %s25_s15, 4  ;;  %p159_p2 = scmp.lt.s32.totalorder %s628_s14, 5 }
   0x5   : > { %s745_s15 = smov (%p27_p1, %s25_s15), 0  ;;  %p160_p3 = pnand %p509_p0, %p159_p2 }
   0x6   : > { %v587_v0 = vld [vmem:[%s739_s1 + $0x40] sm:$0xff] (!%p160_p3)   ;;  %v589_v2 = vld [vmem:[%s739_s1 + $0x48] sm:$0xff] (!%p160_p3)   ;;  %p193_p4 = scmp.lt.s32.totalorder (!%p160_p3), %s620_s12, 3  ;;  %v591_v4 = vld [vmem:[%s739_s1 + $0x50] sm:$0xff] (!%p160_p3)   ;;  %vm412_vm0 = vcmask (!%p160_p3), 257024  }
   0x7   : > { %163 = sbr.rel (%p160_p3) target bundleno = 263 (0x107), region = 32  ;;  %v588_v1 = vld [vmem:[%s739_s1] sm:$0xff] (!%p160_p3)   ;;  %541 = vmatprep.subr.bf16.mxu0 (!%p160_p3), %v587_v0  ;;  %v590_v3 = vld [vmem:[%s739_s1 + $0x8] sm:$0xff] (!%p160_p3)   ;;  %v592_v5 = vld [vmem:[%s739_s1 + $0x10] sm:$0xff] (!%p160_p3)  }
   0x8   : > { %542 = vmatpush3.bf16.msra.mxu0 (!%p160_p3), %v588_v1  ;;  %v593_v6 = vld [vmem:[%s739_s1 + $0x58] sm:$0xff] (!%p160_p3)   ;;  %v595_v8 = vld [vmem:[%s739_s1 + $0x60] sm:$0xff] (!%p160_p3)   ;;  %v597_v10 = vld [vmem:[%s739_s1 + $0x68] sm:$0xff] (!%p160_p3)  }
   0x9   : > { %543 = vmatprep.subr.bf16.mxu0 (!%p160_p3), %v589_v2  ;;  %v594_v7 = vld [vmem:[%s739_s1 + $0x18] sm:$0xff] (!%p160_p3)   ;;  %v596_v9 = vld [vmem:[%s739_s1 + $0x20] sm:$0xff] (!%p160_p3)   ;;  %v598_v12 = vld [vmem:[%s739_s1 + $0x28] sm:$0xff] (!%p160_p3)  }
   0xa   : > { %v599_v13 = vld [vmem:[%s739_s1 + $0x70] sm:$0xff] (!%p160_p3)   ;;  %v601_v15 = vld [vmem:[%s739_s1 + $0x78] sm:$0xff] (!%p160_p3)   ;;  %v514_v19 = vld [vmem:[%s740_s2] ss:$0 sm:$0xff] (!%p160_p3) }
   0xb   : > { %v600_v14 = vld [vmem:[%s739_s1 + $0x30] sm:$0xff] (!%p160_p3)   ;;  %v602_v16 = vld [vmem:[%s739_s1 + $0x38] sm:$0xff] (!%p160_p3)  }
   0xc   : > { %544 = vmatpush3.bf16.msra.mxu0 (!%p160_p3), %v590_v3 }
   0xd   : > { %545 = vmatprep.subr.bf16.mxu0 (!%p160_p3), %v591_v4 }
   0xe   : > { %s747_s12 = smov (!%p193_p4, %s620_s12), 3 }
   0xf   : > { %s537_s5 = sshll.u32 %s747_s12, 4  ;;  %s538_s4 = sshll.u32 %s747_s12, 3 }
  0x10   : > { %546 = vmatpush3.bf16.msra.mxu0 %v592_v5  ;;  %s201_s10 = scalar_lea.vmem %s738_s0, %s537_s5  ;;  %s211_s7 = scalar_lea.vmem %s741_s3, %s538_s4 }
  0x11   : > { %547 = vmatprep.subr.bf16.mxu0 %v593_v6  ;;  %v605_v11 = vld [vmem:[%s201_s10 + $0x4] ss:$8 sps:$4 sm:$0xff]   ;;  %v603_v17 = vld [vmem:[%s201_s10] ss:$8 sps:$4 sm:$0xff]  }
  0x12   : > { %393 = vmatprep.mubr.bf16.mxu0 %v605_v11 }
  0x14   : > { %548 = vmatpush3.bf16.msra.mxu0 %v594_v7 }
  0x15   : > { %549 = vmatprep.subr.bf16.mxu0 %v595_v8 }
  0x18   : > { %550 = vmatpush3.bf16.msra.mxu0 %v596_v9 }
  0x19   : > { %551 = vmatprep.subr.bf16.mxu0 %v597_v10 }
  0x1c   : > { %552 = vmatpush3.bf16.msra.mxu0 %v598_v12 }
  0x1d   : > { %553 = vmatprep.subr.bf16.mxu0 %v599_v13 }
  0x20   : > { %554 = vmatpush3.bf16.msra.mxu0 %v600_v14 }
  0x21   : > { %555 = vmatprep.subr.bf16.mxu0 %v601_v15 }
  0x24   : > { %556 = vmatpush3.bf16.msra.mxu0 %v602_v16 }
  0x27   : > { %394 = vmatmul.mubr.bf16.vlgmr.msra.gmra.mrb[0].mxu0 %v603_v17 }
  0xfa   : > { %v557_v18 = vpop.f32.mrb[0].mxu0 }
  0xfb   : > { %v558_v20 = vpop.f32.mrb[1].mxu0 }
  0xfc   : > { %v559_v21 = vadd.f32 %v558_v20, %v557_v18  ;;  %v560_v22 = vpop.f32.mrb[2].mxu0 }
  0xfd   : > { %v561_v23 = vpop.f32.mrb[3].mxu0 }
  0xfe   : > { %v396_v24 = vadd.f32 %v559_v21, %v514_v19  ;;  %v562_v25 = vadd.f32 %v561_v23, %v560_v22 }
 0x100   : > { %v402_v26 = vmax.f32 %v396_v24, 0.0  ;;  %v399_v27 = vadd.f32 %v562_v25, %v514_v19 }
 0x102   : > { %v539_v28 = vpack.c.bf16 %v402_v26, %v402_v26  ;;  %v403_v29 = vmax.f32 %v399_v27, 0.0 }
 0x104   : > { %413 = vst.msk [vmem:[%s211_s7] sm:$0xf] %vm412_vm0, %v539_v28  ;;  %v540_v30 = vpack.c.bf16 %v403_v29, %v403_v29 }
 0x106   : > { %414 = vst.msk [vmem:[%s211_s7 + $0x4] sm:$0xf] %vm412_vm0, %v540_v30 }
 0x107 PF: > { %s13_s14 = sadd.s32 1, %s628_s14   ;;  %s742_s12 = smov %s624_s13 }
 0x108   : > { %p10_p5 = scmp.ge.s32.totalorder %s13_s14, 6   ;;  %s743_s13 = smov %s745_s15 }
 0x10a   :  { %12 = sbr.rel (!%p10_p5) target bundleno = 2 (0x2), region = 62 }

// kernel: adamatcher_forward.11
= control target key start
LH: loop header
LB: loop body
LE: loop exit
PB: predicated region body
PF: predicated region fallthrough
CT: control target
= control target key end

     0   :  { %s537_s9 = smov 0   ;;  %s539_s10 = smov 0   ;;  %s586_s0 = inlined_call_operand.vmem [shape: bf16[2,16,32], index: 0, kind: input, shape index: {}]   ;;  %s587_s1 = inlined_call_operand.vmem [shape: bf16[2,16,32], index: 1, kind: input, shape index: {}]   ;;  %s588_s2 = inlined_call_operand.vmem [shape: f32[2,1,16], index: 2, kind: output, shape index: {}]  }
   0x1   :  { %s541_s11 = smov 0  }
   0x2 LB: > { %s31_s12 = sadd.s32 1, %s513_s10  ;;  %p438_p0 = scmp.ge.s32.totalorder %s517_s11, 1  ;;  %s517_s11 = sphi %s541_s11, %s12_s11   ;;  %s513_s10 = sphi %s539_s10, %s590_s10   ;;  %s509_s9 = sphi %s537_s9, %s589_s9  }
   0x3   : > { %p33_p1 = scmp.ge.s32.totalorder %s31_s12, 2  ;;  %p157_p2 = scmp.lt.s32.totalorder %s517_s11, 3 }
   0x5   : > { %s592_s12 = smov (%p33_p1, %s31_s12), 0  ;;  %p158_p3 = pnand %p438_p0, %p157_p2 }
   0x6   : > { %vm224_vm0 = vcmask (!%p158_p3), 122880   ;;  %p194_p4 = scmp.lt.s32.totalorder (!%p158_p3), %s509_s9, 1  ;;  %v519_v0 = vmov (!%p158_p3), -inf   ;;  %v520_v1 = vmov (!%p158_p3), 0.0   ;;  %vm521_vm1 = vmmov (!%p158_p3), 0  }
   0x7   : > { %161 = sbr.rel (%p158_p3) target bundleno = 318 (0x13e), region = 28  ;;  %225 = vst.msk [vmem:[#allocation2] sm:$0x1] (!%p158_p3), %vm224_vm0, %v519_v0  ;;  %226 = vst.msk [vmem:[#allocation3] sm:$0x1] (!%p158_p3), %vm224_vm0, %v520_v1  ;;  %452 = vmatprep.subr.bf16.mxu0 (!%p158_p3), %v520_v1  ;;  %454 = vmatprep.mubr.msk.bf16.mxu0 (!%p158_p3), %vm521_vm1, %v520_v1  ;;  %vm241_vm2 = vcmask (!%p158_p3), 261120   ;;  %v304_v16 = vlaneseq (!%p158_p3) }
   0x8   : > { %vm292_vm3 = vcmask (!%p158_p3), 130048  }
   0x9   : > { %v305_v19 = vshrl.u32 (!%p158_p3), %v304_v16, 7 }
   0xb   : > { %v306_v23 = vsub.s32 (!%p158_p3), 0, %v305_v19 }
   0xe   : > { %s594_s9 = smov (!%p194_p4, %s509_s9), 1  ;;  %v291_v21 = vld [vmem:[#allocation2] sm:$0x1]  ;;  %v315_v42 = vld [vmem:[#allocation3] sm:$0x1] }
   0xf   : > { %s448_s13 = sshll.u32 %s594_s9, 3  ;;  %s218_s22 = scalar_lea.vmem %s588_s2, %s594_s9 }
  0x10   : > { %s201_s16 = scalar_lea.vmem %s586_s0, %s448_s13  ;;  %s211_s19 = scalar_lea.vmem %s587_s1, %s448_s13 }
  0x11   : > { %v485_v2 = vld [vmem:[%s211_s19] sm:$0xff]  }
  0x12   : > { %v246_v3 = vsel %vm241_vm2, %v485_v2, 0  ;;  %v486_v4 = vld [vmem:[%s201_s16] sm:$0xff]  }
  0x13   : > { %453 = vmatpush3.bf16.xpose.msra.mxu0 %v246_v3 }
  0x1a   : > { %455 = vmatmul.mubr.msk.bf16.vlgmr.msra.gmra.mrb[0].mxu0 %vm241_vm2, %v486_v4 }
  0xed   : > { %v282_v5 = vpop.f32.mrb[0].mxu0 }
  0xee   : > { %v289_v6 = vmul.f32 0.3125, %v282_v5  ;;  %v456_v7 = vpop.f32.mrb[1].mxu0 }
  0xef   : > { %v285_v8 = vpop.f32.mrb[2].mxu0 }
  0xf0   : > { %v290_v9 = vmul.f32 0.3125, %v285_v8  ;;  %v457_v10 = vpop.f32.mrb[3].mxu0  ;;  %v293_v11 = vsel %vm292_vm3, %v289_v6, -inf }
  0xf2   : > { %v294_v12 = vsel %vm292_vm3, %v290_v9, -inf }
  0xf3   : > { %v295_v13 = vmax.f32 %v293_v11, %v294_v12 }
  0xf5   : > { %v296_v14 = vrot.slane %v295_v13, 4 }
  0xf7   : > { %v297_v15 = vmax.f32 %v295_v13, %v296_v14 }
  0xf9   : > { %v298_v17 = vrot.slane %v297_v15, 2 }
  0xfb   : > { %v299_v18 = vmax.f32 %v297_v15, %v298_v17 }
  0xfd   : > { %v300_v20 = vrot.slane %v299_v18, 1 }
  0xff   : > { %v301_v22 = vmax.f32 %v299_v18, %v300_v20 }
 0x101   : > { %v302_v24 = vmax.f32 %v291_v21, %v301_v22 }
 0x103   : > { %v307_v25 = vrot.slane %v302_v24, %v306_v23  ;;  %332 = vst.msk [vmem:[#allocation2] sm:$0x1] %vm224_vm0, %v302_v24  ;;  %v316_v30 = vsub.f32 %v291_v21, %v302_v24 }
 0x105   : > { %v309_v26 = vsub.f32 %v289_v6, %v307_v25  ;;  %v310_v27 = vsub.f32 %v290_v9, %v307_v25  ;;  %v317_v31 = vmul.f32 1.442695, %v316_v30 }
 0x107   : > { %v311_v28 = vmul.f32 1.442695, %v309_v26  ;;  %v313_v29 = vmul.f32 1.442695, %v310_v27 }
 0x109   : > { %487 = vpow2.f32 %v311_v28 }
 0x10a   : > { %489 = vpow2.f32 %v313_v29  ;;  %v336_v50 = vld [vmem:[#allocation2] sm:$0x1] }
 0x10b   : > { %491 = vpow2.f32 %v317_v31 }
 0x113   : > { %v488_v32 = vpop.eup %487 }
 0x114   : > { %v490_v33 = vpop.eup %489  ;;  %v320_v34 = vsel %vm292_vm3, %v488_v32, 0.0 }
 0x115   : > { %v321_v35 = vsel %vm292_vm3, %v490_v33, 0.0  ;;  %v492_v41 = vpop.eup %491 }
 0x116   : > { %v322_v36 = vadd.f32 %v321_v35, %v320_v34  ;;  %v319_v44 = vmul.f32 %v492_v41, %v315_v42 }
 0x118   : > { %v323_v37 = vrot.slane %v322_v36, 4 }
 0x11a   : > { %v324_v38 = vadd.f32 %v323_v37, %v322_v36 }
 0x11c   : > { %v325_v39 = vrot.slane %v324_v38, 2 }
 0x11e   : > { %v326_v40 = vadd.f32 %v325_v39, %v324_v38 }
 0x120   : > { %v327_v43 = vrot.slane %v326_v40, 1 }
 0x122   : > { %v328_v45 = vadd.f32 %v327_v43, %v326_v40 }
 0x124   : > { %v329_v46 = vadd.f32 %v328_v45, %v319_v44 }
 0x126   : > { %331 = vst.msk [vmem:[#allocation3] sm:$0x1] %vm224_vm0, %v329_v46 }
 0x12d   : > { %v337_v47 = vld [vmem:[#allocation3] sm:$0x1] }
 0x12e   : > { %493 = vlog2.f32 %v337_v47 }
 0x138   : > { %v494_v48 = vpop.eup %493 }
 0x139   : > { %v339_v49 = vmul.f32 0.6931472, %v494_v48 }
 0x13b   : > { %v340_v51 = vadd.f32 %v339_v49, %v336_v50 }
 0x13d   : > { %341 = vst.msk [vmem:[%s218_s22] sm:$0x1] %vm224_vm0, %v340_v51 }
 0x13e PF: > { %s12_s11 = sadd.s32 1, %s517_s11   ;;  %s589_s9 = smov %s513_s10 }
 0x13f   : > { %p9_p5 = scmp.ge.s32.totalorder %s12_s11, 4   ;;  %s590_s10 = smov %s592_s12 }
 0x141   :  { %11 = sbr.rel (!%p9_p5) target bundleno = 2 (0x2), region = 69 }

// kernel: adamatcher_forward.9
= control target key start
LH: loop header
LB: loop body
LE: loop exit
PB: predicated region body
PF: predicated region fallthrough
CT: control target
= control target key end

     0   :  { %s1552_s11 = smov 0   ;;  %s1554_s12 = smov 0   ;;  %s1710_s0 = inlined_call_operand.vmem [shape: bf16[4,16,32], index: 0, kind: input, shape index: {}, may-alias: {0,1}]   ;;  %s1711_s1 = inlined_call_operand.vmem [shape: bf16[4,16,32], index: 1, kind: input, shape index: {}, may-alias: {0,1}]   ;;  %s1712_s2 = inlined_call_operand.vmem [shape: bf16[16,32], index: 2, kind: input, shape index: {}, may-alias: {2,3}]   ;;  %s1713_s3 = inlined_call_operand.vmem [shape: bf16[16,32], index: 3, kind: input, shape index: {}, may-alias: {2,3}]   ;;  %s1714_s4 = inlined_call_operand.vmem [shape: bf16[3,32,32], index: 4, kind: input, shape index: {}]   ;;  %s1715_s5 = inlined_call_operand.vmem [shape: bf16[32,32], index: 5, kind: input, shape index: {}]   ;;  %s1716_s6 = inlined_call_operand.vmem [shape: bf16[1,32], index: 6, kind: input, shape index: {}]   ;;  %s1717_s7 = inlined_call_operand.<no memory space> [shape: f32[1,1], index: 7, kind: input, shape index: {}]   ;;  %s1718_s8 = inlined_call_operand.vmem [shape: bf16[4,16,32], index: 8, kind: output, shape index: {0}]   ;;  %s1719_s9 = inlined_call_operand.vmem [shape: f32[4,1,16], index: 9, kind: output, shape index: {1}]  }
   0x1   :  { %v15_v0 = vstv %s1717_s7  ;;  %s1556_s13 = smov 0  }
   0x2   :  { %16 = vst [vmem:[#allocation6] sm:$0x1] %v15_v0 }
   0x3 LB: > { %s41_s7 = sadd.s32 1, %s1489_s12  ;;  %p1304_p0 = scmp.ge.s32.totalorder %s1493_s13, 1  ;;  %s1493_s13 = sphi %s1556_s13, %s22_s13   ;;  %s1489_s12 = sphi %s1554_s12, %s1721_s12   ;;  %s1485_s11 = sphi %s1552_s11, %s1720_s11  }
   0x4   : > { %p43_p1 = scmp.ge.s32.totalorder %s41_s7, 4  ;;  %p413_p2 = scmp.lt.s32.totalorder %s1493_s13, 5 }
   0x6   : > { %s1723_s7 = smov (%p43_p1, %s41_s7), 0  ;;  %p414_p3 = pnand %p1304_p0, %p413_p2 }
   0x7   : > { %v1447_v1 = vld [vmem:[%s1714_s4] sm:$0xff] (!%p414_p3)   ;;  %v1495_v2 = vmov (!%p414_p3), 0.0   ;;  %v1448_v3 = vld [vmem:[%s1714_s4 + $0x10] sm:$0xff] (!%p414_p3)   ;;  %v1449_v4 = vld [vmem:[%s1714_s4 + $0x8] sm:$0xff] (!%p414_p3)   ;;  %vm1496_vm0 = vmmov (!%p414_p3), 0   ;;  %p496_p4 = scmp.lt.s32.totalorder (!%p414_p3), %s1485_s11, 3 }
   0x8   : > { %417 = sbr.rel (%p414_p3) target bundleno = 1526 (0x5f6), region = 52  ;;  %1367 = vmatprep.subr.bf16.mxu0 (!%p414_p3), %v1495_v2  ;;  %1375 = vmatprep.subr.bf16.mxu1 (!%p414_p3), %v1495_v2  ;;  %vm579_vm1 = vcmask (!%p414_p3), 261120   ;;  %v1450_v5 = vld [vmem:[%s1714_s4 + $0x18] sm:$0xff] (!%p414_p3)   ;;  %v584_v6 = vld [vmem:[%s1712_s2] sm:$0xf] (!%p414_p3)  ;;  %s505_s27 = sadd.s32 (!%p414_p3), 2, %s1485_s11 }
   0x9   : > { %1368 = vmatpush3.bf16.msra.mxu0 (!%p414_p3), %v1447_v1  ;;  %1371 = vmatprep.mubr.msk.bf16.mxu0 (!%p414_p3), %vm1496_vm0, %v1495_v2  ;;  %580 = vst.msk [vmem:[#allocation5] sm:$0xff] (!%p414_p3), %vm579_vm1, %v1495_v2  ;;  %581 = vst.msk [vmem:[#allocation5 + $0x8] sm:$0xff] (!%p414_p3), %vm579_vm1, %v1495_v2  ;;  %v585_v7 = vld [vmem:[%s1712_s2 + $0x4] sm:$0xf] (!%p414_p3)  ;;  %p506_p5 = scmp.lt.s32.totalorder (!%p414_p3), %s505_s27, 0  ;;  %s507_s14 = ssub.s32 (!%p414_p3), 0, %s505_s27 }
   0xa   : > { %1369 = vmatprep.subr.bf16.mxu0 (!%p414_p3), %v1495_v2  ;;  %1376 = vmatpush3.bf16.msra.mxu1 (!%p414_p3), %v1448_v3  ;;  %v657_v13 = vld [vmem:[%s1713_s3] sm:$0xf] (!%p414_p3)  ;;  %v658_v14 = vld [vmem:[%s1713_s3 + $0x4] sm:$0xf] (!%p414_p3)  ;;  %vm574_vm2 = vcmask (!%p414_p3), 7168   ;;  %v1497_v33 = vmov (!%p414_p3), -inf  }
   0xb   : > { %1377 = vmatprep.subr.bf16.mxu1 (!%p414_p3), %v1495_v2  ;;  %1379 = vmatprep.mubr.msk.bf16.mxu1 (!%p414_p3), %vm1496_vm0, %v1495_v2  ;;  %v1451_v32 = vld [vmem:[%s1714_s4 + $0x20] sm:$0xff] (!%p414_p3)   ;;  %575 = vst.msk [vmem:[#allocation3] sm:$0xff] (!%p414_p3), %vm574_vm2, %v1497_v33  ;;  %576 = vst.msk [vmem:[#allocation3 + $0x8] sm:$0xff] (!%p414_p3), %vm574_vm2, %v1497_v33  ;;  %v1452_v34 = vld [vmem:[%s1714_s4 + $0x28] sm:$0xff] (!%p414_p3)   ;;  %vm840_vm3 = vcmask (!%p414_p3), 130048   ;;  %v1498_v43 = vmov (!%p414_p3), 0  }
   0xc   : > { %577 = vst.msk [vmem:[#allocation4] sm:$0xff] (!%p414_p3), %vm574_vm2, %v1495_v2  ;;  %578 = vst.msk [vmem:[#allocation4 + $0x8] sm:$0xff] (!%p414_p3), %vm574_vm2, %v1495_v2  ;;  %1445 = vset.pattern.permute.xlu1 (!%p414_p3), %v1498_v43  ;;  %1446 = vset.pattern.permute.xlu0 (!%p414_p3), %v1498_v43  ;;  %v974_v43 = vld [vmem:[%s1712_s2] sm:$0xf] (!%p414_p3)  ;;  %vm1051_vm4 = vcmask (!%p414_p3), 257024   ;;  %vm1117_vm5 = vcmask (!%p414_p3), 122880  }
   0xd   : > { %1370 = vmatpush3.bf16.msra.mxu0 (!%p414_p3), %v1449_v4 }
   0xe   : > { %1378 = vmatpush3.bf16.msra.mxu1 (!%p414_p3), %v1450_v5  ;;  %1383 = vmatprep.subr.bf16.mxu0 (!%p414_p3), %v1495_v2 }
   0xf   : > { %s1592_s22 = scalar_select %p496_p4, %s1485_s11, 3  ;;  %1391 = vmatprep.subr.bf16.mxu1 %v1495_v2 }
  0x10   : > { %s1307_s11 = smin.u32 %s507_s14, %s505_s27 }
  0x11   : > { %s1344_s28 = sshll.u32 %s1592_s22, 3  ;;  %s509_s15 = sand.u32 3, %s1307_s11  }
  0x12   : > { %s1613_s10 = scalar_lea.vmem %s1710_s0, %s1344_s28  ;;  %s510_s16 = ssub.s32 0, %s509_s15  ;;  %v838_v44 = vld [vmem:[#allocation3] sm:$0xff]  ;;  %v839_v47 = vld [vmem:[#allocation3 + $0x8] sm:$0xff] }
  0x13   : > { %v582_v8 = vld [vmem:[%s1613_s10] sm:$0xf]  ;;  %v583_v9 = vld [vmem:[%s1613_s10 + $0x4] sm:$0xf]  ;;  %s1725_s16 = smov (!%p506_p5, %s510_s16), %s509_s15  ;;  %s561_s25 = scalar_lea.vmem %s1718_s8, %s1344_s28 }
  0x14   : > { %v586_v10 = vadd.bf16 %v584_v6, %v582_v8  ;;  %v587_v11 = vadd.bf16 %v585_v7, %v583_v9  ;;  %p1309_p6 = scmp.lt.s32.totalorder %s1725_s16, 0  ;;  %s516_s17 = sadd.s32 4, %s1725_s16  ;;  %v1055_v9 = vld [vmem:[#allocation6] sm:$0x1] }
  0x15   : > { %s568_s29 = scalar_lea.vmem %s1719_s9, %s1592_s22 }
  0x16   : > { %v1314_v12 = vcombine.low %v586_v10, %v587_v11  ;;  %s1727_s17 = smov (!%p1309_p6, %s516_s17), %s1725_s16  ;;  %v871_v10 = vld [vmem:[#allocation4] sm:$0xff] }
  0x17   : > { %p519_p7 = scmp.lt.s32.totalorder %s1727_s17, 3 }
  0x18   : > { %1372 = vmatmul.mubr.msk.bf16.vlgmr.msra.gmra.mrb[0].mxu0 %vm579_vm1, %v1314_v12 }
  0x19   : > { %1387 = vmatprep.mubr.msk.bf16.mxu0 %vm1496_vm0, %v1495_v2  ;;  %s1729_s17 = smov (!%p519_p7, %s1727_s17), 3  ;;  %1384 = vmatpush3.bf16.msra.mxu0 %v1451_v32 }
  0x1a   : > { %s1345_s18 = sshll.u32 %s1729_s17, 3  ;;  %1385 = vmatprep.subr.bf16.mxu0 %v1495_v2 }
  0x1b   : > { %s526_s26 = scalar_lea.vmem %s1711_s1, %s1345_s18 }
  0x1c   : > { %v655_v15 = vld [vmem:[%s526_s26] sm:$0xf]  ;;  %v656_v16 = vld [vmem:[%s526_s26 + $0x4] sm:$0xf] }
  0x1d   : > { %v659_v17 = vadd.bf16 %v657_v13, %v655_v15  ;;  %v660_v18 = vadd.bf16 %v658_v14, %v656_v16  ;;  %1386 = vmatpush3.bf16.msra.mxu0 %v1452_v34  ;;  %v872_v13 = vld [vmem:[#allocation4 + $0x8] sm:$0xff] }
  0x1e   : > { %1397 = vmatprep.subr.bf16.mxu0 %v1495_v2 }
  0x1f   : > { %v1322_v19 = vcombine.low %v659_v17, %v660_v18 }
  0x21   : > { %1380 = vmatmul.mubr.msk.bf16.vlgmr.msra.gmra.mrb[0].mxu1 %vm579_vm1, %v1322_v19  ;;  %1388 = vmatmul.mubr.msk.bf16.vlgmr.msra.gmra.mrb[4].mxu0 %vm579_vm1, %v1322_v19 }
  0x22   : > { %1393 = vmatprep.mubr.msk.bf16.mxu1 %vm1496_vm0, %v1495_v2  ;;  %1399 = vmatprep.mubr.msk.bf16.mxu0 %vm1496_vm0, %v1495_v2 }
  0xeb   : > { %v646_v20 = vpop.f32.mrb[0].mxu0 }
  0xec   : > { %v1373_v21 = vpop.f32.mrb[1].mxu0 }
  0xed   : > { %v649_v22 = vpop.f32.mrb[2].mxu0  ;;  %v1453_v21 = vld [vmem:[%s1715_s5] sm:$0xff]  }
  0xee   : > { %v653_v23 = vpack.c.bf16 %v649_v22, %v646_v20  ;;  %v1374_v24 = vpop.f32.mrb[3].mxu0 }
  0xef   : > { %v886_v24 = vld [vmem:[#allocation5] sm:$0xff] }
  0xf0   : > { %654 = vst.msk [vmem:[#allocation2] sm:$0xff] %vm579_vm1, %v653_v23  ;;  %v1454_v23 = vld [vmem:[%s1715_s5 + $0x8] sm:$0xff]  }
  0xf4   : > { %v721_v25 = vpop.f32.mrb[0].mxu1  ;;  %v780_v52 = vpop.f32.mrb[4].mxu0 }
  0xf5   : > { %v1381_v26 = vpop.f32.mrb[1].mxu1  ;;  %v1389_v53 = vpop.f32.mrb[5].mxu0 }
  0xf6   : > { %v724_v27 = vpop.f32.mrb[2].mxu1  ;;  %v783_v54 = vpop.f32.mrb[6].mxu0  ;;  %v887_v26 = vld [vmem:[#allocation5 + $0x8] sm:$0xff] }
  0xf7   : > { %v728_v28 = vpack.c.bf16 %v724_v27, %v721_v25  ;;  %v1382_v29 = vpop.f32.mrb[3].mxu1  ;;  %v788_v31 = vld [vmem:[#allocation2] sm:$0xff]  ;;  %v787_v55 = vpack.c.bf16 %v783_v54, %v780_v52  ;;  %v1390_v56 = vpop.f32.mrb[7].mxu0 }
  0xf9   : > { %v793_v30 = vsel %vm579_vm1, %v728_v28, 0  ;;  %1398 = vmatpush3.bf16.msra.mxu0 %v787_v55 }
  0xfa   : > { %1392 = vmatpush3.bf16.xpose.msra.mxu1 %v793_v30  ;;  %1411 = vmatprep.subr.bf16.mxu0 %v1495_v2 }
  0xfb   : > { %1403 = vmatprep.subr.bf16.mxu1 %v1495_v2 }
 0x101   : > { %1394 = vmatmul.mubr.msk.bf16.vlgmr.msra.gmra.mrb[4].mxu1 %vm579_vm1, %v788_v31 }
 0x102   : > { %1407 = vmatprep.mubr.msk.bf16.mxu1 %vm1496_vm0, %v1495_v2  ;;  %1404 = vmatpush3.bf16.msra.mxu1 %v1453_v21 }
 0x103   : > { %1405 = vmatprep.subr.bf16.mxu1 %v1495_v2 }
 0x106   : > { %1406 = vmatpush3.bf16.msra.mxu1 %v1454_v23 }
 0x1d4   : > { %v829_v35 = vpop.f32.mrb[4].mxu1 }
 0x1d5   : > { %v836_v36 = vmul.f32 0.17677669, %v829_v35  ;;  %v1395_v37 = vpop.f32.mrb[5].mxu1 }
 0x1d6   : > { %v832_v38 = vpop.f32.mrb[6].mxu1 }
 0x1d7   : > { %v837_v39 = vmul.f32 0.17677669, %v832_v38  ;;  %v1396_v40 = vpop.f32.mrb[7].mxu1  ;;  %v841_v41 = vsel %vm840_vm3, %v836_v36, -inf }
 0x1d8   : > { %842 = vmax.xlane.f32.xlu0 %v841_v41 }
 0x1d9   : > { %v844_v42 = vsel %vm840_vm3, %v837_v39, -inf }
 0x1dc   : > { %845 = vmax.xlane.f32.xlu0 %v844_v42  ;;  %v972_v42 = vld [vmem:[%s1613_s10] sm:$0xf] }
 0x265   : > { %v843_v45 = vpop.xlane.xlu0 %842 }
 0x266   : > { %v847_v46 = vmax.f32 %v838_v44, %v843_v45  ;;  %v975_v45 = vld [vmem:[%s1712_s2 + $0x4] sm:$0xf] }
 0x268   : > { %v849_v48 = vsub.f32 %v838_v44, %v847_v46  ;;  %949 = vst.msk [vmem:[#allocation3] sm:$0xff] %vm574_vm2, %v847_v46  ;;  %857 = vperm.xlu1 %1445, %v847_v46   ;;  %v973_v44 = vld [vmem:[%s1613_s10 + $0x4] sm:$0xf]  ;;  %v976_v46 = vadd.bf16 %v974_v43, %v972_v42 }
 0x269   : > { %v846_v49 = vpop.xlane.xlu0 %845 }
 0x26a   : > { %v848_v50 = vmax.f32 %v839_v47, %v846_v49  ;;  %v851_v6 = vmul.f32 1.442695, %v849_v48  ;;  %v978_v48 = vunpack.c.l.bf16 %v976_v46 }
 0x26c   : > { %v850_v51 = vsub.f32 %v839_v47, %v848_v50  ;;  %950 = vst.msk [vmem:[#allocation3 + $0x8] sm:$0xff] %vm574_vm2, %v848_v50  ;;  %862 = vperm.xlu1 %1445, %v848_v50   ;;  %v977_v47 = vadd.bf16 %v975_v45, %v973_v44 }
 0x26e   : > { %v853_v5 = vmul.f32 1.442695, %v850_v51  ;;  %v979_v49 = vunpack.c.l.bf16 %v977_v47 }
 0x2e7   : > { %v858_v57 = vpop.permute.xlu1 %857 }
 0x2e8   : > { %v865_v58 = vsub.f32 %v836_v36, %v858_v57 }
 0x2ea   : > { %v867_v59 = vmul.f32 1.442695, %v865_v58 }
 0x2eb   : > { %v863_v60 = vpop.permute.xlu1 %862 }
 0x2ec   : > { %1455 = vpow2.f32 %v867_v59  ;;  %v866_v61 = vsub.f32 %v837_v39, %v863_v60  ;;  %v1054_v60 = vld [vmem:[%s1716_s6] sm:$0x1] }
 0x2ee   : > { %v869_v62 = vmul.f32 1.442695, %v866_v61  ;;  %v1061_v61 = vlaneseq }
 0x2f0   : > { %1457 = vpow2.f32 %v869_v62  ;;  %v1062_v62 = vshrl.u32 %v1061_v61, 7 }
 0x2f1   : > { %1459 = vpow2.f32 %v853_v5 }
 0x2f2   : > { %1461 = vpow2.f32 %v851_v6 }
 0x2f6   : > { %v1456_v63 = vpop.eup %1455 }
 0x2f7   : > { %v875_v0 = vsel %vm840_vm3, %v1456_v63, 0.0 }
 0x2f8   : > { %876 = vadd.xlane.f32.xlu0 %v875_v0 }
 0x2fa   : > { %v1458_v1 = vpop.eup %1457 }
 0x2fb   : > { %v878_v3 = vsel %vm840_vm3, %v1458_v1, 0.0  ;;  %v900_v4 = vpack.c.bf16 %v1458_v1, %v1456_v63  ;;  %v1460_v7 = vpop.eup %1459  ;;  %v1063_v63 = vsub.s32 0, %v1062_v62 }
 0x2fc   : > { %879 = vadd.xlane.f32.xlu1 %v878_v3  ;;  %v1462_v8 = vpop.eup %1461  ;;  %v874_v15 = vmul.f32 %v1460_v7, %v872_v13 }
 0x2fd   : > { %1400 = vmatmul.mubr.msk.bf16.vlgmr.msra.gmra.mrb[8].mxu0 %vm840_vm3, %v900_v4  ;;  %v873_v11 = vmul.f32 %v1462_v8, %v871_v10 }
 0x2fe   : > { %1413 = vmatprep.mubr.msk.bf16.mxu0 %vm1496_vm0, %v1495_v2 }
 0x30d   : > { %895 = vperm.xlu1 %1445, %v1460_v7  }
 0x30e   : > { %890 = vperm.xlu0 %1446, %v1462_v8  }
 0x311   : > { %1058 = vperm.xlu1 %1445, %v1055_v9  }
 0x385   : > { %v877_v12 = vpop.xlane.xlu0 %876 }
 0x386   : > { %v881_v14 = vadd.f32 %v877_v12, %v873_v11 }
 0x388   : > { %884 = vst.msk [vmem:[#allocation4] sm:$0xff] %vm574_vm2, %v881_v14 }
 0x389   : > { %v880_v16 = vpop.xlane.xlu1 %879 }
 0x38a   : > { %v882_v17 = vadd.f32 %v880_v16, %v874_v15 }
 0x38c   : > { %885 = vst.msk [vmem:[#allocation4 + $0x8] sm:$0xff] %vm574_vm2, %v882_v17 }
 0x38d   : > { %v891_v25 = vpop.permute.xlu0 %890  ;;  %v896_v27 = vpop.permute.xlu1 %895 }
 0x38e   : > { %v898_v28 = vmul.f32 %v891_v25, %v886_v24  ;;  %v899_v30 = vmul.f32 %v896_v27, %v887_v26 }
 0x38f   : > { %v956_v18 = vld [vmem:[#allocation4] sm:$0xff] }
 0x390   : > { %1463 = vrcp.f32 %v956_v18 }
 0x391   : > { %v1059_v0 = vpop.permute.xlu1 %1058 }
 0x392   : > { %v1064_v1 = vrot.slane %v1059_v0, %v1063_v63 }
 0x393   : > { %v957_v19 = vld [vmem:[#allocation4 + $0x8] sm:$0xff] }
 0x394   : > { %1465 = vrcp.f32 %v957_v19 }
 0x39a   : > { %v1464_v20 = vpop.eup %1463 }
 0x39b   : > { %962 = vperm.xlu0 %1446, %v1464_v20  }
 0x39e   : > { %v1466_v22 = vpop.eup %1465 }
 0x39f   : > { %967 = vperm.xlu0 %1446, %v1466_v22  }
 0x3d0   : > { %v938_v29 = vpop.f32.mrb[8].mxu0 }
 0x3d1   : > { %v945_v31 = vadd.f32 %v938_v29, %v898_v28  ;;  %v1401_v32 = vpop.f32.mrb[9].mxu0 }
 0x3d2   : > { %v941_v33 = vpop.f32.mrb[10].mxu0 }
 0x3d3   : > { %947 = vst.msk [vmem:[#allocation5] sm:$0xff] %vm579_vm1, %v945_v31  ;;  %v946_v2 = vadd.f32 %v941_v33, %v899_v30  ;;  %v1402_v34 = vpop.f32.mrb[11].mxu0 }
 0x3d5   : > { %948 = vst.msk [vmem:[#allocation5 + $0x8] sm:$0xff] %vm579_vm1, %v946_v2 }
 0x3da   : > { %v954_v36 = vld [vmem:[#allocation5] sm:$0xff] }
 0x3dc   : > { %v955_v38 = vld [vmem:[#allocation5 + $0x8] sm:$0xff] }
 0x41a   : > { %v963_v35 = vpop.permute.xlu0 %962 }
 0x41b   : > { %v970_v39 = vmul.f32 %v963_v35, %v954_v36 }
 0x41e   : > { %v968_v37 = vpop.permute.xlu0 %967 }
 0x41f   : > { %v971_v40 = vmul.f32 %v968_v37, %v955_v38 }
 0x421   : > { %v980_v41 = vpack.c.bf16 %v971_v40, %v970_v39 }
 0x423   : > { %1408 = vmatmul.mubr.msk.bf16.vlgmr.msra.gmra.mrb[8].mxu1 %vm579_vm1, %v980_v41 }
 0x4f6   : > { %v1034_v50 = vpop.f32.mrb[8].mxu1 }
 0x4f7   : > { %v1041_v51 = vadd.f32 %v1034_v50, %v978_v48  ;;  %v1409_v52 = vpop.f32.mrb[9].mxu1 }
 0x4f8   : > { %v1037_v53 = vpop.f32.mrb[10].mxu1 }
 0x4f9   : > { %v1347_v54 = vpack.c.bf16 %v1041_v51, %v1041_v51  ;;  %v1042_v55 = vadd.f32 %v1037_v53, %v979_v49  ;;  %v1410_v56 = vpop.f32.mrb[11].mxu1 }
 0x4fb   : > { %1052 = vst.msk [vmem:[%s561_s25] sm:$0xf] %vm1051_vm4, %v1347_v54  ;;  %v1043_v57 = vpack.c.bf16 %v1042_v55, %v1041_v51  ;;  %v1348_v58 = vpack.c.bf16 %v1042_v55, %v1042_v55 }
 0x4fd   : > { %1053 = vst.msk [vmem:[%s561_s25 + $0x4] sm:$0xf] %vm1051_vm4, %v1348_v58  ;;  %v1069_v59 = vsel %vm579_vm1, %v1043_v57, 0 }
 0x4fe   : > { %1412 = vmatpush3.bf16.xpose.msra.mxu0 %v1069_v59 }
 0x505   : > { %1414 = vmatmul.mubr.msk.bf16.vlgmr.msra.gmra.mrb[12].mxu0 %vm579_vm1, %v1054_v60 }
 0x5d8   : > { %v1105_v3 = vpop.f32.mrb[12].mxu0 }
 0x5d9   : > { %v1106_v4 = vadd.f32 %v1105_v3, %v1064_v1  ;;  %v1415_v5 = vpop.f32.mrb[13].mxu0 }
 0x5da   : > { %v1108_v6 = vpop.f32.mrb[14].mxu0 }
 0x5db   : > { %v1341_v7 = vmul.f32 -1.442695, %v1106_v4  ;;  %v1416_v8 = vpop.f32.mrb[15].mxu0 }
 0x5dd   : > { %1467 = vpow2.f32 %v1341_v7 }
 0x5e7   : > { %v1468_v9 = vpop.eup %1467 }
 0x5e8   : > { %v1114_v10 = vadd.f32 1.0, %v1468_v9 }
 0x5ea   : > { %1469 = vrcp.f32 %v1114_v10 }
 0x5f4   : > { %v1470_v11 = vpop.eup %1469 }
 0x5f5   : > { %1118 = vst.msk [vmem:[%s568_s29] sm:$0x1] %vm1117_vm5, %v1470_v11 }
 0x5f6 PF: > { %s22_s13 = sadd.s32 1, %s1493_s13   ;;  %s1720_s11 = smov %s1489_s12 }
 0x5f7   : > { %p19_p8 = scmp.ge.s32.totalorder %s22_s13, 6   ;;  %s1721_s12 = smov %s1723_s7 }
 0x5f9   :  { %21 = sbr.rel (!%p19_p8) target bundleno = 3 (0x3), region = 113 }

// kernel: adamatcher_forward.12
= control target key start
LH: loop header
LB: loop body
LE: loop exit
PB: predicated region body
PF: predicated region fallthrough
CT: control target
= control target key end

     0   :  { %9 = vsyncpa [#allocation3], 0  ;;  %s925_s0 = inlined_call_operand.vmem [shape: bf16[2,16,32], index: 0, kind: input, shape index: {}]   ;;  %s926_s1 = inlined_call_operand.vmem [shape: bf16[2,16,32], index: 1, kind: input, shape index: {}]   ;;  %s927_s2 = inlined_call_operand.vmem [shape: f32[2,16,1], index: 2, kind: input, shape index: {}]   ;;  %s928_s3 = inlined_call_operand.vmem [shape: f32[2,1,16], index: 3, kind: input, shape index: {}]   ;;  %s929_s4 = inlined_call_operand.hbm [shape: bf16[2,16,16], index: 4, kind: output, shape index: {}]  }
   0x1   :  { %11 = vsyncpa [#allocation3 + $0x1], 0  ;;  %s801_s15 = smov 0   ;;  %s803_s16 = smov 0  }
   0x2   :  { %s805_s17 = smov 0   ;;  %s807_s18 = smov 0  }
   0x3   :  { %s809_s19 = smov 0   ;;  %s811_s20 = smov 0  }
   0x4 LB: > { %s586_s21 = sadd.s32 4294967295, %s768_s20   ;;  %s587_s22 = sadd.s32 4294967294, %s768_s20   ;;  %s768_s20 = sphi %s811_s20, %s17_s20   ;;  %s764_s19 = sphi %s809_s19, %s936_s19   ;;  %s760_s18 = sphi %s807_s18, %s935_s18   ;;  %s756_s17 = sphi %s805_s17, %s934_s17   ;;  %s752_s16 = sphi %s803_s16, %s933_s16   ;;  %s748_s15 = sphi %s801_s15, %s932_s15  }
   0x5   : > { %s36_s23 = sadd.s32 1, %s764_s19  ;;  %s159_s24 = sadd.s32 1, %s756_s17 }
   0x6   : > { %p38_p0 = scmp.ge.s32.totalorder %s36_s23, 2  ;;  %p169_p1 = scmp.ne.s32.totalorder %s756_s17, %s752_s16 }
   0x7   : > { %p170_p2 = scmp.eq.s32.totalorder %s586_s21, 1  ;;  %p175_p3 = scmp.ne.s32.totalorder %s752_s16, %s748_s15 }
   0x8   : > { %s938_s23 = smov (%p38_p0, %s36_s23), 0  ;;  %p176_p5 = scmp.eq.s32.totalorder %s587_s22, 1 }
   0x9   : > { %p841_p4 = por %p170_p2, %p169_p1  ;;  %s152_s26 = ssub.s32 %s764_s19, %s938_s23 }
   0xa   : > { %p590_p6 = scmp.ge.s32.totalorder %s768_s20, 1  ;;  %p157_p7 = scmp.eq.s32.totalorder %s152_s26, 0 }
   0xb   : > { %p848_p8 = por %p176_p5, %p175_p3  ;;  %p242_p9 = scmp.lt.s32.totalorder %s768_s20, 3 }
   0xc   : > { %s854_s28 = scalar_select %p157_p7, %s756_s17, %s159_s24  }
   0xd   : > { %p243_p10 = pnand %p590_p6, %p242_p9 }
   0xe   : > { %p297_p11 = scmp.lt.s32.totalorder (!%p243_p10), %s760_s18, 1  ;;  %v770_v0 = vmov (!%p243_p10), 0.0   ;;  %vm771_vm0 = vmmov (!%p243_p10), 0   ;;  %v772_v1 = vmov (!%p243_p10), 0   ;;  %vm348_vm1 = vcmask (!%p243_p10), 261120   ;;  %s293_s26 = sand.u32 (!%p243_p10), 1, %s752_s16  }
   0xf   : > { %246 = sbr.rel (%p243_p10) target bundleno = 287 (0x11f), region = 36  ;;  %617 = vmatprep.subr.bf16.mxu0 (!%p243_p10), %v770_v0  ;;  %619 = vmatprep.mubr.msk.bf16.mxu0 (!%p243_p10), %vm771_vm0, %v770_v0  ;;  %vm435_vm2 = vcmask (!%p243_p10), 125952  }
  0x10   : > { %683 = vset.pattern.permute.xlu0 (!%p243_p10), %v772_v1 }
  0x16   : > { %s298_s29 = scalar_select %p297_p11, %s760_s18, 1 }
  0x18   : > { %s609_s30 = sshll.u32 %s298_s29, 3  ;;  %s611_s5 = sshll.u32 %s298_s29, 4 }
  0x19   : > { %s304_s8 = scalar_lea.vmem %s925_s0, %s609_s30  ;;  %s314_s11 = scalar_lea.vmem %s926_s1, %s609_s30 }
  0x1a   : > { %s324_s14 = scalar_lea.vmem %s927_s2, %s611_s5  ;;  %v684_v2 = vld [vmem:[%s314_s11] sm:$0xff]   ;;  %s331_s24 = scalar_lea.vmem %s928_s3, %s298_s29 }
  0x1b   : > { %v398_v3 = vld [vmem:[%s324_s14] sm:$0xff]  ;;  %v353_v4 = vsel %vm348_vm1, %v684_v2, 0  ;;  %v399_v5 = vld [vmem:[%s324_s14 + $0x8] sm:$0xff]  ;;  %s591_s29 = sshll.u32 %s293_s26, 3  ;;  %s614_s30 = sshll.u32 %s760_s18, 7 }
  0x1c   : > { %405 = vperm.xlu0 %683, %v398_v3   ;;  %618 = vmatpush3.bf16.xpose.msra.mxu0 %v353_v4  ;;  %v685_v6 = vld [vmem:[%s304_s8] sm:$0xff]   ;;  %s295_s5 = scalar_lea.vmem [#allocation2], %s591_s29  ;;  %s875_s9 = scalar_lea.hbm %s929_s4, %s614_s30 }
  0x1d   : > { %v601_v15 = vld [vmem:[%s331_s24] ss:$0 sm:$0xff]  ;;  %s455_s6 = sshll.u32 %s295_s5, 4  ;;  %s879_s18 = scalar_lea.sflag [#allocation3], %s293_s26  ;;  %s877_s6 = int_to_ptr.vmem [resolvable:$true] %s455_s6 }
  0x1e   : > { %s690_s10 = scalar_lea.vmem %s877_s6, 128  ;;  %s773_s11 = smov [#allocation2]  }
  0x1f   : > { %p691_p12 = scmp.ne.s32.totalorder %s877_s6, %s690_s10  ;;  %s694_s12 = sshll.u32 %s773_s11, 4  ;;  %s695_s12 = int_to_ptr.vmem [resolvable:$false] %s694_s12 }
  0x20   : > { %410 = vperm.xlu0 %683, %v399_v5   ;;  %s696_s13 = scalar_lea.vmem %s695_s12, 256  ;;  %p697_p1 = scmp.lt.s32.totalorder %s877_s6, %s695_s12 }
  0x21   : > { %p692_p13 = pnand %p691_p12, %p841_p4  ;;  %p698_p2 = scmp.lt.s32.totalorder %s696_s13, %s690_s10 }
  0x23   : > { %620 = vmatmul.mubr.msk.bf16.vlgmr.msra.gmra.mrb[0].mxu0 %vm348_vm1, %v685_v6  ;;  %p693_p0 = pneg %p692_p13  ;;  %p699_p3 = por %p698_p2, %p697_p1 }
  0x25   : > { %p700_p5 = pnand %p699_p3, %p693_p0 }
  0x9b   : > { %v406_v7 = vpop.permute.xlu0 %405 }
  0x9f   : > { %v411_v18 = vpop.permute.xlu0 %410 }
  0xf6   : > { %v389_v8 = vpop.f32.mrb[0].mxu0 }
  0xf7   : > { %v396_v9 = vmul.f32 0.3125, %v389_v8  ;;  %v621_v10 = vpop.f32.mrb[1].mxu0 }
  0xf8   : > { %v392_v11 = vpop.f32.mrb[2].mxu0 }
  0xf9   : > { %v401_v12 = vadd.f32 %v396_v9, %v396_v9  ;;  %v397_v13 = vmul.f32 0.3125, %v392_v11  ;;  %v622_v14 = vpop.f32.mrb[3].mxu0 }
  0xfb   : > { %v413_v16 = vsub.f32 %v401_v12, %v406_v7  ;;  %v402_v17 = vadd.f32 %v397_v13, %v397_v13 }
  0xfd   : > { %v421_v19 = vsub.f32 %v413_v16, %v601_v15  ;;  %v414_v20 = vsub.f32 %v402_v17, %v411_v18 }
  0xff   : > { %v423_v21 = vmul.f32 1.442695, %v421_v19  ;;  %v422_v22 = vsub.f32 %v414_v20, %v601_v15 }
 0x101   : > { %686 = vpow2.f32 %v423_v21  ;;  %v425_v23 = vmul.f32 1.442695, %v422_v22 }
 0x103   : > { %688 = vpow2.f32 %v425_v23 }
 0x10b   : > { %v687_v24 = vpop.eup %686 }
 0x10c   : > { %v612_v25 = vpack.c.bf16 %v687_v24, %v687_v24 }
 0x10d   : > { %v689_v26 = vpop.eup %688 }
 0x10e   : > { %v613_v27 = vpack.c.bf16 %v689_v26, %v689_v26  ;;  %436 = vst.msk [vmem:[%s295_s5] sm:$0xf] %vm435_vm2, %v612_v25 }
 0x110   : > { %437 = vst.msk [vmem:[%s295_s5 + $0x4] sm:$0xf] %vm435_vm2, %v613_v27 }
 0x111   : > { %703 = shalt.err (!%p700_p5)
}
 0x112   : > { %s704_s14 = scalar_lea.hbm %s875_s9, 128  ;;  %s708_s24 = scalar_lea.hbm %s929_s4, 256 }
 0x113   : > { %p705_p6 = scmp.ne.s32.totalorder %s875_s9, %s704_s14  ;;  %p709_p10 = scmp.lt.u32.totalorder %s875_s9, %s929_s4 }
 0x114   : > { %p710_p11 = scmp.lt.u32.totalorder %s708_s24, %s704_s14  ;;  %p712_p13 = scmp.lt.u32.totalorder %s704_s14, %s875_s9 }
 0x115   : > { %p706_p7 = pnand %p705_p6, %p841_p4 }
 0x116   : > { %p711_p12 = por %p710_p11, %p709_p10 }
 0x117   : > { %p707_p9 = pneg %p706_p7 }
 0x118   : > { %p713_p0 = por %p712_p13, %p711_p12 }
 0x11a   : > { %p714_p1 = pnand %p713_p0, %p707_p9 }
 0x11c   : > { %717 = shalt.err (!%p714_p1)
}
 0x11d   : > { %s774_s30 = smov 64   ;;  %s775_s5 = smov 4  }
 0x11e   : > { %623 = dma.vmem_to_hbm [thread:$0]  (%p841_p4), %s877_s6, 128, %s875_s9, %s879_s18, %s774_s30, %s774_s30, %s775_s5  }
 0x11f PF: > { %p629_p2 = scmp.ge.s32.totalorder %s768_s20, 2  ;;  %s470_s7 = sand.u32 1, %s748_s15  }
 0x120   : > { %s471_s8 = scalar_lea.sflag [#allocation3], %s470_s7 }
 0x121   : > { %p626_p3 = pnand %p629_p2, %p848_p8 }
 0x123   : > { %743 = dma.done.wait (!%p626_p3), %s471_s8, 128  }
 0x124   : > { %745 = vsyncadd (!%p626_p3), %s471_s8, 4294967168  ;;  %s17_s20 = sadd.s32 1, %s768_s20   ;;  %s932_s15 = smov %s752_s16 }
 0x125   : > { %p14_p5 = scmp.ge.s32.totalorder %s17_s20, 4   ;;  %s933_s16 = smov %s756_s17 }
 0x126   : > { %s934_s17 = smov %s854_s28  ;;  %s935_s18 = smov %s764_s19 }
 0x127   : > { %s936_s19 = smov %s938_s23  ;;  %16 = sbr.rel (!%p14_p5) target bundleno = 4 (0x4), region = 80 }
 0x12e   :  { %476 = vsyncpa [#allocation3], 1 }
 0x12f   :  { %478 = vsyncpa [#allocation3 + $0x1], 1 }

// kernel: adamatcher_forward.13
= control target key start
LH: loop header
LB: loop body
LE: loop exit
PB: predicated region body
PF: predicated region fallthrough
CT: control target
= control target key end

     0   :  { %8 = vsyncpa [#allocation3], 0  ;;  %s1829_s0 = inlined_call_operand.vmem [shape: bf16[2,16,16], index: 0, kind: input, shape index: {}]   ;;  %s1830_s1 = inlined_call_operand.vmem [shape: bf16[2,16,16,16], index: 1, kind: input, shape index: {}]   ;;  %s1831_s2 = inlined_call_operand.vmem [shape: f32[16,2], index: 2, kind: input, shape index: {}]   ;;  %s1832_s3 = inlined_call_operand.hbm [shape: f32[2,2,16], index: 3, kind: output, shape index: {}]  }
   0x1   :  { %10 = vsyncpa [#allocation3 + $0x1], 0  ;;  %s1275_s12 = smov 0   ;;  %s1277_s13 = smov 0  }
   0x2   :  { %s1279_s14 = smov 0   ;;  %s1281_s15 = smov 0  }
   0x3   :  { %s1283_s16 = smov 0   ;;  %s1285_s17 = smov 0  }
   0x4 LB: > { %s980_s18 = sadd.s32 4294967295, %s1250_s17   ;;  %s981_s19 = sadd.s32 4294967294, %s1250_s17   ;;  %s1250_s17 = sphi %s1285_s17, %s16_s17   ;;  %s1246_s16 = sphi %s1283_s16, %s1840_s16   ;;  %s1242_s15 = sphi %s1281_s15, %s1839_s15   ;;  %s1238_s14 = sphi %s1279_s14, %s1838_s14   ;;  %s1234_s13 = sphi %s1277_s13, %s1837_s13   ;;  %s1230_s12 = sphi %s1275_s12, %s1836_s12  }
   0x5   : > { %s28_s20 = sadd.s32 1, %s1246_s16  ;;  %s114_s21 = sadd.s32 1, %s1238_s14 }
   0x6   : > { %p30_p0 = scmp.ge.s32.totalorder %s28_s20, 2  ;;  %p124_p1 = scmp.ne.s32.totalorder %s1238_s14, %s1234_s13 }
   0x7   : > { %p125_p2 = scmp.eq.s32.totalorder %s980_s18, 1  ;;  %p130_p3 = scmp.ne.s32.totalorder %s1234_s13, %s1230_s12 }
   0x8   : > { %s1842_s20 = smov (%p30_p0, %s28_s20), 0  ;;  %p131_p5 = scmp.eq.s32.totalorder %s981_s19, 1 }
   0x9   : > { %p1315_p4 = por %p125_p2, %p124_p1  ;;  %s109_s23 = ssub.s32 %s1246_s16, %s1842_s20 }
   0xa   : > { %p984_p6 = scmp.ge.s32.totalorder %s1250_s17, 1  ;;  %p112_p7 = scmp.eq.s32.totalorder %s109_s23, 0 }
   0xb   : > { %p1322_p8 = por %p131_p5, %p130_p3  ;;  %p174_p9 = scmp.lt.s32.totalorder %s1250_s17, 3 }
   0xc   : > { %s1328_s25 = scalar_select %p112_p7, %s1238_s14, %s114_s21  }
   0xd   : > { %p175_p10 = pnand %p984_p6, %p174_p9 }
   0xe   : > { %v648_v0 = vld [vmem:[%s1831_s2] sm:$0xff] (!%p175_p10)  ;;  %p209_p11 = scmp.lt.s32.totalorder (!%p175_p10), %s1242_s15, 1  ;;  %v1252_v1 = vmov (!%p175_p10), 1   ;;  %v1253_v2 = vmov (!%p175_p10), 0   ;;  %v649_v3 = vld [vmem:[%s1831_s2 + $0x8] sm:$0xff] (!%p175_p10)  ;;  %vm325_vm0 = vcmask (!%p175_p10), 130048  }
   0xf   : > { %178 = sbr.rel (%p175_p10) target bundleno = 218 (0xda), region = 32  ;;  %1136 = vset.pattern.permute.xlu0 (!%p175_p10), %v1252_v1  ;;  %1137 = vset.pattern.permute.xlu1 (!%p175_p10), %v1253_v2  ;;  %vm582_vm1 = vcmask (!%p175_p10), 1041409   ;;  %vm585_vm2 = vcmask (!%p175_p10), 1042434   ;;  %vm588_vm3 = vcmask (!%p175_p10), 1043459   ;;  %vm591_vm4 = vcmask (!%p175_p10), 1044484   ;;  %s206_s18 = sand.u32 (!%p175_p10), 1, %s1234_s13  }
  0x10   : > { %652 = vperm.xlu1 (!%p175_p10), %1137, %v648_v0   ;;  %760 = vperm.xlu0 (!%p175_p10), %1136, %v648_v0   ;;  %vm594_vm5 = vcmask (!%p175_p10), 1045509   ;;  %vm597_vm6 = vcmask (!%p175_p10), 1046534   ;;  %vm600_vm7 = vcmask (!%p175_p10), 1047559   ;;  %s985_s19 = sshll.u32 (!%p175_p10), %s206_s18, 1  ;;  %s991_s21 = sshll.u32 (!%p175_p10), %s1242_s15, 5  ;;  %vm869_vm8 = vcmask (!%p175_p10), 1040384  }
  0x11   : > { %s208_s23 = scalar_lea.vmem (!%p175_p10), [#allocation2], %s985_s19  ;;  %vm871_vm9 = vcmask (!%p175_p10), 123904   ;;  %s1782_s29 = scalar_lea.hbm (!%p175_p10), %s1832_s3, %s991_s21 }
  0x12   : > { %s888_s26 = sshll.u32 (!%p175_p10), %s208_s23, 4  ;;  %s874_s30 = scalar_lea.sflag (!%p175_p10), [#allocation3], %s206_s18  ;;  %s1784_s26 = int_to_ptr.vmem [resolvable:$true] %s888_s26 }
  0x14   : > { %656 = vperm.xlu1 (!%p175_p10), %1137, %v649_v3   ;;  %763 = vperm.xlu0 (!%p175_p10), %1136, %v649_v3  }
  0x16   : > { %s210_s28 = scalar_select %p209_p11, %s1242_s15, 1 }
  0x17   : > { %s1172_s15 = scalar_lea.vmem %s1784_s26, 32 }
  0x18   : > { %s994_s4 = sshll.u32 %s210_s28, 3  ;;  %s995_s5 = sshll.u32 %s210_s28, 7 }
  0x19   : > { %s216_s8 = scalar_lea.vmem %s1829_s0, %s994_s4  ;;  %s1344_s11 = scalar_lea.vmem %s1830_s1, %s995_s5 }
  0x1a   : > { %v997_v4 = vld [vmem:[%s216_s8] sm:$0xff]   ;;  %v1064_v6 = vld [vmem:[%s1344_s11 + $0x8] sm:$0xff]   ;;  %v1065_v11 = vld [vmem:[%s1344_s11 + $0x10] sm:$0xff]   ;;  %p1173_p12 = scmp.ne.s32.totalorder %s1784_s26, %s1172_s15  ;;  %s1254_s4 = smov [#allocation2]  }
  0x1b   : > { %v1001_v5 = vld [vmem:[%s1344_s11] sm:$0xff]   ;;  %v1348_v7 = vunpack.c.l.bf16 %v997_v4  ;;  %v1350_v8 = vunpack.c.h.bf16 %v997_v4  ;;  %v1066_v12 = vld [vmem:[%s1344_s11 + $0x18] sm:$0xff]   ;;  %v1006_v14 = vunpack.c.l.bf16 %v1064_v6  ;;  %v1007_v15 = vunpack.c.h.bf16 %v1064_v6  ;;  %v1068_v18 = vld [vmem:[%s1344_s11 + $0x28] sm:$0xff]   ;;  %s1176_s5 = sshll.u32 %s1254_s4, 4  ;;  %s1177_s5 = int_to_ptr.vmem [resolvable:$false] %s1176_s5 }
  0x1c   : > { %v1002_v9 = vunpack.c.l.bf16 %v1001_v5  ;;  %v1003_v10 = vunpack.c.h.bf16 %v1001_v5  ;;  %v1067_v13 = vld [vmem:[%s1344_s11 + $0x20] sm:$0xff]   ;;  %v1010_v16 = vunpack.c.l.bf16 %v1065_v11  ;;  %v1011_v17 = vunpack.c.h.bf16 %v1065_v11  ;;  %v1069_v19 = vld [vmem:[%s1344_s11 + $0x30] sm:$0xff]   ;;  %v1070_v20 = vld [vmem:[%s1344_s11 + $0x38] sm:$0xff]   ;;  %p1174_p13 = pnand %p1173_p12, %p1315_p4  ;;  %s1178_s6 = scalar_lea.vmem %s1177_s5, 64 }
  0x1d   : > { %v1014_v21 = vunpack.c.l.bf16 %v1066_v12  ;;  %v1015_v22 = vunpack.c.h.bf16 %v1066_v12  ;;  %v1018_v23 = vunpack.c.l.bf16 %v1067_v13  ;;  %v1019_v24 = vunpack.c.h.bf16 %v1067_v13  ;;  %v1071_v25 = vld [vmem:[%s1344_s11 + $0x40] sm:$0xff]   ;;  %v1072_v26 = vld [vmem:[%s1344_s11 + $0x48] sm:$0xff]   ;;  %v1073_v27 = vld [vmem:[%s1344_s11 + $0x50] sm:$0xff]   ;;  %p1179_p1 = scmp.lt.s32.totalorder %s1784_s26, %s1177_s5  ;;  %p1180_p2 = scmp.lt.s32.totalorder %s1178_s6, %s1172_s15 }
  0x1e   : > { %v1022_v28 = vunpack.c.l.bf16 %v1068_v18  ;;  %v1023_v29 = vunpack.c.h.bf16 %v1068_v18  ;;  %v1026_v30 = vunpack.c.l.bf16 %v1069_v19  ;;  %v1027_v31 = vunpack.c.h.bf16 %v1069_v19  ;;  %v1074_v32 = vld [vmem:[%s1344_s11 + $0x58] sm:$0xff]   ;;  %v1075_v33 = vld [vmem:[%s1344_s11 + $0x60] sm:$0xff]   ;;  %v1076_v38 = vld [vmem:[%s1344_s11 + $0x68] sm:$0xff]   ;;  %p1175_p0 = pneg %p1174_p13 }
  0x1f   : > { %v1030_v34 = vunpack.c.l.bf16 %v1070_v20  ;;  %v1031_v35 = vunpack.c.h.bf16 %v1070_v20  ;;  %v1034_v36 = vunpack.c.l.bf16 %v1071_v25  ;;  %v1035_v37 = vunpack.c.h.bf16 %v1071_v25  ;;  %v1077_v39 = vld [vmem:[%s1344_s11 + $0x70] sm:$0xff]   ;;  %v1078_v44 = vld [vmem:[%s1344_s11 + $0x78] sm:$0xff]   ;;  %p1181_p3 = por %p1180_p2, %p1179_p1 }
  0x20   : > { %v1038_v40 = vunpack.c.l.bf16 %v1072_v26  ;;  %v1039_v41 = vunpack.c.h.bf16 %v1072_v26  ;;  %v1042_v42 = vunpack.c.l.bf16 %v1073_v27  ;;  %v1043_v43 = vunpack.c.h.bf16 %v1073_v27 }
  0x21   : > { %v1046_v45 = vunpack.c.l.bf16 %v1074_v32  ;;  %v1047_v46 = vunpack.c.h.bf16 %v1074_v32  ;;  %v1050_v47 = vunpack.c.l.bf16 %v1075_v33  ;;  %v1051_v48 = vunpack.c.h.bf16 %v1075_v33  ;;  %p1182_p5 = pnand %p1181_p3, %p1175_p0 }
  0x22   : > { %v1054_v49 = vunpack.c.l.bf16 %v1076_v38  ;;  %v1055_v50 = vunpack.c.h.bf16 %v1076_v38  ;;  %v1058_v51 = vunpack.c.l.bf16 %v1077_v39  ;;  %v1059_v52 = vunpack.c.h.bf16 %v1077_v39 }
  0x23   : > { %v1062_v53 = vunpack.c.l.bf16 %v1078_v44  ;;  %v1063_v54 = vunpack.c.h.bf16 %v1078_v44  ;;  %v293_v55 = vmul.f32 %v1002_v9, %v1348_v7  ;;  %v294_v56 = vmul.f32 %v1003_v10, %v1350_v8 }
  0x24   : > { %v295_v57 = vmul.f32 %v1006_v14, %v1348_v7  ;;  %v296_v58 = vmul.f32 %v1007_v15, %v1350_v8  ;;  %v297_v59 = vmul.f32 %v1010_v16, %v1348_v7  ;;  %v298_v60 = vmul.f32 %v1011_v17, %v1350_v8 }
  0x25   : > { %v299_v61 = vmul.f32 %v1014_v21, %v1348_v7  ;;  %v300_v62 = vmul.f32 %v1015_v22, %v1350_v8  ;;  %v301_v63 = vmul.f32 %v1018_v23, %v1348_v7  ;;  %v302_v0 = vmul.f32 %v1019_v24, %v1350_v8 }
  0x26   : > { %v303_v1 = vmul.f32 %v1022_v28, %v1348_v7  ;;  %v304_v2 = vmul.f32 %v1023_v29, %v1350_v8  ;;  %v305_v3 = vmul.f32 %v1026_v30, %v1348_v7  ;;  %v306_v4 = vmul.f32 %v1027_v31, %v1350_v8 }
  0x27   : > { %v307_v5 = vmul.f32 %v1030_v34, %v1348_v7  ;;  %v308_v6 = vmul.f32 %v1031_v35, %v1350_v8  ;;  %v1383_v9 = vmul.f32 %v1034_v36, %v1348_v7  ;;  %v1386_v10 = vmul.f32 %v1035_v37, %v1350_v8 }
  0x28   : > { %v1389_v11 = vmul.f32 %v1038_v40, %v1348_v7  ;;  %v1392_v12 = vmul.f32 %v1039_v41, %v1350_v8  ;;  %v1395_v13 = vmul.f32 %v1042_v42, %v1348_v7  ;;  %v1398_v14 = vmul.f32 %v1043_v43, %v1350_v8 }
  0x29   : > { %v1401_v15 = vmul.f32 %v1046_v45, %v1348_v7  ;;  %v1404_v16 = vmul.f32 %v1047_v46, %v1350_v8  ;;  %v1407_v17 = vmul.f32 %v1050_v47, %v1348_v7  ;;  %v1410_v18 = vmul.f32 %v1051_v48, %v1350_v8 }
  0x2a   : > { %v1413_v19 = vmul.f32 %v1054_v49, %v1348_v7  ;;  %v1416_v20 = vmul.f32 %v1055_v50, %v1350_v8  ;;  %v1419_v21 = vmul.f32 %v1058_v51, %v1348_v7  ;;  %v1422_v22 = vmul.f32 %v1059_v52, %v1350_v8 }
  0x2b   : > { %v1425_v23 = vmul.f32 %v1062_v53, %v1348_v7  ;;  %v1428_v24 = vmul.f32 %v1063_v54, %v1350_v8  ;;  %v326_v25 = vsel %vm325_vm0, %v293_v55, 0.0  ;;  %v327_v26 = vsel %vm325_vm0, %v294_v56, 0.0 }
  0x2c   : > { %v328_v27 = vadd.f32 %v327_v26, %v326_v25  ;;  %v335_v28 = vsel %vm325_vm0, %v295_v57, 0.0  ;;  %v336_v29 = vsel %vm325_vm0, %v296_v58, 0.0  ;;  %v344_v30 = vsel %vm325_vm0, %v297_v59, 0.0 }
  0x2d   : > { %v337_v31 = vadd.f32 %v336_v29, %v335_v28  ;;  %v345_v32 = vsel %vm325_vm0, %v298_v60, 0.0  ;;  %v353_v7 = vsel %vm325_vm0, %v299_v61, 0.0  ;;  %v354_v33 = vsel %vm325_vm0, %v300_v62, 0.0 }
  0x2e   : > { %v329_v8 = vrot.slane %v328_v27, 4  ;;  %v346_v34 = vadd.f32 %v345_v32, %v344_v30  ;;  %v355_v35 = vadd.f32 %v354_v33, %v353_v7  ;;  %v362_v36 = vsel %vm325_vm0, %v301_v63, 0.0 }
  0x2f   : > { %v338_v37 = vrot.slane %v337_v31, 4  ;;  %v363_v38 = vsel %vm325_vm0, %v302_v0, 0.0  ;;  %v371_v39 = vsel %vm325_vm0, %v303_v1, 0.0  ;;  %v372_v40 = vsel %vm325_vm0, %v304_v2, 0.0 }
  0x30   : > { %v330_v41 = vadd.f32 %v329_v8, %v328_v27  ;;  %v347_v42 = vrot.slane %v346_v34, 4  ;;  %v356_v43 = vrot.slane %v355_v35, 4  ;;  %v364_v44 = vadd.f32 %v363_v38, %v362_v36 }
  0x31   : > { %v339_v45 = vadd.f32 %v338_v37, %v337_v31  ;;  %v373_v46 = vadd.f32 %v372_v40, %v371_v39  ;;  %v380_v47 = vsel %vm325_vm0, %v305_v3, 0.0  ;;  %v381_v48 = vsel %vm325_vm0, %v306_v4, 0.0 }
  0x32   : > { %v331_v49 = vrot.slane %v330_v41, 2  ;;  %v348_v50 = vadd.f32 %v347_v42, %v346_v34  ;;  %v357_v51 = vadd.f32 %v356_v43, %v355_v35  ;;  %v365_v52 = vrot.slane %v364_v44, 4 }
  0x33   : > { %v340_v53 = vrot.slane %v339_v45, 2  ;;  %v374_v54 = vrot.slane %v373_v46, 4  ;;  %v382_v55 = vadd.f32 %v381_v48, %v380_v47  ;;  %v389_v56 = vsel %vm325_vm0, %v307_v5, 0.0 }
  0x34   : > { %v332_v57 = vadd.f32 %v331_v49, %v330_v41  ;;  %v349_v58 = vrot.slane %v348_v50, 2  ;;  %v358_v59 = vrot.slane %v357_v51, 2  ;;  %v366_v60 = vadd.f32 %v365_v52, %v364_v44 }
  0x35   : > { %v341_v61 = vadd.f32 %v340_v53, %v339_v45  ;;  %v375_v62 = vadd.f32 %v374_v54, %v373_v46  ;;  %v383_v63 = vrot.slane %v382_v55, 4  ;;  %v390_v0 = vsel %vm325_vm0, %v308_v6, 0.0 }
  0x36   : > { %v333_v1 = vrot.slane %v332_v57, 1  ;;  %v350_v2 = vadd.f32 %v349_v58, %v348_v50  ;;  %v359_v3 = vadd.f32 %v358_v59, %v357_v51  ;;  %v367_v4 = vrot.slane %v366_v60, 2 }
  0x37   : > { %v342_v25 = vrot.slane %v341_v61, 1  ;;  %v376_v26 = vrot.slane %v375_v62, 2  ;;  %v384_v27 = vadd.f32 %v383_v63, %v382_v55  ;;  %v391_v28 = vadd.f32 %v390_v0, %v389_v56 }
  0x38   : > { %v1446_v29 = vadd.f32 %v333_v1, %v332_v57  ;;  %v351_v5 = vrot.slane %v350_v2, 1  ;;  %v360_v30 = vrot.slane %v359_v3, 1  ;;  %v368_v31 = vadd.f32 %v367_v4, %v366_v60 }
  0x39   : > { %v1448_v32 = vadd.f32 %v342_v25, %v341_v61  ;;  %v377_v7 = vadd.f32 %v376_v26, %v375_v62  ;;  %v385_v33 = vrot.slane %v384_v27, 2  ;;  %v392_v8 = vrot.slane %v391_v28, 4 }
  0x3a   : > { %v1450_v34 = vadd.f32 %v351_v5, %v350_v2  ;;  %v1452_v6 = vadd.f32 %v360_v30, %v359_v3  ;;  %v369_v35 = vrot.slane %v368_v31, 1  ;;  %v398_v36 = vsel %vm325_vm0, %v1383_v9, 0.0 }
  0x3b   : > { %v378_v37 = vrot.slane %v377_v7, 1  ;;  %v386_v38 = vadd.f32 %v385_v33, %v384_v27  ;;  %v393_v39 = vadd.f32 %v392_v8, %v391_v28  ;;  %v399_v40 = vsel %vm325_vm0, %v1386_v10, 0.0 }
  0x3c   : > { %v1458_v41 = vadd.f32 %v369_v35, %v368_v31  ;;  %v400_v42 = vadd.f32 %v399_v40, %v398_v36  ;;  %v407_v43 = vsel %vm325_vm0, %v1389_v11, 0.0  ;;  %v408_v44 = vsel %vm325_vm0, %v1392_v12, 0.0 }
  0x3d   : > { %v1464_v45 = vadd.f32 %v378_v37, %v377_v7  ;;  %v387_v46 = vrot.slane %v386_v38, 1  ;;  %v394_v47 = vrot.slane %v393_v39, 2  ;;  %v409_v9 = vadd.f32 %v408_v44, %v407_v43 }
  0x3e   : > { %v401_v48 = vrot.slane %v400_v42, 4  ;;  %v416_v49 = vsel %vm325_vm0, %v1395_v13, 0.0  ;;  %v417_v10 = vsel %vm325_vm0, %v1398_v14, 0.0  ;;  %v425_v50 = vsel %vm325_vm0, %v1401_v15, 0.0 }
  0x3f   : > { %v1472_v51 = vadd.f32 %v387_v46, %v386_v38  ;;  %v395_v11 = vadd.f32 %v394_v47, %v393_v39  ;;  %v410_v52 = vrot.slane %v409_v9, 4  ;;  %v418_v12 = vadd.f32 %v417_v10, %v416_v49 }
  0x40   : > { %v402_v53 = vadd.f32 %v401_v48, %v400_v42  ;;  %v426_v54 = vsel %vm325_vm0, %v1404_v16, 0.0  ;;  %v434_v55 = vsel %vm325_vm0, %v1407_v17, 0.0  ;;  %v435_v13 = vsel %vm325_vm0, %v1410_v18, 0.0 }
  0x41   : > { %v396_v56 = vrot.slane %v395_v11, 1  ;;  %v411_v14 = vadd.f32 %v410_v52, %v409_v9  ;;  %v419_v57 = vrot.slane %v418_v12, 4  ;;  %v427_v58 = vadd.f32 %v426_v54, %v425_v50 }
  0x42   : > { %v403_v15 = vrot.slane %v402_v53, 2  ;;  %v436_v59 = vadd.f32 %v435_v13, %v434_v55  ;;  %v443_v60 = vsel %vm325_vm0, %v1413_v19, 0.0  ;;  %v444_v61 = vsel %vm325_vm0, %v1416_v20, 0.0 }
  0x43   : > { %v397_v62 = vadd.f32 %v396_v56, %v395_v11  ;;  %v412_v16 = vrot.slane %v411_v14, 2  ;;  %v420_v63 = vadd.f32 %v419_v57, %v418_v12  ;;  %v428_v0 = vrot.slane %v427_v58, 4 }
  0x44   : > { %v404_v17 = vadd.f32 %v403_v15, %v402_v53  ;;  %v437_v1 = vrot.slane %v436_v59, 4  ;;  %v445_v2 = vadd.f32 %v444_v61, %v443_v60  ;;  %v452_v18 = vsel %vm325_vm0, %v1419_v21, 0.0 }
  0x45   : > { %v413_v3 = vadd.f32 %v412_v16, %v411_v14  ;;  %v421_v4 = vrot.slane %v420_v63, 2  ;;  %v429_v25 = vadd.f32 %v428_v0, %v427_v58  ;;  %v453_v26 = vsel %vm325_vm0, %v1422_v22, 0.0 }
  0x46   : > { %v405_v19 = vrot.slane %v404_v17, 1  ;;  %v438_v27 = vadd.f32 %v437_v1, %v436_v59  ;;  %v446_v28 = vrot.slane %v445_v2, 4  ;;  %v454_v20 = vadd.f32 %v453_v26, %v452_v18 }
  0x47   : > { %v414_v5 = vrot.slane %v413_v3, 1  ;;  %v422_v30 = vadd.f32 %v421_v4, %v420_v63  ;;  %v430_v31 = vrot.slane %v429_v25, 2  ;;  %v461_v7 = vsel %vm325_vm0, %v1425_v23, 0.0 }
  0x48   : > { %v406_v33 = vadd.f32 %v405_v19, %v404_v17  ;;  %v439_v8 = vrot.slane %v438_v27, 2  ;;  %v447_v35 = vadd.f32 %v446_v28, %v445_v2  ;;  %v455_v21 = vrot.slane %v454_v20, 4 }
  0x49   : > { %v415_v36 = vadd.f32 %v414_v5, %v413_v3  ;;  %v423_v37 = vrot.slane %v422_v30, 1  ;;  %v431_v38 = vadd.f32 %v430_v31, %v429_v25  ;;  %v462_v22 = vsel %vm325_vm0, %v1428_v24, 0.0 }
  0x4a   : > { %v440_v39 = vadd.f32 %v439_v8, %v438_v27  ;;  %v448_v40 = vrot.slane %v447_v35, 2  ;;  %v456_v42 = vadd.f32 %v455_v21, %v454_v20  ;;  %v463_v43 = vadd.f32 %v462_v22, %v461_v7 }
  0x4b   : > { %v424_v44 = vadd.f32 %v423_v37, %v422_v30  ;;  %v432_v46 = vrot.slane %v431_v38, 1  ;;  %v1493_v47 = vmul.f32 0.25, %v1446_v29  ;;  %v1496_v23 = vmul.f32 0.25, %v1448_v32 }
  0x4c   : > { %v441_v9 = vrot.slane %v440_v39, 1  ;;  %v449_v48 = vadd.f32 %v448_v40, %v447_v35  ;;  %v457_v49 = vrot.slane %v456_v42, 2  ;;  %v464_v10 = vrot.slane %v463_v43, 4 }
  0x4d   : > { %v433_v50 = vadd.f32 %v432_v46, %v431_v38  ;;  %v1499_v11 = vmul.f32 0.25, %v1450_v34  ;;  %v1502_v24 = vmul.f32 0.25, %v1452_v6  ;;  %v1505_v52 = vmul.f32 0.25, %v1458_v41 }
  0x4e   : > { %v442_v12 = vadd.f32 %v441_v9, %v440_v39  ;;  %v450_v29 = vrot.slane %v449_v48, 1  ;;  %v458_v53 = vadd.f32 %v457_v49, %v456_v42  ;;  %v465_v54 = vadd.f32 %v464_v10, %v463_v43 }
  0x4f   : > { %v1508_v32 = vmul.f32 0.25, %v1464_v45  ;;  %v1511_v55 = vmul.f32 0.25, %v1472_v51  ;;  %v1513_v13 = vmul.f32 0.25, %v397_v62  ;;  %v1515_v34 = vmul.f32 0.25, %v406_v33 }
  0x50   : > { %v451_v56 = vadd.f32 %v450_v29, %v449_v48  ;;  %v459_v6 = vrot.slane %v458_v53, 1  ;;  %v466_v14 = vrot.slane %v465_v54, 2  ;;  %v1517_v57 = vmul.f32 0.25, %v415_v36 }
  0x51   : > { %v1519_v41 = vmul.f32 0.25, %v424_v44  ;;  %v1521_v58 = vmul.f32 0.25, %v433_v50  ;;  %v1523_v15 = vmul.f32 0.25, %v442_v12  ;;  %v486_v45 = vsel %vm325_vm0, %v1493_v47, -inf }
  0x52   : > { %v460_v51 = vadd.f32 %v459_v6, %v458_v53  ;;  %v467_v59 = vadd.f32 %v466_v14, %v465_v54  ;;  %v1527_v60 = vmul.f32 0.25, %v451_v56  ;;  %v487_v61 = vsel %vm325_vm0, %v1496_v23, -inf }
  0x53   : > { %v488_v62 = vsel %vm325_vm0, %v1499_v11, -inf  ;;  %v489_v16 = vsel %vm325_vm0, %v1502_v24, -inf  ;;  %v490_v63 = vsel %vm325_vm0, %v1505_v52, -inf  ;;  %v492_v0 = vsel %vm325_vm0, %v1508_v32, -inf }
  0x54   : > { %v468_v17 = vrot.slane %v467_v59, 1  ;;  %v1539_v1 = vmul.f32 0.25, %v460_v51  ;;  %v491_v2 = vmax.f32 %v486_v45, %v490_v63  ;;  %v493_v18 = vmax.f32 %v487_v61, %v492_v0 }
  0x55   : > { %v494_v3 = vsel %vm325_vm0, %v1511_v55, -inf  ;;  %v496_v4 = vsel %vm325_vm0, %v1513_v13, -inf  ;;  %v498_v25 = vsel %vm325_vm0, %v1515_v34, -inf  ;;  %v500_v26 = vsel %vm325_vm0, %v1517_v57, -inf }
  0x56   : > { %v469_v19 = vadd.f32 %v468_v17, %v467_v59  ;;  %v495_v27 = vmax.f32 %v488_v62, %v494_v3  ;;  %v497_v28 = vmax.f32 %v489_v16, %v496_v4  ;;  %v499_v20 = vmax.f32 %v491_v2, %v498_v25 }
  0x57   : > { %v501_v5 = vmax.f32 %v493_v18, %v500_v26  ;;  %v502_v30 = vsel %vm325_vm0, %v1519_v41, -inf  ;;  %v504_v31 = vsel %vm325_vm0, %v1521_v58, -inf  ;;  %v506_v7 = vsel %vm325_vm0, %v1523_v15, -inf }
  0x58   : > { %v485_v33 = vmul.f32 0.25, %v469_v19  ;;  %v503_v8 = vmax.f32 %v495_v27, %v502_v30  ;;  %v505_v35 = vmax.f32 %v497_v28, %v504_v31  ;;  %v507_v21 = vmax.f32 %v499_v20, %v506_v7 }
  0x59   : > { %v508_v36 = vsel %vm325_vm0, %v1527_v60, -inf  ;;  %v510_v37 = vsel %vm325_vm0, %v1539_v1, -inf }
  0x5a   : > { %v509_v38 = vmax.f32 %v501_v5, %v508_v36  ;;  %v511_v22 = vmax.f32 %v503_v8, %v510_v37  ;;  %v512_v39 = vsel %vm325_vm0, %v485_v33, -inf }
  0x5b   : > { %v513_v40 = vmax.f32 %v505_v35, %v512_v39 }
  0x5c   : > { %v514_v42 = vmax.f32 %v507_v21, %v509_v38 }
  0x5d   : > { %v515_v43 = vmax.f32 %v511_v22, %v513_v40 }
  0x5f   : > { %v516_v44 = vmax.f32 %v514_v42, %v515_v43 }
  0x61   : > { %v517_v46 = vsub.f32 %v1493_v47, %v516_v44  ;;  %v518_v9 = vsub.f32 %v1496_v23, %v516_v44  ;;  %v519_v48 = vsub.f32 %v1499_v11, %v516_v44  ;;  %v520_v49 = vsub.f32 %v1502_v24, %v516_v44 }
  0x62   : > { %v521_v10 = vsub.f32 %v1505_v52, %v516_v44  ;;  %v522_v50 = vsub.f32 %v1508_v32, %v516_v44  ;;  %v523_v12 = vsub.f32 %v1511_v55, %v516_v44  ;;  %v524_v56 = vsub.f32 %v1513_v13, %v516_v44 }
  0x63   : > { %v533_v29 = vmul.f32 1.442695, %v517_v46  ;;  %v535_v53 = vmul.f32 1.442695, %v518_v9  ;;  %v537_v54 = vmul.f32 1.442695, %v519_v48  ;;  %v525_v47 = vsub.f32 %v1515_v34, %v516_v44 }
  0x64   : > { %v539_v6 = vmul.f32 1.442695, %v520_v49  ;;  %v541_v23 = vmul.f32 1.442695, %v521_v10  ;;  %v526_v11 = vsub.f32 %v1517_v57, %v516_v44  ;;  %v543_v24 = vmul.f32 1.442695, %v522_v50 }
  0x65   : > { %1138 = vpow2.f32 %v533_v29  ;;  %v527_v52 = vsub.f32 %v1519_v41, %v516_v44  ;;  %v545_v32 = vmul.f32 1.442695, %v523_v12  ;;  %v528_v55 = vsub.f32 %v1521_v58, %v516_v44 }
  0x66   : > { %1140 = vpow2.f32 %v535_v53  ;;  %v547_v14 = vmul.f32 1.442695, %v524_v56  ;;  %v529_v45 = vsub.f32 %v1523_v15, %v516_v44  ;;  %v549_v13 = vmul.f32 1.442695, %v525_v47 }
  0x67   : > { %1142 = vpow2.f32 %v537_v54  ;;  %v530_v34 = vsub.f32 %v1527_v60, %v516_v44  ;;  %v551_v51 = vmul.f32 1.442695, %v526_v11  ;;  %v531_v57 = vsub.f32 %v1539_v1, %v516_v44 }
  0x68   : > { %1144 = vpow2.f32 %v539_v6  ;;  %v553_v59 = vmul.f32 1.442695, %v527_v52  ;;  %v532_v61 = vsub.f32 %v485_v33, %v516_v44  ;;  %v555_v41 = vmul.f32 1.442695, %v528_v55 }
  0x69   : > { %1146 = vpow2.f32 %v541_v23  ;;  %v557_v62 = vmul.f32 1.442695, %v529_v45  ;;  %v559_v58 = vmul.f32 1.442695, %v530_v34  ;;  %v561_v15 = vmul.f32 1.442695, %v531_v57 }
  0x6a   : > { %1148 = vpow2.f32 %v543_v24  ;;  %v563_v60 = vmul.f32 1.442695, %v532_v61  ;;  %v628_v45 = vlaneseq }
  0x6b   : > { %1150 = vpow2.f32 %v545_v32 }
  0x6c   : > { %1152 = vpow2.f32 %v547_v14  ;;  %v629_v34 = vshrl.u32 %v628_v45, 7 }
  0x6d   : > { %1154 = vpow2.f32 %v549_v13 }
  0x6e   : > { %1156 = vpow2.f32 %v551_v51 }
  0x6f   : > { %v1575_v16 = vpop.eup %1138  ;;  %1158 = vpow2.f32 %v553_v59  ;;  %v630_v59 = vsub.s32 0, %v629_v34 }
  0x70   : > { %v1577_v63 = vpop.eup %1140  ;;  %1160 = vpow2.f32 %v555_v41 }
  0x71   : > { %v1579_v0 = vpop.eup %1142  ;;  %1162 = vpow2.f32 %v557_v62  ;;  %v581_v17 = vrot.slane %v1577_v63, 7 }
  0x72   : > { %v1582_v1 = vpop.eup %1144  ;;  %1164 = vpow2.f32 %v559_v58  ;;  %v584_v2 = vrot.slane %v1579_v0, 6 }
  0x73   : > { %v1585_v18 = vpop.eup %1146  ;;  %1166 = vpow2.f32 %v561_v15  ;;  %v583_v3 = vsel %vm582_vm1, %v581_v17, %v1575_v16  ;;  %v587_v4 = vrot.slane %v1582_v1, 5 }
  0x74   : > { %v1590_v25 = vpop.eup %1148  ;;  %1168 = vpow2.f32 %v563_v60  ;;  %v586_v26 = vsel %vm585_vm2, %v584_v2, %v583_v3  ;;  %v590_v19 = vrot.slane %v1585_v18, 4 }
  0x75   : > { %v1594_v27 = vpop.eup %1150  ;;  %v589_v28 = vsel %vm588_vm3, %v587_v4, %v586_v26  ;;  %v593_v20 = vrot.slane %v1590_v25, 3 }
  0x76   : > { %v1598_v5 = vpop.eup %1152  ;;  %v592_v30 = vsel %vm591_vm4, %v590_v19, %v589_v28  ;;  %v596_v31 = vrot.slane %v1594_v27, 2 }
  0x77   : > { %v1602_v7 = vpop.eup %1154  ;;  %v595_v33 = vsel %vm594_vm5, %v593_v20, %v592_v30  ;;  %v599_v21 = vrot.slane %v1598_v5, 1 }
  0x78   : > { %v1605_v8 = vpop.eup %1156  ;;  %v598_v38 = vsel %vm597_vm6, %v596_v31, %v595_v33 }
  0x79   : > { %v1607_v35 = vpop.eup %1158  ;;  %v602_v36 = vrot.slane %v1605_v8, 7  ;;  %v601_v48 = vsel %vm600_vm7, %v599_v21, %v598_v38 }
  0x7a   : > { %v1611_v37 = vpop.eup %1160  ;;  %v604_v22 = vrot.slane %v1607_v35, 6  ;;  %v618_v6 = vsel %vm325_vm0, %v601_v48, 0.0 }
  0x7b   : > { %v1615_v39 = vpop.eup %1162  ;;  %v603_v40 = vsel %vm582_vm1, %v602_v36, %v1602_v7  ;;  %v606_v42 = vrot.slane %v1611_v37, 5 }
  0x7c   : > { %v1620_v43 = vpop.eup %1164  ;;  %v605_v44 = vsel %vm585_vm2, %v604_v22, %v603_v40  ;;  %v608_v46 = vrot.slane %v1615_v39, 4 }
  0x7d   : > { %v1624_v9 = vpop.eup %1166  ;;  %v607_v49 = vsel %vm588_vm3, %v606_v42, %v605_v44  ;;  %v610_v10 = vrot.slane %v1620_v43, 3 }
  0x7e   : > { %v1629_v50 = vpop.eup %1168  ;;  %v609_v12 = vsel %vm591_vm4, %v608_v46, %v607_v49  ;;  %v612_v29 = vrot.slane %v1624_v9, 2 }
  0x7f   : > { %v611_v53 = vsel %vm594_vm5, %v610_v10, %v609_v12  ;;  %v614_v54 = vrot.slane %v1629_v50, 1 }
  0x80   : > { %v613_v56 = vsel %vm597_vm6, %v612_v29, %v611_v53 }
  0x81   : > { %v615_v47 = vsel %vm600_vm7, %v614_v54, %v613_v56 }
  0x82   : > { %v619_v23 = vsel %vm325_vm0, %v615_v47, 0.0 }
  0x83   : > { %v620_v11 = vadd.f32 %v619_v23, %v618_v6 }
  0x85   : > { %v621_v24 = vrot.slane %v620_v11, 4 }
  0x87   : > { %v622_v52 = vadd.f32 %v621_v24, %v620_v11 }
  0x89   : > { %v623_v32 = vrot.slane %v622_v52, 2 }
  0x8b   : > { %v624_v55 = vadd.f32 %v623_v32, %v622_v52 }
  0x8d   : > { %v625_v14 = vrot.slane %v624_v55, 1 }
  0x8f   : > { %v626_v13 = vadd.f32 %v625_v14, %v624_v55  ;;  %v653_v51 = vpop.permute.xlu1 %652  ;;  %v1639_v57 = vpop.permute.xlu0 %760 }
  0x90   : > { %v658_v61 = vrot.slane %v653_v51, 1  ;;  %v659_v41 = vrot.slane %v653_v51, 2  ;;  %v660_v62 = vrot.slane %v653_v51, 3  ;;  %v661_v58 = vrot.slane %v653_v51, 4 }
  0x91   : > { %1170 = vrcp.f32 %v626_v13  ;;  %v662_v60 = vrot.slane %v653_v51, 5  ;;  %v663_v17 = vrot.slane %v653_v51, 6  ;;  %v664_v2 = vrot.slane %v653_v51, 7 }
  0x92   : > { %v765_v3 = vrot.slane %v1639_v57, 1  ;;  %v766_v4 = vrot.slane %v1639_v57, 2  ;;  %v767_v26 = vrot.slane %v1639_v57, 3  ;;  %v768_v19 = vrot.slane %v1639_v57, 4 }
  0x93   : > { %v1641_v15 = vpop.permute.xlu1 %656  ;;  %v769_v28 = vrot.slane %v1639_v57, 5  ;;  %v1648_v20 = vpop.permute.xlu0 %763  ;;  %v770_v30 = vrot.slane %v1639_v57, 6  ;;  %v771_v31 = vrot.slane %v1639_v57, 7 }
  0x94   : > { %v665_v33 = vrot.slane %v1641_v15, 1  ;;  %v666_v21 = vrot.slane %v1641_v15, 2  ;;  %v667_v38 = vrot.slane %v1641_v15, 3  ;;  %v668_v22 = vrot.slane %v1641_v15, 4 }
  0x95   : > { %v669_v40 = vrot.slane %v1641_v15, 5  ;;  %v670_v42 = vrot.slane %v1641_v15, 6  ;;  %v671_v46 = vrot.slane %v1641_v15, 7  ;;  %v772_v48 = vrot.slane %v1648_v20, 1 }
  0x96   : > { %v773_v49 = vrot.slane %v1648_v20, 2  ;;  %v774_v10 = vrot.slane %v1648_v20, 3  ;;  %v775_v12 = vrot.slane %v1648_v20, 4  ;;  %v776_v29 = vrot.slane %v1648_v20, 5 }
  0x97   : > { %v777_v53 = vrot.slane %v1648_v20, 6  ;;  %v778_v47 = vrot.slane %v1648_v20, 7 }
  0x9b   : > { %v1171_v36 = vpop.eup %1170 }
  0x9c   : > { %v631_v44 = vrot.slane %v1171_v36, %v630_v59 }
  0x9e   : > { %v633_v54 = vmul.f32 %v1577_v63, %v631_v44  ;;  %v634_v56 = vmul.f32 %v1579_v0, %v631_v44  ;;  %v635_v6 = vmul.f32 %v1582_v1, %v631_v44  ;;  %v632_v23 = vmul.f32 %v1575_v16, %v631_v44 }
  0x9f   : > { %v636_v11 = vmul.f32 %v1585_v18, %v631_v44  ;;  %v637_v24 = vmul.f32 %v1590_v25, %v631_v44  ;;  %v638_v52 = vmul.f32 %v1594_v27, %v631_v44  ;;  %v639_v32 = vmul.f32 %v1598_v5, %v631_v44 }
  0xa0   : > { %v689_v55 = vmul.f32 %v658_v61, %v633_v54  ;;  %v690_v14 = vmul.f32 %v659_v41, %v634_v56  ;;  %v691_v45 = vmul.f32 %v660_v62, %v635_v6  ;;  %v688_v63 = vmul.f32 %v653_v51, %v632_v23 }
  0xa1   : > { %v1674_v13 = vmul.f32 %v661_v58, %v636_v11  ;;  %v1676_v0 = vmul.f32 %v662_v60, %v637_v24  ;;  %v1678_v1 = vmul.f32 %v663_v17, %v638_v52  ;;  %v1680_v34 = vmul.f32 %v664_v2, %v639_v32 }
  0xa2   : > { %v720_v16 = vrot.slane %v689_v55, 7  ;;  %v722_v18 = vrot.slane %v690_v14, 6  ;;  %v724_v59 = vrot.slane %v691_v45, 5  ;;  %v795_v61 = vmul.f32 %v1639_v57, %v632_v23 }
  0xa3   : > { %v726_v25 = vrot.slane %v1674_v13, 4  ;;  %v728_v27 = vrot.slane %v1676_v0, 3  ;;  %v796_v41 = vmul.f32 %v765_v3, %v633_v54  ;;  %v797_v62 = vmul.f32 %v766_v4, %v634_v56 }
  0xa4   : > { %v721_v51 = vsel %vm582_vm1, %v720_v16, %v688_v63  ;;  %v798_v58 = vmul.f32 %v767_v26, %v635_v6  ;;  %v1688_v17 = vmul.f32 %v768_v19, %v636_v11  ;;  %v1690_v2 = vmul.f32 %v769_v28, %v637_v24 }
  0xa5   : > { %v723_v60 = vsel %vm585_vm2, %v722_v18, %v721_v51  ;;  %v1692_v36 = vmul.f32 %v770_v30, %v638_v52  ;;  %v732_v55 = vrot.slane %v1680_v34, 1  ;;  %v1695_v14 = vmul.f32 %v771_v31, %v639_v32 }
  0xa6   : > { %v827_v45 = vrot.slane %v796_v41, 7  ;;  %v829_v5 = vrot.slane %v797_v62, 6  ;;  %v725_v57 = vsel %vm588_vm3, %v724_v59, %v723_v60  ;;  %v831_v23 = vrot.slane %v798_v58, 5 }
  0xa7   : > { %v833_v3 = vrot.slane %v1688_v17, 4  ;;  %v835_v4 = vrot.slane %v1690_v2, 3  ;;  %v837_v19 = vrot.slane %v1692_v36, 2  ;;  %v640_v28 = vmul.f32 %v1602_v7, %v631_v44 }
  0xa8   : > { %v828_v26 = vsel %vm582_vm1, %v827_v45, %v795_v61  ;;  %v641_v30 = vmul.f32 %v1605_v8, %v631_v44  ;;  %v642_v54 = vmul.f32 %v1607_v35, %v631_v44  ;;  %v643_v56 = vmul.f32 %v1611_v37, %v631_v44 }
  0xa9   : > { %v830_v31 = vsel %vm585_vm2, %v829_v5, %v828_v26  ;;  %v644_v6 = vmul.f32 %v1615_v39, %v631_v44  ;;  %v839_v11 = vrot.slane %v1695_v14, 1  ;;  %v645_v24 = vmul.f32 %v1620_v43, %v631_v44 }
  0xaa   : > { %v646_v52 = vmul.f32 %v1624_v9, %v631_v44  ;;  %v647_v32 = vmul.f32 %v1629_v50, %v631_v44  ;;  %v832_v7 = vsel %vm588_vm3, %v831_v23, %v830_v31  ;;  %v697_v8 = vmul.f32 %v665_v33, %v641_v30 }
  0xab   : > { %v698_v35 = vmul.f32 %v666_v21, %v642_v54  ;;  %v699_v37 = vmul.f32 %v667_v38, %v643_v56  ;;  %v696_v39 = vmul.f32 %v1641_v15, %v640_v28  ;;  %v700_v43 = vmul.f32 %v668_v22, %v644_v6 }
  0xac   : > { %v701_v9 = vmul.f32 %v669_v40, %v645_v24  ;;  %v702_v50 = vmul.f32 %v670_v42, %v646_v52  ;;  %v703_v33 = vmul.f32 %v671_v46, %v647_v32  ;;  %v734_v44 = vrot.slane %v697_v8, 7 }
  0xad   : > { %v736_v63 = vrot.slane %v698_v35, 6  ;;  %v738_v21 = vrot.slane %v699_v37, 5  ;;  %v740_v16 = vrot.slane %v700_v43, 4  ;;  %v803_v59 = vmul.f32 %v1648_v20, %v640_v28 }
  0xae   : > { %v742_v18 = vrot.slane %v701_v9, 3  ;;  %v744_v38 = vrot.slane %v702_v50, 2  ;;  %v735_v5 = vsel %vm582_vm1, %v734_v44, %v696_v39  ;;  %v804_v22 = vmul.f32 %v772_v48, %v641_v30 }
  0xaf   : > { %v805_v40 = vmul.f32 %v773_v49, %v642_v54  ;;  %v806_v15 = vmul.f32 %v774_v10, %v643_v56  ;;  %v737_v42 = vsel %vm585_vm2, %v736_v63, %v735_v5  ;;  %v807_v46 = vmul.f32 %v775_v12, %v644_v6 }
  0xb0   : > { %v808_v61 = vmul.f32 %v776_v29, %v645_v24  ;;  %v809_v51 = vmul.f32 %v777_v53, %v646_v52  ;;  %v739_v41 = vsel %vm588_vm3, %v738_v21, %v737_v42  ;;  %v746_v48 = vrot.slane %v703_v33, 1 }
  0xb1   : > { %v841_v62 = vrot.slane %v804_v22, 7  ;;  %v843_v58 = vrot.slane %v805_v40, 6  ;;  %v741_v49 = vsel %vm591_vm4, %v740_v16, %v739_v41  ;;  %v810_v10 = vmul.f32 %v778_v47, %v647_v32 }
  0xb2   : > { %v845_v60 = vrot.slane %v806_v15, 5  ;;  %v847_v17 = vrot.slane %v807_v46, 4  ;;  %v743_v12 = vsel %vm594_vm5, %v742_v18, %v741_v49  ;;  %v849_v29 = vrot.slane %v808_v61, 3 }
  0xb3   : > { %v842_v2 = vsel %vm582_vm1, %v841_v62, %v803_v59  ;;  %v851_v36 = vrot.slane %v809_v51, 2  ;;  %v727_v14 = vsel %vm591_vm4, %v726_v25, %v725_v57  ;;  %v745_v45 = vsel %vm597_vm6, %v744_v38, %v743_v12 }
  0xb4   : > { %v844_v53 = vsel %vm585_vm2, %v843_v58, %v842_v2  ;;  %v834_v23 = vsel %vm591_vm4, %v833_v3, %v832_v7  ;;  %v729_v47 = vsel %vm594_vm5, %v728_v27, %v727_v14  ;;  %v747_v26 = vsel %vm600_vm7, %v746_v48, %v745_v45 }
  0xb5   : > { %v846_v20 = vsel %vm588_vm3, %v845_v60, %v844_v53  ;;  %v836_v28 = vsel %vm594_vm5, %v835_v4, %v834_v23  ;;  %v1835_v13 = vrot.slane %v1678_v1, 2  ;;  %v751_v57 = vsel %vm325_vm0, %v747_v26, 0.0 }
  0xb6   : > { %v848_v30 = vsel %vm591_vm4, %v847_v17, %v846_v20  ;;  %v838_v3 = vsel %vm597_vm6, %v837_v19, %v836_v28  ;;  %v853_v0 = vrot.slane %v810_v10, 1 }
  0xb7   : > { %v731_v25 = vsel %vm597_vm6, %v1835_v13, %v729_v47  ;;  %v850_v31 = vsel %vm594_vm5, %v849_v29, %v848_v30  ;;  %v840_v4 = vsel %vm600_vm7, %v839_v11, %v838_v3 }
  0xb8   : > { %v733_v27 = vsel %vm600_vm7, %v732_v55, %v731_v25  ;;  %v852_v1 = vsel %vm597_vm6, %v851_v36, %v850_v31  ;;  %v857_v24 = vsel %vm325_vm0, %v840_v4, 0.0 }
  0xb9   : > { %v750_v54 = vsel %vm325_vm0, %v733_v27, 0.0  ;;  %v854_v6 = vsel %vm600_vm7, %v853_v0, %v852_v1 }
  0xba   : > { %v752_v56 = vadd.f32 %v751_v57, %v750_v54  ;;  %v858_v19 = vsel %vm325_vm0, %v854_v6, 0.0 }
  0xbb   : > { %v859_v32 = vadd.f32 %v858_v19, %v857_v24 }
  0xbc   : > { %v753_v52 = vrot.slane %v752_v56, 4 }
  0xbd   : > { %v860_v34 = vrot.slane %v859_v32, 4 }
  0xbe   : > { %v754_v7 = vadd.f32 %v753_v52, %v752_v56 }
  0xbf   : > { %v861_v8 = vadd.f32 %v860_v34, %v859_v32 }
  0xc0   : > { %v755_v55 = vrot.slane %v754_v7, 2 }
  0xc1   : > { %v862_v35 = vrot.slane %v861_v8, 2 }
  0xc2   : > { %v756_v11 = vadd.f32 %v755_v55, %v754_v7 }
  0xc3   : > { %v863_v37 = vadd.f32 %v862_v35, %v861_v8 }
  0xc4   : > { %v757_v39 = vrot.slane %v756_v11, 1 }
  0xc5   : > { %v864_v43 = vrot.slane %v863_v37, 1 }
  0xc6   : > { %v758_v50 = vadd.f32 %v757_v39, %v756_v11 }
  0xc7   : > { %v865_v9 = vadd.f32 %v864_v43, %v863_v37 }
  0xc9   : > { %v867_v33 = vrot.slane %v865_v9, 7 }
  0xcb   : > { %v870_v44 = vsel %vm869_vm8, %v758_v50, %v867_v33 }
  0xcc   : > { %872 = vst.msk [vmem:[%s208_s23] sm:$0x3] %vm871_vm9, %v870_v44 }
  0xcd   : > { %1185 = shalt.err (!%p1182_p5)
}
  0xce   : > { %s1186_s7 = scalar_lea.hbm %s1782_s29, 32  ;;  %s1190_s10 = scalar_lea.hbm %s1832_s3, 64 }
  0xcf   : > { %p1187_p6 = scmp.ne.s32.totalorder %s1782_s29, %s1186_s7  ;;  %p1191_p10 = scmp.lt.u32.totalorder %s1782_s29, %s1832_s3 }
  0xd0   : > { %p1192_p11 = scmp.lt.u32.totalorder %s1190_s10, %s1186_s7  ;;  %p1194_p13 = scmp.lt.u32.totalorder %s1186_s7, %s1782_s29 }
  0xd1   : > { %p1188_p7 = pnand %p1187_p6, %p1315_p4 }
  0xd2   : > { %p1193_p12 = por %p1192_p11, %p1191_p10 }
  0xd3   : > { %p1189_p9 = pneg %p1188_p7 }
  0xd4   : > { %p1195_p0 = por %p1194_p13, %p1193_p12 }
  0xd6   : > { %p1196_p1 = pnand %p1195_p0, %p1189_p9 }
  0xd8   : > { %1199 = shalt.err (!%p1196_p1)
}
  0xd9   : > { %1079 = dma.vmem_to_hbm [thread:$0]  (%p1315_p4), %s1784_s26, 32, %s1782_s29, %s874_s30  }
  0xda PF: > { %p1085_p2 = scmp.ge.s32.totalorder %s1250_s17, 2  ;;  %s900_s19 = sand.u32 1, %s1230_s12  }
  0xdb   : > { %s901_s21 = scalar_lea.sflag [#allocation3], %s900_s19 }
  0xdc   : > { %p1082_p3 = pnand %p1085_p2, %p1322_p8 }
  0xde   : > { %1225 = dma.done.wait (!%p1082_p3), %s901_s21, 32  }
  0xdf   : > { %1227 = vsyncadd (!%p1082_p3), %s901_s21, 4294967264  ;;  %s16_s17 = sadd.s32 1, %s1250_s17   ;;  %s1836_s12 = smov %s1234_s13 }
  0xe0   : > { %p13_p5 = scmp.ge.s32.totalorder %s16_s17, 4   ;;  %s1837_s13 = smov %s1238_s14 }
  0xe1   : > { %s1838_s14 = smov %s1328_s25  ;;  %s1839_s15 = smov %s1246_s16 }
  0xe2   : > { %s1840_s16 = smov %s1842_s20  ;;  %15 = sbr.rel (!%p13_p5) target bundleno = 4 (0x4), region = 70 }
  0xe9   :  { %906 = vsyncpa [#allocation3], 1 }
  0xea   :  { %908 = vsyncpa [#allocation3 + $0x1], 1 }

</bundles_post_ra>
